<compile_context>
chip_gen: v7x
topology: tpu7x:2x2x1
jax: 0.10.0
libtpu: 0.0.40
codegen_flags: <defaults>
</compile_context>

<pallas_src>
import functools
import math

import jax
import jax.numpy as jnp
import numpy as np
from jax.experimental import pallas as pl
from jax.experimental.pallas import tpu as pltpu

_INV_SQRT2 = 1.0 / math.sqrt(2.0)


# ---------------------------------------------------------------------------
# Shared in-kernel attention core: learned prototype queries cross-attend over
# per-batch features.  Everything is 2-D full-width matmuls (MXU), rowwise
# softmax (VPU/EUP) and static sublane/lane slices — no in-kernel transposes,
# no activation reshapes splitting the lane dim, no per-head matmul loops.
# ---------------------------------------------------------------------------
def _attend(kv, block_b, nk, qbd_ref, hm_ref, bias_ref,
            wk_ref, bk_ref, wv_ref, bv_ref, wo_ref, bo_ref,
            o_ref, matmul_dtype):
    # kv       : [block_b * nk, D] f32 features (resident in vregs/VMEM)
    # qbd_ref  : [H*Nq, D]   block-diagonal, pre-scaled queries (matmul_dtype)
    # hm_ref   : [H, 1, D]   per-head lane mask (f32)
    # bias_ref : [block_b, 1, nk] additive key-padding bias (f32)
    # wk/wv/wo : [D, D] (matmul_dtype), bk/bv/bo : [1, D] (f32)
    # o_ref    : [block_b, Nq, D]
    H = hm_ref.shape[0]
    HNq, D = qbd_ref.shape
    Nq = HNq // H

    kv_m = kv.astype(matmul_dtype)
    # Full-width K/V projections: single lane-dense matmuls, f32 accumulation.
    k = jnp.dot(kv_m, wk_ref[...], preferred_element_type=jnp.float32) + bk_ref[...]
    v = jnp.dot(kv_m, wv_ref[...], preferred_element_type=jnp.float32) + bv_ref[...]

    qbd = qbd_ref[...]
    hm = hm_ref[...]
    wo = wo_ref[...]
    bo = bo_ref[...]

    for b in range(block_b):                       # static, small batch block
        k_b = k[b * nk:(b + 1) * nk, :].astype(matmul_dtype)   # [nk, D]
        v_b = v[b * nk:(b + 1) * nk, :].astype(matmul_dtype)   # [nk, D]

        # All-head scores in ONE lane-dense matmul (block-diagonal queries):
        #   S[h*Nq+q, j] = sum_{d in head h} q[h,q,d] * k_b[j, h*dh+d]
        s = jax.lax.dot_general(qbd, k_b, (((1,), (1,)), ((), ())),
                                preferred_element_type=jnp.float32)  # [H*Nq, nk]
        s = s + bias_ref[b]                        # additive key-padding mask
        # NOTE: fully-masked rows give a uniform distribution here, whereas
        # PyTorch nn.MultiheadAttention would produce NaNs for that edge case.
        s = s - jnp.max(s, axis=-1, keepdims=True)
        e = jnp.exp(s)
        a = e * pl.reciprocal(jnp.sum(e, axis=-1, keepdims=True), approx=True)

        # Attention applied with a single full-width matmul ...
        o_wide = jnp.dot(a.astype(matmul_dtype), v_b,
                         preferred_element_type=jnp.float32)         # [H*Nq, D]
        # ... then extract the per-head block diagonal (== concat-of-heads).
        out_pre = o_wide[0:Nq, :] * hm[0]
        for h in range(1, H):
            out_pre = out_pre + o_wide[h * Nq:(h + 1) * Nq, :] * hm[h]

        # Output projection: one full-width matmul; no [H, Nq, D] temporary,
        # no head-sum reduction.
        out_b = jnp.dot(out_pre.astype(matmul_dtype), wo,
                        preferred_element_type=jnp.float32) + bo
        o_ref[b] = out_b.astype(o_ref.dtype)


# ---------------------------------------------------------------------------
# Kernel 1 (fused): img_fea_module (Linear + GELU(erf) + LayerNorm) followed
# directly by img_distill attention — projected features never leave VMEM.
# ---------------------------------------------------------------------------
def _img_ctx_kernel(x_ref, w_ref, b_ref, g_ref, beta_ref,
                    qbd_ref, hm_ref, bias_ref,
                    wk_ref, bk_ref, wv_ref, bv_ref, wo_ref, bo_ref,
                    o_ref, *, matmul_dtype):
    Bt, N, F = x_ref.shape
    x = x_ref[...].reshape(Bt * N, F).astype(matmul_dtype)   # fill sublanes
    h = jnp.dot(x, w_ref[...], preferred_element_type=jnp.float32) + b_ref[...]
    # exact GELU (PyTorch nn.GELU default: erf form), f32
    h = 0.5 * h * (1.0 + jax.lax.erf(h * _INV_SQRT2))
    # LayerNorm over last dim, eps=1e-5, biased variance (PyTorch default), f32
    mu = jnp.mean(h, axis=-1, keepdims=True)
    var = jnp.mean((h - mu) ** 2, axis=-1, keepdims=True)
    kv = (h - mu) * jax.lax.rsqrt(var + 1e-5) * g_ref[...] + beta_ref[...]

    _attend(kv, Bt, N, qbd_ref, hm_ref, bias_ref,
            wk_ref, bk_ref, wv_ref, bv_ref, wo_ref, bo_ref,
            o_ref, matmul_dtype)


# ---------------------------------------------------------------------------
# Kernel 2: txt_distill attention over precomputed text features.
# ---------------------------------------------------------------------------
def _txt_ctx_kernel(kv_ref, qbd_ref, hm_ref, bias_ref,
                    wk_ref, bk_ref, wv_ref, bv_ref, wo_ref, bo_ref,
                    o_ref, *, matmul_dtype):
    Bt, Nk, D = kv_ref.shape
    kv = kv_ref[...].reshape(Bt * Nk, D)
    _attend(kv, Bt, Nk, qbd_ref, hm_ref, bias_ref,
            wk_ref, bk_ref, wv_ref, bv_ref, wo_ref, bo_ref,
            o_ref, matmul_dtype)


# ---------------------------------------------------------------------------
# Host-side helpers (run once, outside the grid).
# ---------------------------------------------------------------------------
def _head_mask(D, num_head):
    dh = D // num_head
    col_head = jnp.arange(D) // dh
    return (col_head[None, :] == jnp.arange(num_head)[:, None]).astype(jnp.float32)


def _blockdiag_queries(proto, wq, bq, num_head):
    # Hoisted, batch-invariant Q projection with 1/sqrt(dh) folded in, laid out
    # block-diagonally so all heads' scores come from one full-width matmul.
    Nq, D = proto.shape
    dh = D // num_head
    q = (proto @ wq + bq) * (1.0 / math.sqrt(dh))               # [Nq, D]
    hm = _head_mask(D, num_head)                                # [H, D]
    qbd = (q[None, :, :] * hm[:, None, :]).reshape(num_head * Nq, D)
    return qbd, hm[:, None, :]                                  # [H*Nq, D], [H,1,D]


def _mask_to_bias(mask):
    # mask: [B, Nk], 1 = valid token, 0 = padding -> additive bias [B, 1, Nk]
    return jnp.where(mask[:, None, :] > 0.5, 0.0, -1e9).astype(jnp.float32)


def _fixed_spec(shape):
    return pl.BlockSpec(shape, lambda i, _n=len(shape): (0,) * _n)


def _compiler_params():
    return pltpu.CompilerParams(dimension_semantics=("parallel",),
                                vmem_limit_bytes=32 * 1024 * 1024)


# ---------------------------------------------------------------------------
# pallas_call wrappers
# ---------------------------------------------------------------------------
def img_ctx_feature(ctx_img, img_w, img_b, ln_g, ln_b, proto, mha_params, mask,
                    num_head, *, block_b=2, matmul_dtype=jnp.float32):
    B, N, F = ctx_img.shape
    D = img_w.shape[1]
    H = num_head
    Nq = proto.shape[0]
    block_b = min(block_b, B)
    assert B % block_b == 0

    wq, bq, wk, bk, wv, bv, wo, bo = mha_params
    qbd, hm = _blockdiag_queries(proto, wq, bq, H)
    bias = _mask_to_bias(mask)

    kernel = functools.partial(_img_ctx_kernel, matmul_dtype=matmul_dtype)
    return pl.pallas_call(
        kernel,
        out_shape=jax.ShapeDtypeStruct((B, Nq, D), jnp.float32),
        grid=(B // block_b,),
        in_specs=[
            pl.BlockSpec((block_b, N, F), lambda i: (i, 0, 0)),
            _fixed_spec((F, D)),
            _fixed_spec((1, D)), _fixed_spec((1, D)), _fixed_spec((1, D)),
            _fixed_spec((H * Nq, D)),
            _fixed_spec((H, 1, D)),
            pl.BlockSpec((block_b, 1, N), lambda i: (i, 0, 0)),
            _fixed_spec((D, D)), _fixed_spec((1, D)),
            _fixed_spec((D, D)), _fixed_spec((1, D)),
            _fixed_spec((D, D)), _fixed_spec((1, D)),
        ],
        out_specs=pl.BlockSpec((block_b, Nq, D), lambda i: (i, 0, 0)),
        compiler_params=_compiler_params(),
    )(ctx_img,
      img_w.astype(matmul_dtype), img_b, ln_g, ln_b,
      qbd.astype(matmul_dtype), hm, bias,
      wk.astype(matmul_dtype), bk,
      wv.astype(matmul_dtype), bv,
      wo.astype(matmul_dtype), bo)


def txt_ctx_feature(txt_features, proto, mha_params, mask, num_head,
                    *, block_b=2, matmul_dtype=jnp.float32):
    B, Nk, D = txt_features.shape
    H = num_head
    Nq = proto.shape[0]
    block_b = min(block_b, B)
    assert B % block_b == 0

    wq, bq, wk, bk, wv, bv, wo, bo = mha_params
    qbd, hm = _blockdiag_queries(proto, wq, bq, H)
    bias = _mask_to_bias(mask)

    kernel = functools.partial(_txt_ctx_kernel, matmul_dtype=matmul_dtype)
    return pl.pallas_call(
        kernel,
        out_shape=jax.ShapeDtypeStruct((B, Nq, D), jnp.float32),
        grid=(B // block_b,),
        in_specs=[
            pl.BlockSpec((block_b, Nk, D), lambda i: (i, 0, 0)),
            _fixed_spec((H * Nq, D)),
            _fixed_spec((H, 1, D)),
            pl.BlockSpec((block_b, 1, Nk), lambda i: (i, 0, 0)),
            _fixed_spec((D, D)), _fixed_spec((1, D)),
            _fixed_spec((D, D)), _fixed_spec((1, D)),
            _fixed_spec((D, D)), _fixed_spec((1, D)),
        ],
        out_specs=pl.BlockSpec((block_b, Nq, D), lambda i: (i, 0, 0)),
        compiler_params=_compiler_params(),
    )(txt_features,
      qbd.astype(matmul_dtype), hm, bias,
      wk.astype(matmul_dtype), bk,
      wv.astype(matmul_dtype), bv,
      wo.astype(matmul_dtype), bo)


# ---------------------------------------------------------------------------
# VCLM.get_ctx_feature (use_know=False)
# ---------------------------------------------------------------------------
def vclm_get_ctx_feature(params, ctx_img, ctx_img_mask, txt_features,
                         ctx_text_mask, num_head, *, block_b=2,
                         matmul_dtype=jnp.float32):
    img_out = img_ctx_feature(ctx_img, params["img_w"], params["img_b"],
                              params["ln_g"], params["ln_b"],
                              params["img_proto"], params["img_mha"],
                              ctx_img_mask, num_head,
                              block_b=block_b, matmul_dtype=matmul_dtype)
    txt_out = txt_ctx_feature(txt_features, params["txt_proto"],
                              params["txt_mha"], ctx_text_mask, num_head,
                              block_b=block_b, matmul_dtype=matmul_dtype)
    return img_out, txt_out


# ---------------------------------------------------------------------------
# Pure-JAX reference (same semantics) for correctness checks.
# ---------------------------------------------------------------------------
def _ref_img_fea(x, w, b, g, beta):
    h = x @ w + b
    h = 0.5 * h * (1.0 + jax.lax.erf(h / math.sqrt(2.0)))
    mu = h.mean(-1, keepdims=True)
    var = ((h - mu) ** 2).mean(-1, keepdims=True)
    return (h - mu) / jnp.sqrt(var + 1e-5) * g + beta


def _ref_mha(proto, feats, mask, params, H):
    wq, bq, wk, bk, wv, bv, wo, bo = params
    B, Nk, D = feats.shape
    Nq = proto.shape[0]
    dh = D // H
    q = (proto @ wq + bq).reshape(Nq, H, dh)
    k = (feats @ wk + bk[0]).reshape(B, Nk, H, dh)
    v = (feats @ wv + bv[0]).reshape(B, Nk, H, dh)
    s = jnp.einsum("qhd,bkhd->bhqk", q, k) / math.sqrt(dh)
    s = jnp.where(mask[:, None, None, :] > 0.5, s, -1e9)
    a = jax.nn.softmax(s, axis=-1)
    o = jnp.einsum("bhqk,bkhd->bqhd", a, v).reshape(B, Nq, D)
    return o @ wo + bo[0]


# ---------------------------------------------------------------------------
if __name__ == "__main__":
    # small, deterministic config
    B, N_IMG, F_IMG = 4, 16, 64          # batch, #image regions, img_fea_size
    D, H = 32, 4                         # common_size, num_head
    L_TXT = 8                            # text length (post-BERT features)
    N_IMG_PROTO, N_TXT_PROTO = 80, 40
    BLOCK_B = 2                          # batch elements per grid step (grid=2)

    key = jax.random.PRNGKey(0)
    ks = jax.random.split(key, 20)

    def nrm(k, shape, scale=0.05):
        return (scale * jax.random.normal(k, shape)).astype(jnp.float32)

    def mha_params(k0):
        kk = jax.random.split(k0, 8)
        return (nrm(kk[0], (D, D)), nrm(kk[1], (1, D)),
                nrm(kk[2], (D, D)), nrm(kk[3], (1, D)),
                nrm(kk[4], (D, D)), nrm(kk[5], (1, D)),
                nrm(kk[6], (D, D)), nrm(kk[7], (1, D)))

    params = {
        "img_w": nrm(ks[0], (F_IMG, D)),
        "img_b": nrm(ks[1], (1, D)),
        "ln_g": jnp.ones((1, D), jnp.float32),
        "ln_b": jnp.zeros((1, D), jnp.float32),
        "img_proto": nrm(ks[2], (N_IMG_PROTO, D), scale=1.0),   # normal_ init
        "txt_proto": nrm(ks[3], (N_TXT_PROTO, D), scale=1.0),
        "img_mha": mha_params(ks[4]),
        "txt_mha": mha_params(ks[5]),
    }

    ctx_img = nrm(ks[6], (B, N_IMG, F_IMG), scale=1.0)
    txt_features = nrm(ks[7], (B, L_TXT, D), scale=1.0)  # stands in for BERT output
    # masks: 1 = valid token, 0 = padding
    ctx_img_mask = jnp.concatenate(
        [jnp.ones((B, N_IMG - 3)), jnp.zeros((B, 3))], axis=1).astype(jnp.float32)
    ctx_text_mask = jnp.concatenate(
        [jnp.ones((B, L_TXT - 2)), jnp.zeros((B, 2))], axis=1).astype(jnp.float32)

    # references
    img_proj_ref = _ref_img_fea(ctx_img, params["img_w"], params["img_b"],
                                params["ln_g"], params["ln_b"])
    img_ref = _ref_mha(params["img_proto"], img_proj_ref, ctx_img_mask,
                       params["img_mha"], H)
    txt_ref = _ref_mha(params["txt_proto"], txt_features, ctx_text_mask,
                       params["txt_mha"], H)

    # f32 MXU operands: strict check
    img_out, txt_out = vclm_get_ctx_feature(
        params, ctx_img, ctx_img_mask, txt_features, ctx_text_mask, H,
        block_b=BLOCK_B, matmul_dtype=jnp.float32)
    jax.block_until_ready((img_out, txt_out))
    np.testing.assert_allclose(np.asarray(img_out), np.asarray(img_ref),
                               rtol=1e-3, atol=1e-3)
    np.testing.assert_allclose(np.asarray(txt_out), np.asarray(txt_ref),
                               rtol=1e-3, atol=1e-3)

    # bf16 MXU operands (v6e/v7x fast path), f32 accumulation: looser check
    img_bf, txt_bf = vclm_get_ctx_feature(
        params, ctx_img, ctx_img_mask, txt_features, ctx_text_mask, H,
        block_b=BLOCK_B, matmul_dtype=jnp.bfloat16)
    jax.block_until_ready((img_bf, txt_bf))
    np.testing.assert_allclose(np.asarray(img_bf), np.asarray(img_ref),
                               rtol=5e-2, atol=5e-2)
    np.testing.assert_allclose(np.asarray(txt_bf), np.asarray(txt_ref),
                               rtol=5e-2, atol=5e-2)

    print("KERNEL_OK")
</pallas_src>

<mosaic_0001>
module attributes {stable_mosaic.version = 11 : i64} {
  func.func @_img_ctx_kernel(%arg0: i32, %arg1: memref<2x16x64xf32, #tpu.memory_space<vmem>>, %arg2: memref<64x32xf32, #tpu.memory_space<vmem>>, %arg3: memref<1x32xf32, #tpu.memory_space<vmem>>, %arg4: memref<1x32xf32, #tpu.memory_space<vmem>>, %arg5: memref<1x32xf32, #tpu.memory_space<vmem>>, %arg6: memref<320x32xf32, #tpu.memory_space<vmem>>, %arg7: memref<4x1x32xf32, #tpu.memory_space<vmem>>, %arg8: memref<2x1x16xf32, #tpu.memory_space<vmem>>, %arg9: memref<32x32xf32, #tpu.memory_space<vmem>>, %arg10: memref<1x32xf32, #tpu.memory_space<vmem>>, %arg11: memref<32x32xf32, #tpu.memory_space<vmem>>, %arg12: memref<1x32xf32, #tpu.memory_space<vmem>>, %arg13: memref<32x32xf32, #tpu.memory_space<vmem>>, %arg14: memref<1x32xf32, #tpu.memory_space<vmem>>, %arg15: memref<2x80x32xf32, #tpu.memory_space<vmem>>) attributes {dimension_semantics = [#tpu.dimension_semantics<parallel>], iteration_bounds = array<i64: 2>, scalar_prefetch = 0 : i64, scratch_operands = 0 : i64, tpu.core_type = #tpu.core_type<tc>, window_params = [{transform_indices = @transform_0, window_bounds = array<i64: 2, 16, 64>}, {pipeline_mode = #tpu.pipeline_mode<synchronous>, transform_indices = @transform_1, window_bounds = array<i64: 64, 32>}, {pipeline_mode = #tpu.pipeline_mode<synchronous>, transform_indices = @transform_2, window_bounds = array<i64: 1, 32>}, {pipeline_mode = #tpu.pipeline_mode<synchronous>, transform_indices = @transform_3, window_bounds = array<i64: 1, 32>}, {pipeline_mode = #tpu.pipeline_mode<synchronous>, transform_indices = @transform_4, window_bounds = array<i64: 1, 32>}, {pipeline_mode = #tpu.pipeline_mode<synchronous>, transform_indices = @transform_5, window_bounds = array<i64: 320, 32>}, {pipeline_mode = #tpu.pipeline_mode<synchronous>, transform_indices = @transform_6, window_bounds = array<i64: 4, 1, 32>}, {transform_indices = @transform_7, window_bounds = array<i64: 2, 1, 16>}, {pipeline_mode = #tpu.pipeline_mode<synchronous>, transform_indices = @transform_8, window_bounds = array<i64: 32, 32>}, {pipeline_mode = #tpu.pipeline_mode<synchronous>, transform_indices = @transform_9, window_bounds = array<i64: 1, 32>}, {pipeline_mode = #tpu.pipeline_mode<synchronous>, transform_indices = @transform_10, window_bounds = array<i64: 32, 32>}, {pipeline_mode = #tpu.pipeline_mode<synchronous>, transform_indices = @transform_11, window_bounds = array<i64: 1, 32>}, {pipeline_mode = #tpu.pipeline_mode<synchronous>, transform_indices = @transform_12, window_bounds = array<i64: 32, 32>}, {pipeline_mode = #tpu.pipeline_mode<synchronous>, transform_indices = @transform_13, window_bounds = array<i64: 1, 32>}, {transform_indices = @transform_14, window_bounds = array<i64: 2, 80, 32>}]} {
    %c0 = arith.constant 0 : index
    %c0_0 = arith.constant 0 : index
    %c0_1 = arith.constant 0 : index
    %0 = vector.load %arg1[%c0, %c0_0, %c0_1] : memref<2x16x64xf32, #tpu.memory_space<vmem>>, vector<2x16x64xf32>
    %1 = vector.shape_cast %0 : vector<2x16x64xf32> to vector<32x64xf32>
    %c0_2 = arith.constant 0 : index
    %c0_3 = arith.constant 0 : index
    %2 = vector.load %arg2[%c0_2, %c0_3] : memref<64x32xf32, #tpu.memory_space<vmem>>, vector<64x32xf32>
    %cst = arith.constant dense<0.000000e+00> : vector<32x32xf32>
    %3 = tpu.matmul %1, %2, %cst {dimension_numbers = #tpu.dot_dimension_numbers<[1], [0], [0], [1], [0, 0, 1, 1], [], []>} : vector<32x64xf32>, vector<64x32xf32>, vector<32x32xf32> -> vector<32x32xf32>
    %c0_4 = arith.constant 0 : index
    %c0_5 = arith.constant 0 : index
    %4 = vector.load %arg3[%c0_4, %c0_5] : memref<1x32xf32, #tpu.memory_space<vmem>>, vector<1x32xf32>
    %5 = vector.broadcast %4 : vector<1x32xf32> to vector<32x32xf32>
    %6 = arith.addf %3, %5 : vector<32x32xf32>
    %cst_6 = arith.constant 5.000000e-01 : f32
    %7 = vector.broadcast %cst_6 : f32 to vector<32x32xf32>
    %8 = arith.mulf %7, %6 : vector<32x32xf32>
    %cst_7 = arith.constant 0.707106769 : f32
    %9 = vector.broadcast %cst_7 : f32 to vector<32x32xf32>
    %10 = arith.mulf %6, %9 : vector<32x32xf32>
    %11 = math.erf %10 : vector<32x32xf32>
    %cst_8 = arith.constant 1.000000e+00 : f32
    %12 = vector.broadcast %cst_8 : f32 to vector<32x32xf32>
    %13 = arith.addf %12, %11 : vector<32x32xf32>
    %14 = arith.mulf %8, %13 : vector<32x32xf32>
    %cst_9 = arith.constant dense<0.000000e+00> : vector<32xf32>
    %15 = vector.multi_reduction <add>, %14, %cst_9 [1] : vector<32x32xf32> to vector<32xf32>
    %16 = vector.shape_cast %15 : vector<32xf32> to vector<32x1xf32>
    %cst_10 = arith.constant 3.200000e+01 : f32
    %17 = vector.broadcast %cst_10 : f32 to vector<32x1xf32>
    %18 = arith.divf %16, %17 : vector<32x1xf32>
    %19 = vector.broadcast %18 : vector<32x1xf32> to vector<32x32xf32>
    %20 = arith.subf %14, %19 : vector<32x32xf32>
    %21 = arith.mulf %20, %20 : vector<32x32xf32>
    %cst_11 = arith.constant dense<0.000000e+00> : vector<32xf32>
    %22 = vector.multi_reduction <add>, %21, %cst_11 [1] : vector<32x32xf32> to vector<32xf32>
    %23 = vector.shape_cast %22 : vector<32xf32> to vector<32x1xf32>
    %cst_12 = arith.constant 3.200000e+01 : f32
    %24 = vector.broadcast %cst_12 : f32 to vector<32x1xf32>
    %25 = arith.divf %23, %24 : vector<32x1xf32>
    %26 = vector.broadcast %18 : vector<32x1xf32> to vector<32x32xf32>
    %27 = arith.subf %14, %26 : vector<32x32xf32>
    %cst_13 = arith.constant 9.99999974E-6 : f32
    %28 = vector.broadcast %cst_13 : f32 to vector<32x1xf32>
    %29 = arith.addf %25, %28 : vector<32x1xf32>
    %30 = math.rsqrt %29 : vector<32x1xf32>
    %31 = vector.broadcast %30 : vector<32x1xf32> to vector<32x32xf32>
    %32 = arith.mulf %27, %31 : vector<32x32xf32>
    %c0_14 = arith.constant 0 : index
    %c0_15 = arith.constant 0 : index
    %33 = vector.load %arg4[%c0_14, %c0_15] : memref<1x32xf32, #tpu.memory_space<vmem>>, vector<1x32xf32>
    %34 = vector.broadcast %33 : vector<1x32xf32> to vector<32x32xf32>
    %35 = arith.mulf %32, %34 : vector<32x32xf32>
    %c0_16 = arith.constant 0 : index
    %c0_17 = arith.constant 0 : index
    %36 = vector.load %arg5[%c0_16, %c0_17] : memref<1x32xf32, #tpu.memory_space<vmem>>, vector<1x32xf32>
    %37 = vector.broadcast %36 : vector<1x32xf32> to vector<32x32xf32>
    %38 = arith.addf %35, %37 : vector<32x32xf32>
    %c0_18 = arith.constant 0 : index
    %c0_19 = arith.constant 0 : index
    %39 = vector.load %arg9[%c0_18, %c0_19] : memref<32x32xf32, #tpu.memory_space<vmem>>, vector<32x32xf32>
    %cst_20 = arith.constant dense<0.000000e+00> : vector<32x32xf32>
    %40 = tpu.matmul %38, %39, %cst_20 {dimension_numbers = #tpu.dot_dimension_numbers<[1], [0], [0], [1], [0, 0, 1, 1], [], []>} : vector<32x32xf32>, vector<32x32xf32>, vector<32x32xf32> -> vector<32x32xf32>
    %c0_21 = arith.constant 0 : index
    %c0_22 = arith.constant 0 : index
    %41 = vector.load %arg10[%c0_21, %c0_22] : memref<1x32xf32, #tpu.memory_space<vmem>>, vector<1x32xf32>
    %42 = vector.broadcast %41 : vector<1x32xf32> to vector<32x32xf32>
    %43 = arith.addf %40, %42 : vector<32x32xf32>
    %c0_23 = arith.constant 0 : index
    %c0_24 = arith.constant 0 : index
    %44 = vector.load %arg11[%c0_23, %c0_24] : memref<32x32xf32, #tpu.memory_space<vmem>>, vector<32x32xf32>
    %cst_25 = arith.constant dense<0.000000e+00> : vector<32x32xf32>
    %45 = tpu.matmul %38, %44, %cst_25 {dimension_numbers = #tpu.dot_dimension_numbers<[1], [0], [0], [1], [0, 0, 1, 1], [], []>} : vector<32x32xf32>, vector<32x32xf32>, vector<32x32xf32> -> vector<32x32xf32>
    %c0_26 = arith.constant 0 : index
    %c0_27 = arith.constant 0 : index
    %46 = vector.load %arg12[%c0_26, %c0_27] : memref<1x32xf32, #tpu.memory_space<vmem>>, vector<1x32xf32>
    %47 = vector.broadcast %46 : vector<1x32xf32> to vector<32x32xf32>
    %48 = arith.addf %45, %47 : vector<32x32xf32>
    %c0_28 = arith.constant 0 : index
    %c0_29 = arith.constant 0 : index
    %49 = vector.load %arg6[%c0_28, %c0_29] : memref<320x32xf32, #tpu.memory_space<vmem>>, vector<320x32xf32>
    %c0_30 = arith.constant 0 : index
    %c0_31 = arith.constant 0 : index
    %c0_32 = arith.constant 0 : index
    %50 = vector.load %arg7[%c0_30, %c0_31, %c0_32] : memref<4x1x32xf32, #tpu.memory_space<vmem>>, vector<4x1x32xf32>
    %c0_33 = arith.constant 0 : index
    %c0_34 = arith.constant 0 : index
    %51 = vector.load %arg13[%c0_33, %c0_34] : memref<32x32xf32, #tpu.memory_space<vmem>>, vector<32x32xf32>
    %c0_35 = arith.constant 0 : index
    %c0_36 = arith.constant 0 : index
    %52 = vector.load %arg14[%c0_35, %c0_36] : memref<1x32xf32, #tpu.memory_space<vmem>>, vector<1x32xf32>
    %53 = vector.extract_strided_slice %43 {offsets = [0, 0], sizes = [16, 32], strides = [1, 1]} : vector<32x32xf32> to vector<16x32xf32>
    %54 = vector.extract_strided_slice %48 {offsets = [0, 0], sizes = [16, 32], strides = [1, 1]} : vector<32x32xf32> to vector<16x32xf32>
    %cst_37 = arith.constant dense<0.000000e+00> : vector<320x16xf32>
    %55 = tpu.matmul %49, %53, %cst_37 {dimension_numbers = #tpu.dot_dimension_numbers<[1], [1], [0], [0], [0, 0, 1, 0], [], []>} : vector<320x32xf32>, vector<16x32xf32>, vector<320x16xf32> -> vector<320x16xf32>
    %c0_38 = arith.constant 0 : index
    %c0_39 = arith.constant 0 : index
    %c0_40 = arith.constant 0 : index
    %56 = vector.load %arg8[%c0_38, %c0_39, %c0_40] : memref<2x1x16xf32, #tpu.memory_space<vmem>>, vector<1x1x16xf32>
    %57 = vector.shape_cast %56 : vector<1x1x16xf32> to vector<1x16xf32>
    %58 = vector.broadcast %57 : vector<1x16xf32> to vector<320x16xf32>
    %59 = arith.addf %55, %58 : vector<320x16xf32>
    %cst_41 = arith.constant dense<0xFF800000> : vector<320xf32>
    %60 = vector.multi_reduction <maximumf>, %59, %cst_41 [1] : vector<320x16xf32> to vector<320xf32>
    %61 = vector.shape_cast %60 : vector<320xf32> to vector<320x1xf32>
    %62 = vector.broadcast %61 : vector<320x1xf32> to vector<320x16xf32>
    %63 = arith.subf %59, %62 : vector<320x16xf32>
    %64 = math.exp %63 : vector<320x16xf32>
    %cst_42 = arith.constant dense<0.000000e+00> : vector<320xf32>
    %65 = vector.multi_reduction <add>, %64, %cst_42 [1] : vector<320x16xf32> to vector<320xf32>
    %66 = vector.shape_cast %65 : vector<320xf32> to vector<320x1xf32>
    %67 = tpu.reciprocal %66 {approx = true} : vector<320x1xf32> -> vector<320x1xf32>
    %68 = vector.broadcast %67 : vector<320x1xf32> to vector<320x16xf32>
    %69 = arith.mulf %64, %68 : vector<320x16xf32>
    %cst_43 = arith.constant dense<0.000000e+00> : vector<320x32xf32>
    %70 = tpu.matmul %69, %54, %cst_43 {dimension_numbers = #tpu.dot_dimension_numbers<[1], [0], [0], [1], [0, 0, 1, 1], [], []>} : vector<320x16xf32>, vector<16x32xf32>, vector<320x32xf32> -> vector<320x32xf32>
    %71 = vector.extract_strided_slice %70 {offsets = [0, 0], sizes = [80, 32], strides = [1, 1]} : vector<320x32xf32> to vector<80x32xf32>
    %72 = vector.extract_strided_slice %50 {offsets = [0, 0, 0], sizes = [1, 1, 32], strides = [1, 1, 1]} : vector<4x1x32xf32> to vector<1x1x32xf32>
    %73 = vector.shape_cast %72 : vector<1x1x32xf32> to vector<1x32xf32>
    %74 = vector.broadcast %73 : vector<1x32xf32> to vector<80x32xf32>
    %75 = arith.mulf %71, %74 : vector<80x32xf32>
    %76 = vector.extract_strided_slice %70 {offsets = [80, 0], sizes = [80, 32], strides = [1, 1]} : vector<320x32xf32> to vector<80x32xf32>
    %77 = vector.extract_strided_slice %50 {offsets = [1, 0, 0], sizes = [1, 1, 32], strides = [1, 1, 1]} : vector<4x1x32xf32> to vector<1x1x32xf32>
    %78 = vector.shape_cast %77 : vector<1x1x32xf32> to vector<1x32xf32>
    %79 = vector.broadcast %78 : vector<1x32xf32> to vector<80x32xf32>
    %80 = arith.mulf %76, %79 : vector<80x32xf32>
    %81 = arith.addf %75, %80 : vector<80x32xf32>
    %82 = vector.extract_strided_slice %70 {offsets = [160, 0], sizes = [80, 32], strides = [1, 1]} : vector<320x32xf32> to vector<80x32xf32>
    %83 = vector.extract_strided_slice %50 {offsets = [2, 0, 0], sizes = [1, 1, 32], strides = [1, 1, 1]} : vector<4x1x32xf32> to vector<1x1x32xf32>
    %84 = vector.shape_cast %83 : vector<1x1x32xf32> to vector<1x32xf32>
    %85 = vector.broadcast %84 : vector<1x32xf32> to vector<80x32xf32>
    %86 = arith.mulf %82, %85 : vector<80x32xf32>
    %87 = arith.addf %81, %86 : vector<80x32xf32>
    %88 = vector.extract_strided_slice %70 {offsets = [240, 0], sizes = [80, 32], strides = [1, 1]} : vector<320x32xf32> to vector<80x32xf32>
    %89 = vector.extract_strided_slice %50 {offsets = [3, 0, 0], sizes = [1, 1, 32], strides = [1, 1, 1]} : vector<4x1x32xf32> to vector<1x1x32xf32>
    %90 = vector.shape_cast %89 : vector<1x1x32xf32> to vector<1x32xf32>
    %91 = vector.broadcast %90 : vector<1x32xf32> to vector<80x32xf32>
    %92 = arith.mulf %88, %91 : vector<80x32xf32>
    %93 = arith.addf %87, %92 : vector<80x32xf32>
    %cst_44 = arith.constant dense<0.000000e+00> : vector<80x32xf32>
    %94 = tpu.matmul %93, %51, %cst_44 {dimension_numbers = #tpu.dot_dimension_numbers<[1], [0], [0], [1], [0, 0, 1, 1], [], []>} : vector<80x32xf32>, vector<32x32xf32>, vector<80x32xf32> -> vector<80x32xf32>
    %95 = vector.broadcast %52 : vector<1x32xf32> to vector<80x32xf32>
    %96 = arith.addf %94, %95 : vector<80x32xf32>
    %c0_45 = arith.constant 0 : index
    %c0_46 = arith.constant 0 : index
    %c0_47 = arith.constant 0 : index
    %97 = vector.load %arg15[%c0_45, %c0_46, %c0_47] : memref<2x80x32xf32, #tpu.memory_space<vmem>>, vector<1x80x32xf32>
    %98 = vector.shape_cast %97 : vector<1x80x32xf32> to vector<80x32xf32>
    %99 = vector.shape_cast %96 : vector<80x32xf32> to vector<1x80x32xf32>
    tpu.vector_store %arg15[%c0_45, %c0_46, %c0_47], %99 {strides = array<i32>} : memref<2x80x32xf32, #tpu.memory_space<vmem>>, vector<1x80x32xf32>,
    %100 = vector.extract_strided_slice %43 {offsets = [16, 0], sizes = [16, 32], strides = [1, 1]} : vector<32x32xf32> to vector<16x32xf32>
    %101 = vector.extract_strided_slice %48 {offsets = [16, 0], sizes = [16, 32], strides = [1, 1]} : vector<32x32xf32> to vector<16x32xf32>
    %cst_48 = arith.constant dense<0.000000e+00> : vector<320x16xf32>
    %102 = tpu.matmul %49, %100, %cst_48 {dimension_numbers = #tpu.dot_dimension_numbers<[1], [1], [0], [0], [0, 0, 1, 0], [], []>} : vector<320x32xf32>, vector<16x32xf32>, vector<320x16xf32> -> vector<320x16xf32>
    %c1 = arith.constant 1 : index
    %c0_49 = arith.constant 0 : index
    %c0_50 = arith.constant 0 : index
    %103 = vector.load %arg8[%c1, %c0_49, %c0_50] : memref<2x1x16xf32, #tpu.memory_space<vmem>>, vector<1x1x16xf32>
    %104 = vector.shape_cast %103 : vector<1x1x16xf32> to vector<1x16xf32>
    %105 = vector.broadcast %104 : vector<1x16xf32> to vector<320x16xf32>
    %106 = arith.addf %102, %105 : vector<320x16xf32>
    %cst_51 = arith.constant dense<0xFF800000> : vector<320xf32>
    %107 = vector.multi_reduction <maximumf>, %106, %cst_51 [1] : vector<320x16xf32> to vector<320xf32>
    %108 = vector.shape_cast %107 : vector<320xf32> to vector<320x1xf32>
    %109 = vector.broadcast %108 : vector<320x1xf32> to vector<320x16xf32>
    %110 = arith.subf %106, %109 : vector<320x16xf32>
    %111 = math.exp %110 : vector<320x16xf32>
    %cst_52 = arith.constant dense<0.000000e+00> : vector<320xf32>
    %112 = vector.multi_reduction <add>, %111, %cst_52 [1] : vector<320x16xf32> to vector<320xf32>
    %113 = vector.shape_cast %112 : vector<320xf32> to vector<320x1xf32>
    %114 = tpu.reciprocal %113 {approx = true} : vector<320x1xf32> -> vector<320x1xf32>
    %115 = vector.broadcast %114 : vector<320x1xf32> to vector<320x16xf32>
    %116 = arith.mulf %111, %115 : vector<320x16xf32>
    %cst_53 = arith.constant dense<0.000000e+00> : vector<320x32xf32>
    %117 = tpu.matmul %116, %101, %cst_53 {dimension_numbers = #tpu.dot_dimension_numbers<[1], [0], [0], [1], [0, 0, 1, 1], [], []>} : vector<320x16xf32>, vector<16x32xf32>, vector<320x32xf32> -> vector<320x32xf32>
    %118 = vector.extract_strided_slice %117 {offsets = [0, 0], sizes = [80, 32], strides = [1, 1]} : vector<320x32xf32> to vector<80x32xf32>
    %119 = vector.extract_strided_slice %50 {offsets = [0, 0, 0], sizes = [1, 1, 32], strides = [1, 1, 1]} : vector<4x1x32xf32> to vector<1x1x32xf32>
    %120 = vector.shape_cast %119 : vector<1x1x32xf32> to vector<1x32xf32>
    %121 = vector.broadcast %120 : vector<1x32xf32> to vector<80x32xf32>
    %122 = arith.mulf %118, %121 : vector<80x32xf32>
    %123 = vector.extract_strided_slice %117 {offsets = [80, 0], sizes = [80, 32], strides = [1, 1]} : vector<320x32xf32> to vector<80x32xf32>
    %124 = vector.extract_strided_slice %50 {offsets = [1, 0, 0], sizes = [1, 1, 32], strides = [1, 1, 1]} : vector<4x1x32xf32> to vector<1x1x32xf32>
    %125 = vector.shape_cast %124 : vector<1x1x32xf32> to vector<1x32xf32>
    %126 = vector.broadcast %125 : vector<1x32xf32> to vector<80x32xf32>
    %127 = arith.mulf %123, %126 : vector<80x32xf32>
    %128 = arith.addf %122, %127 : vector<80x32xf32>
    %129 = vector.extract_strided_slice %117 {offsets = [160, 0], sizes = [80, 32], strides = [1, 1]} : vector<320x32xf32> to vector<80x32xf32>
    %130 = vector.extract_strided_slice %50 {offsets = [2, 0, 0], sizes = [1, 1, 32], strides = [1, 1, 1]} : vector<4x1x32xf32> to vector<1x1x32xf32>
    %131 = vector.shape_cast %130 : vector<1x1x32xf32> to vector<1x32xf32>
    %132 = vector.broadcast %131 : vector<1x32xf32> to vector<80x32xf32>
    %133 = arith.mulf %129, %132 : vector<80x32xf32>
    %134 = arith.addf %128, %133 : vector<80x32xf32>
    %135 = vector.extract_strided_slice %117 {offsets = [240, 0], sizes = [80, 32], strides = [1, 1]} : vector<320x32xf32> to vector<80x32xf32>
    %136 = vector.extract_strided_slice %50 {offsets = [3, 0, 0], sizes = [1, 1, 32], strides = [1, 1, 1]} : vector<4x1x32xf32> to vector<1x1x32xf32>
    %137 = vector.shape_cast %136 : vector<1x1x32xf32> to vector<1x32xf32>
    %138 = vector.broadcast %137 : vector<1x32xf32> to vector<80x32xf32>
    %139 = arith.mulf %135, %138 : vector<80x32xf32>
    %140 = arith.addf %134, %139 : vector<80x32xf32>
    %cst_54 = arith.constant dense<0.000000e+00> : vector<80x32xf32>
    %141 = tpu.matmul %140, %51, %cst_54 {dimension_numbers = #tpu.dot_dimension_numbers<[1], [0], [0], [1], [0, 0, 1, 1], [], []>} : vector<80x32xf32>, vector<32x32xf32>, vector<80x32xf32> -> vector<80x32xf32>
    %142 = vector.broadcast %52 : vector<1x32xf32> to vector<80x32xf32>
    %143 = arith.addf %141, %142 : vector<80x32xf32>
    %c1_55 = arith.constant 1 : index
    %c0_56 = arith.constant 0 : index
    %c0_57 = arith.constant 0 : index
    %144 = vector.load %arg15[%c1_55, %c0_56, %c0_57] : memref<2x80x32xf32, #tpu.memory_space<vmem>>, vector<1x80x32xf32>
    %145 = vector.shape_cast %144 : vector<1x80x32xf32> to vector<80x32xf32>
    %146 = vector.shape_cast %143 : vector<80x32xf32> to vector<1x80x32xf32>
    tpu.vector_store %arg15[%c1_55, %c0_56, %c0_57], %146 {strides = array<i32>} : memref<2x80x32xf32, #tpu.memory_space<vmem>>, vector<1x80x32xf32>,
    return
  }
  func.func @transform_0(%arg0: i32) -> (i32, i32, i32) {
    %c0_i32 = arith.constant 0 : i32
    %c0_i32_0 = arith.constant 0 : i32
    %c0_i32_1 = arith.constant 0 : i32
    return %arg0, %c0_i32, %c0_i32_0 : i32, i32, i32
  }
  func.func @transform_1(%arg0: i32) -> (i32, i32) {
    %c0_i32 = arith.constant 0 : i32
    %c0_i32_0 = arith.constant 0 : i32
    %c0_i32_1 = arith.constant 0 : i32
    return %c0_i32, %c0_i32_0 : i32, i32
  }
  func.func @transform_2(%arg0: i32) -> (i32, i32) {
    %c0_i32 = arith.constant 0 : i32
    %c0_i32_0 = arith.constant 0 : i32
    %c0_i32_1 = arith.constant 0 : i32
    return %c0_i32, %c0_i32_0 : i32, i32
  }
  func.func @transform_3(%arg0: i32) -> (i32, i32) {
    %c0_i32 = arith.constant 0 : i32
    %c0_i32_0 = arith.constant 0 : i32
    %c0_i32_1 = arith.constant 0 : i32
    return %c0_i32, %c0_i32_0 : i32, i32
  }
  func.func @transform_4(%arg0: i32) -> (i32, i32) {
    %c0_i32 = arith.constant 0 : i32
    %c0_i32_0 = arith.constant 0 : i32
    %c0_i32_1 = arith.constant 0 : i32
    return %c0_i32, %c0_i32_0 : i32, i32
  }
  func.func @transform_5(%arg0: i32) -> (i32, i32) {
    %c0_i32 = arith.constant 0 : i32
    %c0_i32_0 = arith.constant 0 : i32
    %c0_i32_1 = arith.constant 0 : i32
    return %c0_i32, %c0_i32_0 : i32, i32
  }
  func.func @transform_6(%arg0: i32) -> (i32, i32, i32) {
    %c0_i32 = arith.constant 0 : i32
    %c0_i32_0 = arith.constant 0 : i32
    %c0_i32_1 = arith.constant 0 : i32
    %c0_i32_2 = arith.constant 0 : i32
    return %c0_i32, %c0_i32_0, %c0_i32_1 : i32, i32, i32
  }
  func.func @transform_7(%arg0: i32) -> (i32, i32, i32) {
    %c0_i32 = arith.constant 0 : i32
    %c0_i32_0 = arith.constant 0 : i32
    %c0_i32_1 = arith.constant 0 : i32
    return %arg0, %c0_i32, %c0_i32_0 : i32, i32, i32
  }
  func.func @transform_8(%arg0: i32) -> (i32, i32) {
    %c0_i32 = arith.constant 0 : i32
    %c0_i32_0 = arith.constant 0 : i32
    %c0_i32_1 = arith.constant 0 : i32
    return %c0_i32, %c0_i32_0 : i32, i32
  }
  func.func @transform_9(%arg0: i32) -> (i32, i32) {
    %c0_i32 = arith.constant 0 : i32
    %c0_i32_0 = arith.constant 0 : i32
    %c0_i32_1 = arith.constant 0 : i32
    return %c0_i32, %c0_i32_0 : i32, i32
  }
  func.func @transform_10(%arg0: i32) -> (i32, i32) {
    %c0_i32 = arith.constant 0 : i32
    %c0_i32_0 = arith.constant 0 : i32
    %c0_i32_1 = arith.constant 0 : i32
    return %c0_i32, %c0_i32_0 : i32, i32
  }
  func.func @transform_11(%arg0: i32) -> (i32, i32) {
    %c0_i32 = arith.constant 0 : i32
    %c0_i32_0 = arith.constant 0 : i32
    %c0_i32_1 = arith.constant 0 : i32
    return %c0_i32, %c0_i32_0 : i32, i32
  }
  func.func @transform_12(%arg0: i32) -> (i32, i32) {
    %c0_i32 = arith.constant 0 : i32
    %c0_i32_0 = arith.constant 0 : i32
    %c0_i32_1 = arith.constant 0 : i32
    return %c0_i32, %c0_i32_0 : i32, i32
  }
  func.func @transform_13(%arg0: i32) -> (i32, i32) {
    %c0_i32 = arith.constant 0 : i32
    %c0_i32_0 = arith.constant 0 : i32
    %c0_i32_1 = arith.constant 0 : i32
    return %c0_i32, %c0_i32_0 : i32, i32
  }
  func.func @transform_14(%arg0: i32) -> (i32, i32, i32) {
    %c0_i32 = arith.constant 0 : i32
    %c0_i32_0 = arith.constant 0 : i32
    %c0_i32_1 = arith.constant 0 : i32
    return %arg0, %c0_i32, %c0_i32_0 : i32, i32, i32
  }
}

</mosaic_0001>

<bundles_post_ra>
// kernel: tpu_custom_call.1
= control target key start
LH: loop header
LB: loop body
LE: loop exit
PB: predicated region body
PF: predicated region fallthrough
CT: control target
= control target key end

     0   :  { %s5186_s29 = smov 0   ;;  %s6745_s0 = inlined_call_operand.vmem [shape: f32[4,16,64], index: 0, kind: input, shape index: {}]   ;;  %s6746_s1 = inlined_call_operand.vmem [shape: f32[64,32], index: 1, kind: input, shape index: {}]   ;;  %s6747_s2 = inlined_call_operand.vmem [shape: f32[1,32], index: 2, kind: input, shape index: {}]   ;;  %s6748_s3 = inlined_call_operand.vmem [shape: f32[1,32], index: 3, kind: input, shape index: {}]   ;;  %s6749_s4 = inlined_call_operand.vmem [shape: f32[1,32], index: 4, kind: input, shape index: {}]   ;;  %s6750_s5 = inlined_call_operand.vmem [shape: f32[320,32], index: 5, kind: input, shape index: {}]   ;;  %s6751_s6 = inlined_call_operand.vmem [shape: f32[4,1,32], index: 6, kind: input, shape index: {}]   ;;  %s6752_s7 = inlined_call_operand.vmem [shape: f32[4,1,16], index: 7, kind: input, shape index: {}]   ;;  %s6753_s8 = inlined_call_operand.vmem [shape: f32[32,32], index: 8, kind: input, shape index: {}]   ;;  %s6754_s9 = inlined_call_operand.vmem [shape: f32[1,32], index: 9, kind: input, shape index: {}]   ;;  %s6755_s10 = inlined_call_operand.vmem [shape: f32[32,32], index: 10, kind: input, shape index: {}]   ;;  %s6756_s11 = inlined_call_operand.vmem [shape: f32[1,32], index: 11, kind: input, shape index: {}]   ;;  %s6757_s12 = inlined_call_operand.vmem [shape: f32[32,32], index: 12, kind: input, shape index: {}]   ;;  %s6758_s13 = inlined_call_operand.vmem [shape: f32[1,32], index: 13, kind: input, shape index: {}]   ;;  %s6759_s14 = inlined_call_operand.vmem [shape: f32[4,80,32], index: 14, kind: output, shape index: {}]  }
   0x1 LB: > { %s3837_s30 = sadd.s32 4294967295, %s5109_s29   ;;  %p3841_p0 = scmp.ge.s32.totalorder %s5109_s29, 1  ;;  %s5109_s29 = sphi %s5186_s29, %s24_s29  }
   0x2   : > { %p424_p1 = scmp.lt.s32.totalorder %s5109_s29, 3 }
   0x4   : > { %p425_p2 = pnand %p3841_p0, %p424_p1 }
   0x5   : > { %v499_v0 = vld [vmem:[%s6746_s1] sm:$0xff] (!%p425_p2)  ;;  %v500_v1 = vld [vmem:[%s6746_s1 + $0x8] sm:$0xff] (!%p425_p2)  ;;  %v501_v2 = vld [vmem:[%s6746_s1 + $0x10] sm:$0xff] (!%p425_p2)  ;;  %s3842_s21 = sshll.u32 (!%p425_p2), %s3837_s30, 1  ;;  %vm514_vm0 = vcmask (!%p425_p2), 523264   ;;  %vm632_vm1 = vcmask (!%p425_p2), 261120  }
   0x6   : > { %428 = sbr.rel (%p425_p2) target bundleno = 2448 (0x990), region = 76  ;;  %v4646_v3 = vpack.c.bf16 (!%p425_p2), %v500_v1, %v499_v0  ;;  %v502_v4 = vld [vmem:[%s6746_s1 + $0x18] sm:$0xff] (!%p425_p2)  ;;  %p477_p3 = scmp.lt.s32.totalorder (!%p425_p2), %s3842_s21, 3  ;;  %v503_v6 = vld [vmem:[%s6746_s1 + $0x20] sm:$0xff] (!%p425_p2)  ;;  %v504_v7 = vld [vmem:[%s6746_s1 + $0x28] sm:$0xff] (!%p425_p2)  ;;  %vm1359_vm3 = vcmask (!%p425_p2), 130048  }
   0x7   : > { %v4650_v5 = vpack.c.bf16 (!%p425_p2), %v502_v4, %v501_v2  ;;  %v4654_v8 = vpack.c.bf16 (!%p425_p2), %v504_v7, %v503_v6  ;;  %v505_v9 = vld [vmem:[%s6746_s1 + $0x30] sm:$0xff] (!%p425_p2)  ;;  %v506_v10 = vld [vmem:[%s6746_s1 + $0x38] sm:$0xff] (!%p425_p2)  ;;  %v3848_v16 = vld [vmem:[%s6747_s2] ss:$0 sm:$0xff] (!%p425_p2) }
   0x8   : > { %4647 = vmatprep.subr.bf16.mxu0 (!%p425_p2), %v4646_v3  ;;  %v4658_v12 = vpack.c.bf16 (!%p425_p2), %v506_v10, %v505_v9  ;;  %v708_v0 = vld [vmem:[%s6753_s8] sm:$0xff] (!%p425_p2)  ;;  %v709_v1 = vld [vmem:[%s6753_s8 + $0x8] sm:$0xff] (!%p425_p2)  ;;  %v711_v4 = vld [vmem:[%s6753_s8 + $0x18] sm:$0xff] (!%p425_p2) }
   0x9   : > { %4649 = vmatpush3.bf16.msra.mxu0 (!%p425_p2), %v4646_v3  ;;  %v4662_v2 = vpack.c.bf16 (!%p425_p2), %v709_v1, %v708_v0  ;;  %v710_v3 = vld [vmem:[%s6753_s8 + $0x10] sm:$0xff] (!%p425_p2)  ;;  %vm5290_vm2 = vmpackc.low (!%p425_p2), %vm632_vm1, %vm632_vm1  ;;  %v923_v1 = vld [vmem:[%s6750_s5 + $0x58] sm:$0xff] (!%p425_p2) }
   0xa   : > { %4651 = vmatprep.subr.bf16.mxu0 (!%p425_p2), %v4650_v5  ;;  %v922_v0 = vld [vmem:[%s6750_s5 + $0x50] sm:$0xff] (!%p425_p2) }
   0xb   : > { %4663 = vmatprep.subr.bf16.mxu1 (!%p425_p2), %v4662_v2 }
   0xc   : > { %4665 = vmatpush3.bf16.msra.mxu1 (!%p425_p2), %v4662_v2  ;;  %v924_v2 = vld [vmem:[%s6750_s5 + $0x60] sm:$0xff] (!%p425_p2) }
   0xd   : > { %s6763_s21 = smov (!%p477_p3, %s3842_s21), 3  ;;  %4653 = vmatpush3.bf16.msra.mxu0 %v4650_v5  ;;  %v4666_v5 = vpack.c.bf16 %v711_v4, %v710_v3  ;;  %v925_v3 = vld [vmem:[%s6750_s5 + $0x68] sm:$0xff]  ;;  %v926_v4 = vld [vmem:[%s6750_s5 + $0x70] sm:$0xff] }
   0xe   : > { %s4069_s28 = sshll.u32 %s6763_s21, 4  ;;  %4655 = vmatprep.subr.bf16.mxu0 %v4654_v8  ;;  %s5491_s26 = scalar_lea.vmem %s6752_s7, %s6763_s21 }
   0xf   : > { %s481_s20 = scalar_lea.vmem %s6745_s0, %s4069_s28  ;;  %4667 = vmatprep.subr.bf16.mxu1 %v4666_v5 }
  0x10   : > { %v495_v11 = vld [vmem:[%s481_s20] sm:$0xff]  ;;  %v496_v13 = vld [vmem:[%s481_s20 + $0x8] sm:$0xff]  ;;  %v497_v14 = vld [vmem:[%s481_s20 + $0x10] sm:$0xff]  ;;  %4669 = vmatpush3.bf16.msra.mxu1 %v4666_v5 }
  0x11   : > { %4310 = vmatprep.mubr.msk.f32.mxu0 %vm514_vm0, %v495_v11  ;;  %4657 = vmatpush3.bf16.msra.mxu0 %v4654_v8  ;;  %v498_v15 = vld [vmem:[%s481_s20 + $0x18] sm:$0xff]  ;;  %v956_v5 = vld [vmem:[%s6757_s12] sm:$0xff] }
  0x12   : > { %4659 = vmatprep.subr.bf16.mxu0 %v4658_v12 }
  0x15   : > { %4661 = vmatpush3.bf16.msra.mxu0 %v4658_v12 }
  0x18   : > { %4311 = vmatmul.mubr.msk.f32.vlgmr.msra.gmra.mrb[0].mxu0 %vm514_vm0, %v496_v13 }
  0x19   : > { %4313 = vmatprep.mubr.msk.f32.mxu0 %vm514_vm0, %v497_v14 }
  0x1c   : > { %4314 = vmatmul.mubr.msk.f32.gmra.mrb[2].mxu0 %vm514_vm0, %v498_v15 }
  0xeb   : > { %v4312_v17 = vpop.f32.mrb[0].mxu0 }
  0xec   : > { %v599_v18 = vadd.f32 %v4312_v17, %v3848_v16  ;;  %v593_v19 = vpop.f32.mrb[1].mxu0 }
  0xed   : > { %v594_v20 = vadd.f32 %v3848_v16, %v593_v19 }
  0xee   : > { %v617_v21 = vmul.f32 0.70710677, %v599_v18  ;;  %v613_v31 = vmul.f32 0.5, %v599_v18  ;;  %v3853_v18 = vld [vmem:[%s6748_s3] ss:$0 sm:$0xff] }
  0xef   : > { %v616_v22 = vmul.f32 0.70710677, %v594_v20  ;;  %v4315_v23 = vpop.f32.mrb[2].mxu0  ;;  %v612_v28 = vmul.f32 0.5, %v594_v20  ;;  %v3854_v20 = vld [vmem:[%s6749_s4] ss:$0 sm:$0xff] }
  0xf0   : > { %4723 = verf.f32 %v617_v21  ;;  %v609_v24 = vadd.f32 %v4315_v23, %v3848_v16  ;;  %v603_v25 = vpop.f32.mrb[3].mxu0 }
  0xf1   : > { %4725 = verf.f32 %v616_v22  ;;  %v604_v35 = vadd.f32 %v3848_v16, %v603_v25 }
  0xf2   : > { %v619_v43 = vmul.f32 0.70710677, %v609_v24  ;;  %v615_v49 = vmul.f32 0.5, %v609_v24 }
  0xf3   : > { %v618_v37 = vmul.f32 0.70710677, %v604_v35  ;;  %v614_v39 = vmul.f32 0.5, %v604_v35 }
  0xf5   : > { %4727 = verf.f32 %v618_v37  ;;  %v818_v37 = vld [vmem:[%s6755_s10 + $0x10] sm:$0xff] }
  0xf6   : > { %4729 = verf.f32 %v619_v43 }
  0xfa   : > { %v4724_v26 = vpop.eup %4723 }
  0xfb   : > { %v4726_v27 = vpop.eup %4725  ;;  %v625_v30 = vadd.f32 1.0, %v4724_v26 }
  0xfc   : > { %v624_v29 = vadd.f32 1.0, %v4726_v27 }
  0xfd   : > { %v629_v34 = vmul.f32 %v625_v30, %v613_v31  ;;  %v816_v30 = vld [vmem:[%s6755_s10] sm:$0xff]  ;;  %v817_v31 = vld [vmem:[%s6755_s10 + $0x8] sm:$0xff] }
  0xfe   : > { %v628_v32 = vmul.f32 %v624_v29, %v612_v28 }
  0xff   : > { %v636_v36 = vsel %vm632_vm1, %v629_v34, 0.0  ;;  %v4728_v38 = vpop.eup %4727 }
 0x100   : > { %v633_v33 = vsel %vm632_vm1, %v628_v32, 0.0  ;;  %v626_v40 = vadd.f32 1.0, %v4728_v38  ;;  %v4730_v46 = vpop.eup %4729  ;;  %v819_v38 = vld [vmem:[%s6755_s10 + $0x18] sm:$0xff] }
 0x101   : > { %634 = vadd.xlane.f32.xlu0 %v633_v33  ;;  %v627_v52 = vadd.f32 1.0, %v4730_v46 }
 0x102   : > { %v630_v41 = vmul.f32 %v626_v40, %v614_v39  ;;  %v4674_v39 = vpack.c.bf16 %v819_v38, %v818_v37  ;;  %v912_v40 = vld [vmem:[%s6750_s5] sm:$0xff] }
 0x103   : > { %v631_v56 = vmul.f32 %v627_v52, %v615_v49  ;;  %4348 = vmatprep.mubr.msk.f32.mxu0 %vm632_vm1, %v912_v40  ;;  %v3860_v40 = vld [vmem:[%s6756_s11] ss:$0 sm:$0xff] }
 0x104   : > { %v639_v42 = vsel %vm632_vm1, %v630_v41, 0.0 }
 0x105   : > { %637 = vadd.xlane.f32.xlu0 %v636_v36  ;;  %v642_v58 = vsel %vm632_vm1, %v631_v56, 0.0 }
 0x109   : > { %640 = vadd.xlane.f32.xlu0 %v639_v42 }
 0x18e   : > { %v635_v44 = vpop.xlane.xlu0 %634 }
 0x18f   : > { %v646_v45 = vmul.f32 0.03125, %v635_v44 }
 0x191   : > { %v650_v47 = vsub.f32 %v628_v32, %v646_v45  ;;  %v4670_v32 = vpack.c.bf16 %v817_v31, %v816_v30  ;;  %v946_v30 = vld [vmem:[%s6750_s5 + $0x110] sm:$0xff]  ;;  %v947_v31 = vld [vmem:[%s6750_s5 + $0x118] sm:$0xff] }
 0x192   : > { %v638_v48 = vpop.xlane.xlu0 %637 }
 0x193   : > { %v647_v50 = vmul.f32 0.03125, %v638_v48  ;;  %v654_v51 = vmul.f32 %v650_v47, %v650_v47  ;;  %4671 = vmatprep.subr.bf16.mxu1 %v4670_v32  ;;  %v5284_v48 = vld [vmem:[%s6754_s9] ss:$0 sm:$0xff] }
 0x195   : > { %v651_v53 = vsub.f32 %v629_v34, %v647_v50  ;;  %v658_v54 = vsel %vm632_vm1, %v654_v51, 0.0 }
 0x196   : > { %659 = vadd.xlane.f32.xlu1 %v658_v54  ;;  %v641_v59 = vpop.xlane.xlu0 %640 }
 0x197   : > { %v655_v55 = vmul.f32 %v651_v53, %v651_v53  ;;  %v648_v60 = vmul.f32 0.03125, %v641_v59  ;;  %v917_v59 = vld [vmem:[%s6750_s5 + $0x28] sm:$0xff] }
 0x199   : > { %v661_v57 = vsel %vm632_vm1, %v655_v55, 0.0  ;;  %v652_v61 = vsub.f32 %v630_v41, %v648_v60  ;;  %v913_v55 = vld [vmem:[%s6750_s5 + $0x8] sm:$0xff]  ;;  %v918_v60 = vld [vmem:[%s6750_s5 + $0x30] sm:$0xff] }
 0x19a   : > { %662 = vadd.xlane.f32.xlu1 %v661_v57  ;;  %v915_v57 = vld [vmem:[%s6750_s5 + $0x18] sm:$0xff] }
 0x19b   : > { %v656_v62 = vmul.f32 %v652_v61, %v652_v61 }
 0x19d   : > { %v664_v63 = vsel %vm632_vm1, %v656_v62, 0.0  ;;  %v920_v62 = vld [vmem:[%s6750_s5 + $0x40] sm:$0xff] }
 0x19e   : > { %643 = vadd.xlane.f32.xlu1 %v642_v58  ;;  %665 = vadd.xlane.f32.xlu0 %v664_v63  ;;  %v916_v58 = vld [vmem:[%s6750_s5 + $0x20] sm:$0xff]  ;;  %v921_v63 = vld [vmem:[%s6750_s5 + $0x48] sm:$0xff] }
 0x223   : > { %v660_v6 = vpop.xlane.xlu1 %659 }
 0x224   : > { %v670_v7 = vmul.f32 0.03125, %v660_v6  ;;  %v957_v6 = vld [vmem:[%s6757_s12 + $0x8] sm:$0xff] }
 0x226   : > { %v674_v8 = vadd.f32 1e-05, %v670_v7  ;;  %v5358_v7 = vpack.c.bf16 %v957_v6, %v956_v5 }
 0x227   : > { %v663_v9 = vpop.xlane.xlu1 %662 }
 0x228   : > { %4731 = vrsqrt.f32 %v674_v8  ;;  %v671_v10 = vmul.f32 0.03125, %v663_v9  ;;  %v958_v8 = vld [vmem:[%s6757_s12 + $0x10] sm:$0xff]  ;;  %v959_v9 = vld [vmem:[%s6757_s12 + $0x18] sm:$0xff] }
 0x22a   : > { %v675_v11 = vadd.f32 1e-05, %v671_v10  ;;  %v5367_v10 = vpack.c.bf16 %v959_v9, %v958_v8 }
 0x22b   : > { %v644_v12 = vpop.xlane.xlu1 %643  ;;  %v666_v27 = vpop.xlane.xlu0 %665 }
 0x22c   : > { %4733 = vrsqrt.f32 %v675_v11  ;;  %v649_v13 = vmul.f32 0.03125, %v644_v12  ;;  %v672_v28 = vmul.f32 0.03125, %v666_v27  ;;  %v927_v11 = vld [vmem:[%s6750_s5 + $0x78] sm:$0xff]  ;;  %v928_v12 = vld [vmem:[%s6750_s5 + $0x80] sm:$0xff] }
 0x22d   : > { %v943_v27 = vld [vmem:[%s6750_s5 + $0xf8] sm:$0xff] }
 0x22e   : > { %v653_v14 = vsub.f32 %v631_v56, %v649_v13  ;;  %v676_v29 = vadd.f32 1e-05, %v672_v28  ;;  %v914_v56 = vld [vmem:[%s6750_s5 + $0x10] sm:$0xff]  ;;  %v929_v13 = vld [vmem:[%s6750_s5 + $0x88] sm:$0xff]  ;;  %v944_v28 = vld [vmem:[%s6750_s5 + $0x100] sm:$0xff] }
 0x230   : > { %v657_v15 = vmul.f32 %v653_v14, %v653_v14  ;;  %4735 = vrsqrt.f32 %v676_v29  ;;  %v945_v29 = vld [vmem:[%s6750_s5 + $0x108] sm:$0xff] }
 0x232   : > { %v4732_v16 = vpop.eup %4731  ;;  %v667_v17 = vsel %vm632_vm1, %v657_v15, 0.0  ;;  %v931_v15 = vld [vmem:[%s6750_s5 + $0x98] sm:$0xff] }
 0x233   : > { %668 = vadd.xlane.f32.xlu1 %v667_v17  ;;  %v682_v19 = vmul.f32 %v4732_v16, %v650_v47  ;;  %v932_v16 = vld [vmem:[%s6750_s5 + $0xa0] sm:$0xff]  ;;  %v933_v17 = vld [vmem:[%s6750_s5 + $0xa8] sm:$0xff] }
 0x235   : > { %v693_v21 = vmul.f32 %v3853_v18, %v682_v19  ;;  %v935_v19 = vld [vmem:[%s6750_s5 + $0xb8] sm:$0xff] }
 0x236   : > { %v4734_v22 = vpop.eup %4733 }
 0x237   : > { %v704_v23 = vadd.f32 %v3854_v20, %v693_v21  ;;  %v683_v24 = vmul.f32 %v4734_v22, %v651_v53  ;;  %v937_v21 = vld [vmem:[%s6750_s5 + $0xc8] sm:$0xff]  ;;  %v938_v22 = vld [vmem:[%s6750_s5 + $0xd0] sm:$0xff] }
 0x239   : > { %4324 = vmatprep.mubr.msk.f32.mxu1 %vm632_vm1, %v704_v23  ;;  %v694_v25 = vmul.f32 %v3853_v18, %v683_v24  ;;  %v940_v24 = vld [vmem:[%s6750_s5 + $0xe0] sm:$0xff] }
 0x23a   : > { %v4736_v33 = vpop.eup %4735 }
 0x23b   : > { %v705_v26 = vadd.f32 %v3854_v20, %v694_v25  ;;  %v684_v34 = vmul.f32 %v4736_v33, %v652_v61  ;;  %v919_v61 = vld [vmem:[%s6750_s5 + $0x38] sm:$0xff]  ;;  %v941_v25 = vld [vmem:[%s6750_s5 + $0xe8] sm:$0xff] }
 0x23c   : > { %v949_v33 = vld [vmem:[%s6750_s5 + $0x128] sm:$0xff] }
 0x23d   : > { %4325 = vmatmul.mubr.msk.f32.vlgmr.msra.gmra.mrb[0].mxu1 %vm632_vm1, %v705_v26  ;;  %v695_v35 = vmul.f32 %v3853_v18, %v684_v34  ;;  %v950_v34 = vld [vmem:[%s6750_s5 + $0x130] sm:$0xff] }
 0x23e   : > { %4673 = vmatpush3.bf16.msra.mxu1 %v4670_v32  ;;  %v948_v32 = vld [vmem:[%s6750_s5 + $0x120] sm:$0xff] }
 0x23f   : > { %v706_v36 = vadd.f32 %v3854_v20, %v695_v35  ;;  %4675 = vmatprep.subr.bf16.mxu1 %v4674_v39  ;;  %v951_v35 = vld [vmem:[%s6750_s5 + $0x138] sm:$0xff] }
 0x241   : > { %4327 = vmatprep.mubr.msk.f32.mxu1 %vm632_vm1, %v706_v36 }
 0x242   : > { %4677 = vmatpush3.bf16.msra.mxu1 %v4674_v39 }
 0x2c0   : > { %v669_v41 = vpop.xlane.xlu1 %668 }
 0x2c1   : > { %v673_v42 = vmul.f32 0.03125, %v669_v41 }
 0x2c3   : > { %v677_v43 = vadd.f32 1e-05, %v673_v42 }
 0x2c5   : > { %4737 = vrsqrt.f32 %v677_v43 }
 0x2cf   : > { %v4738_v44 = vpop.eup %4737 }
 0x2d0   : > { %v685_v45 = vmul.f32 %v4738_v44, %v653_v14  ;;  %v930_v14 = vld [vmem:[%s6750_s5 + $0x90] sm:$0xff] }
 0x2d2   : > { %v696_v46 = vmul.f32 %v3853_v18, %v685_v45  ;;  %v934_v18 = vld [vmem:[%s6750_s5 + $0xb0] sm:$0xff] }
 0x2d4   : > { %v707_v47 = vadd.f32 %v3854_v20, %v696_v46  ;;  %v936_v20 = vld [vmem:[%s6750_s5 + $0xc0] sm:$0xff] }
 0x2d6   : > { %4328 = vmatmul.mubr.msk.f32.gmra.mrb[2].mxu1 %vm632_vm1, %v707_v47 }
 0x2d7   : > { %4338 = vmatprep.mubr.msk.f32.mxu1 %vm632_vm1, %v704_v23  ;;  %v939_v23 = vld [vmem:[%s6750_s5 + $0xd8] sm:$0xff] }
 0x2da   : > { %4339 = vmatmul.mubr.msk.f32.vlgmr.msra.gmra.mrb[4].mxu1 %vm632_vm1, %v705_v26  ;;  %v942_v26 = vld [vmem:[%s6750_s5 + $0xf0] sm:$0xff] }
 0x2db   : > { %4341 = vmatprep.mubr.msk.f32.mxu1 %vm632_vm1, %v706_v36 }
 0x2de   : > { %4342 = vmatmul.mubr.msk.f32.gmra.mrb[6].mxu1 %vm632_vm1, %v707_v47 }
 0x310   : > { %v4326_v49 = vpop.f32.mrb[0].mxu1 }
 0x311   : > { %v803_v50 = vadd.f32 %v4326_v49, %v5284_v48  ;;  %v797_v51 = vpop.f32.mrb[1].mxu1 }
 0x312   : > { %v798_v52 = vadd.f32 %v5284_v48, %v797_v51 }
 0x314   : > { %v4678_v54 = vpack.c.bf16 %v803_v50, %v798_v52 }
 0x316   : > { %4680 = vmatprep.subr.msk.bf16.mxu0 %vm5290_vm2, %v4678_v54 }
 0x317   : > { %4683 = vmatpush3.bf16.xpose.msk.msra.mxu0 %vm5290_vm2, %v4678_v54 }
 0x318   : > { %4689 = vmatprep.subr.bf16.mxu0 %v5358_v7 }
 0x31e   : > { %4349 = vmatmul.mubr.msk.f32.vlgmr.msra.gmra.mrb[4].mxu0 %vm632_vm1, %v913_v55 }
 0x31f   : > { %4351 = vmatprep.mubr.msk.f32.mxu0 %vm632_vm1, %v914_v56  ;;  %4691 = vmatpush3.bf16.msra.mxu0 %v5358_v7 }
 0x320   : > { %4693 = vmatprep.subr.bf16.mxu0 %v5367_v10 }
 0x322   : > { %4352 = vmatmul.mubr.msk.f32.gmra.mrb[6].mxu0 %vm632_vm1, %v915_v57 }
 0x323   : > { %4354 = vmatprep.mubr.msk.f32.mxu0 %vm632_vm1, %v916_v58  ;;  %4695 = vmatpush3.bf16.msra.mxu0 %v5367_v10 }
 0x326   : > { %4355 = vmatmul.mubr.msk.f32.gmra.mrb[8].mxu0 %vm632_vm1, %v917_v59 }
 0x327   : > { %4357 = vmatprep.mubr.msk.f32.mxu0 %vm632_vm1, %v918_v60 }
 0x32a   : > { %4358 = vmatmul.mubr.msk.f32.gmra.mrb[10].mxu0 %vm632_vm1, %v919_v61 }
 0x32b   : > { %4360 = vmatprep.mubr.msk.f32.mxu0 %vm632_vm1, %v920_v62 }
 0x32e   : > { %4361 = vmatmul.mubr.msk.f32.gmra.mrb[12].mxu0 %vm632_vm1, %v921_v63 }
 0x32f   : > { %4363 = vmatprep.mubr.msk.f32.mxu0 %vm632_vm1, %v922_v0 }
 0x332   : > { %4364 = vmatmul.mubr.msk.f32.gmra.mrb[14].mxu0 %vm632_vm1, %v923_v1 }
 0x333   : > { %4366 = vmatprep.mubr.msk.f32.mxu0 %vm632_vm1, %v924_v2 }
 0x336   : > { %4367 = vmatmul.mubr.msk.f32.gmra.mrb[16].mxu0 %vm632_vm1, %v925_v3 }
 0x337   : > { %4369 = vmatprep.mubr.msk.f32.mxu0 %vm632_vm1, %v926_v4 }
 0x33a   : > { %4370 = vmatmul.mubr.msk.f32.gmra.mrb[18].mxu0 %vm632_vm1, %v927_v11 }
 0x33b   : > { %4372 = vmatprep.mubr.msk.f32.mxu0 %vm632_vm1, %v928_v12 }
 0x33e   : > { %4373 = vmatmul.mubr.msk.f32.gmra.mrb[20].mxu0 %vm632_vm1, %v929_v13 }
 0x33f   : > { %4375 = vmatprep.mubr.msk.f32.mxu0 %vm632_vm1, %v930_v14 }
 0x342   : > { %4376 = vmatmul.mubr.msk.f32.gmra.mrb[22].mxu0 %vm632_vm1, %v931_v15 }
 0x343   : > { %4378 = vmatprep.mubr.msk.f32.mxu0 %vm632_vm1, %v932_v16 }
 0x346   : > { %4379 = vmatmul.mubr.msk.f32.gmra.mrb[24].mxu0 %vm632_vm1, %v933_v17 }
 0x347   : > { %4381 = vmatprep.mubr.msk.f32.mxu0 %vm632_vm1, %v934_v18 }
 0x34a   : > { %4382 = vmatmul.mubr.msk.f32.gmra.mrb[26].mxu0 %vm632_vm1, %v935_v19 }
 0x34b   : > { %4384 = vmatprep.mubr.msk.f32.mxu0 %vm632_vm1, %v936_v20 }
 0x34e   : > { %4385 = vmatmul.mubr.msk.f32.gmra.mrb[28].mxu0 %vm632_vm1, %v937_v21 }
 0x34f   : > { %4387 = vmatprep.mubr.msk.f32.mxu0 %vm632_vm1, %v938_v22 }
 0x352   : > { %4388 = vmatmul.mubr.msk.f32.gmra.mrb[30].mxu0 %vm632_vm1, %v939_v23 }
 0x353   : > { %4390 = vmatprep.mubr.msk.f32.mxu0 %vm632_vm1, %v940_v24 }
 0x356   : > { %4391 = vmatmul.mubr.msk.f32.gmra.mrb[32].mxu0 %vm632_vm1, %v941_v25 }
 0x357   : > { %4393 = vmatprep.mubr.msk.f32.mxu0 %vm632_vm1, %v942_v26 }
 0x35a   : > { %4394 = vmatmul.mubr.msk.f32.gmra.mrb[34].mxu0 %vm632_vm1, %v943_v27 }
 0x35b   : > { %4396 = vmatprep.mubr.msk.f32.mxu0 %vm632_vm1, %v944_v28 }
 0x35e   : > { %4397 = vmatmul.mubr.msk.f32.gmra.mrb[36].mxu0 %vm632_vm1, %v945_v29 }
 0x35f   : > { %4399 = vmatprep.mubr.msk.f32.mxu0 %vm632_vm1, %v946_v30 }
 0x362   : > { %4400 = vmatmul.mubr.msk.f32.gmra.mrb[38].mxu0 %vm632_vm1, %v947_v31 }
 0x363   : > { %4402 = vmatprep.mubr.msk.f32.mxu0 %vm632_vm1, %v948_v32 }
 0x366   : > { %4403 = vmatmul.mubr.msk.f32.gmra.mrb[40].mxu0 %vm632_vm1, %v949_v33 }
 0x367   : > { %4405 = vmatprep.mubr.msk.f32.mxu0 %vm632_vm1, %v950_v34 }
 0x36a   : > { %4406 = vmatmul.mubr.msk.f32.gmra.mrb[42].mxu0 %vm632_vm1, %v951_v35 }
 0x3a9   : > { %v4329_v36 = vpop.f32.mrb[2].mxu1 }
 0x3aa   : > { %v813_v37 = vadd.f32 %v4329_v36, %v5284_v48  ;;  %v807_v38 = vpop.f32.mrb[3].mxu1 }
 0x3ab   : > { %v808_v39 = vadd.f32 %v5284_v48, %v807_v38  ;;  %v5494_v48 = vld [vmem:[%s5491_s26] ss:$0 sm:$0xff] }
 0x3ad   : > { %v5479_v41 = vpack.c.bf16 %v813_v37, %v808_v39  ;;  %v4340_v42 = vpop.f32.mrb[4].mxu1 }
 0x3ae   : > { %v899_v43 = vadd.f32 %v4340_v42, %v3860_v40  ;;  %v893_v44 = vpop.f32.mrb[5].mxu1 }
 0x3af   : > { %v894_v45 = vadd.f32 %v3860_v40, %v893_v44 }
 0x3b1   : > { %v4684_v46 = vpack.c.bf16 %v899_v43, %v894_v45  ;;  %v4343_v47 = vpop.f32.mrb[6].mxu1 }
 0x3b2   : > { %v909_v49 = vadd.f32 %v4343_v47, %v3860_v40  ;;  %v903_v50 = vpop.f32.mrb[7].mxu1 }
 0x3b3   : > { %4685 = vmatprep.subr.bf16.mxu1 %v4684_v46  ;;  %v904_v51 = vadd.f32 %v3860_v40, %v903_v50 }
 0x3b4   : > { %4687 = vmatpush3.bf16.msra.mxu1 %v4684_v46 }
 0x3b5   : > { %v5481_v52 = vpack.c.bf16 %v909_v49, %v904_v51  ;;  %4698 = vmatprep.subr.msk.bf16.mxu1 %vm5290_vm2, %v5479_v41 }
 0x3b7   : > { %4703 = vmatprep.subr.bf16.mxu0 %v5481_v52 }
 0x3f1   : > { %v4350_v54 = vpop.f32.mrb[4].mxu0 }
 0x3f2   : > { %v5497_v55 = vadd.f32 %v4350_v54, %v5494_v48  ;;  %v1160_v56 = vpop.f32.mrb[5].mxu0 }
 0x3f3   : > { %v5500_v57 = vadd.f32 %v5494_v48, %v1160_v56 }
 0x3f4   : > { %v1363_v58 = vsel %vm1359_vm3, %v5497_v55, -inf }
 0x3f5   : > { %v4353_v59 = vpop.f32.mrb[6].mxu0  ;;  %1364 = vmax.xlane.f32.xlu1 %v1363_v58  ;;  %v1360_v60 = vsel %vm1359_vm3, %v5500_v57, -inf }
 0x3f6   : > { %v5507_v61 = vadd.f32 %v4353_v59, %v5494_v48  ;;  %v1170_v62 = vpop.f32.mrb[7].mxu0  ;;  %1361 = vmax.xlane.f32.xlu0 %v1360_v60 }
 0x3f7   : > { %v5510_v63 = vadd.f32 %v5494_v48, %v1170_v62 }
 0x3f8   : > { %v1369_v0 = vsel %vm1359_vm3, %v5507_v61, -inf }
 0x3f9   : > { %v4356_v1 = vpop.f32.mrb[8].mxu0  ;;  %1370 = vmax.xlane.f32.xlu1 %v1369_v0  ;;  %v1366_v2 = vsel %vm1359_vm3, %v5510_v63, -inf }
 0x3fa   : > { %v5517_v3 = vadd.f32 %v4356_v1, %v5494_v48  ;;  %v1180_v4 = vpop.f32.mrb[9].mxu0  ;;  %1367 = vmax.xlane.f32.xlu0 %v1366_v2 }
 0x3fb   : > { %v5520_v5 = vadd.f32 %v5494_v48, %v1180_v4 }
 0x3fc   : > { %v1375_v6 = vsel %vm1359_vm3, %v5517_v3, -inf }
 0x3fd   : > { %v4359_v8 = vpop.f32.mrb[10].mxu0  ;;  %1376 = vmax.xlane.f32.xlu1 %v1375_v6  ;;  %v1372_v9 = vsel %vm1359_vm3, %v5520_v5, -inf }
 0x3fe   : > { %v5527_v11 = vadd.f32 %v4359_v8, %v5494_v48  ;;  %v1190_v12 = vpop.f32.mrb[11].mxu0  ;;  %1373 = vmax.xlane.f32.xlu0 %v1372_v9 }
 0x3ff   : > { %v5530_v13 = vadd.f32 %v5494_v48, %v1190_v12 }
 0x400   : > { %v1381_v14 = vsel %vm1359_vm3, %v5527_v11, -inf }
 0x401   : > { %v4362_v15 = vpop.f32.mrb[12].mxu0  ;;  %1382 = vmax.xlane.f32.xlu1 %v1381_v14  ;;  %v1378_v16 = vsel %vm1359_vm3, %v5530_v13, -inf }
 0x402   : > { %v5537_v17 = vadd.f32 %v4362_v15, %v5494_v48  ;;  %v1200_v18 = vpop.f32.mrb[13].mxu0  ;;  %1379 = vmax.xlane.f32.xlu0 %v1378_v16 }
 0x403   : > { %v5540_v19 = vadd.f32 %v5494_v48, %v1200_v18 }
 0x404   : > { %v1387_v20 = vsel %vm1359_vm3, %v5537_v17, -inf }
 0x405   : > { %v4365_v21 = vpop.f32.mrb[14].mxu0  ;;  %1388 = vmax.xlane.f32.xlu1 %v1387_v20  ;;  %v1384_v22 = vsel %vm1359_vm3, %v5540_v19, -inf }
 0x406   : > { %v5547_v23 = vadd.f32 %v4365_v21, %v5494_v48  ;;  %v1210_v24 = vpop.f32.mrb[15].mxu0  ;;  %1385 = vmax.xlane.f32.xlu0 %v1384_v22 }
 0x407   : > { %v5550_v25 = vadd.f32 %v5494_v48, %v1210_v24 }
 0x408   : > { %v1393_v26 = vsel %vm1359_vm3, %v5547_v23, -inf }
 0x409   : > { %v4368_v27 = vpop.f32.mrb[16].mxu0  ;;  %1394 = vmax.xlane.f32.xlu1 %v1393_v26  ;;  %v1390_v28 = vsel %vm1359_vm3, %v5550_v25, -inf }
 0x40a   : > { %v5557_v29 = vadd.f32 %v4368_v27, %v5494_v48  ;;  %v1220_v30 = vpop.f32.mrb[17].mxu0  ;;  %1391 = vmax.xlane.f32.xlu0 %v1390_v28 }
 0x40b   : > { %v5560_v31 = vadd.f32 %v5494_v48, %v1220_v30 }
 0x40c   : > { %v1399_v32 = vsel %vm1359_vm3, %v5557_v29, -inf }
 0x40d   : > { %v4371_v33 = vpop.f32.mrb[18].mxu0  ;;  %1400 = vmax.xlane.f32.xlu1 %v1399_v32  ;;  %v1396_v34 = vsel %vm1359_vm3, %v5560_v31, -inf }
 0x40e   : > { %v5567_v35 = vadd.f32 %v4371_v33, %v5494_v48  ;;  %v1230_v36 = vpop.f32.mrb[19].mxu0  ;;  %1397 = vmax.xlane.f32.xlu0 %v1396_v34 }
 0x40f   : > { %v5570_v37 = vadd.f32 %v5494_v48, %v1230_v36 }
 0x410   : > { %v1405_v38 = vsel %vm1359_vm3, %v5567_v35, -inf }
 0x411   : > { %v4374_v39 = vpop.f32.mrb[20].mxu0  ;;  %1406 = vmax.xlane.f32.xlu1 %v1405_v38  ;;  %v1402_v40 = vsel %vm1359_vm3, %v5570_v37, -inf }
 0x412   : > { %v5577_v42 = vadd.f32 %v4374_v39, %v5494_v48  ;;  %v1240_v43 = vpop.f32.mrb[21].mxu0  ;;  %1403 = vmax.xlane.f32.xlu0 %v1402_v40 }
 0x413   : > { %v5580_v44 = vadd.f32 %v5494_v48, %v1240_v43 }
 0x414   : > { %v1411_v45 = vsel %vm1359_vm3, %v5577_v42, -inf }
 0x415   : > { %v4377_v46 = vpop.f32.mrb[22].mxu0  ;;  %1412 = vmax.xlane.f32.xlu1 %v1411_v45  ;;  %v1408_v47 = vsel %vm1359_vm3, %v5580_v44, -inf }
 0x416   : > { %v5587_v49 = vadd.f32 %v4377_v46, %v5494_v48  ;;  %v1250_v50 = vpop.f32.mrb[23].mxu0  ;;  %1409 = vmax.xlane.f32.xlu0 %v1408_v47 }
 0x417   : > { %v5590_v51 = vadd.f32 %v5494_v48, %v1250_v50 }
 0x418   : > { %v1417_v54 = vsel %vm1359_vm3, %v5587_v49, -inf }
 0x419   : > { %v4380_v56 = vpop.f32.mrb[24].mxu0  ;;  %1418 = vmax.xlane.f32.xlu1 %v1417_v54  ;;  %v1414_v58 = vsel %vm1359_vm3, %v5590_v51, -inf }
 0x41a   : > { %v5597_v59 = vadd.f32 %v4380_v56, %v5494_v48  ;;  %v1260_v60 = vpop.f32.mrb[25].mxu0  ;;  %1415 = vmax.xlane.f32.xlu0 %v1414_v58 }
 0x41b   : > { %v5600_v62 = vadd.f32 %v5494_v48, %v1260_v60 }
 0x41c   : > { %v1423_v0 = vsel %vm1359_vm3, %v5597_v59, -inf }
 0x41d   : > { %v4383_v1 = vpop.f32.mrb[26].mxu0  ;;  %1424 = vmax.xlane.f32.xlu1 %v1423_v0  ;;  %v1420_v2 = vsel %vm1359_vm3, %v5600_v62, -inf }
 0x41e   : > { %v5607_v4 = vadd.f32 %v4383_v1, %v5494_v48  ;;  %v1270_v6 = vpop.f32.mrb[27].mxu0  ;;  %1421 = vmax.xlane.f32.xlu0 %v1420_v2 }
 0x41f   : > { %v5610_v8 = vadd.f32 %v5494_v48, %v1270_v6 }
 0x420   : > { %v1429_v9 = vsel %vm1359_vm3, %v5607_v4, -inf }
 0x421   : > { %v4386_v12 = vpop.f32.mrb[28].mxu0  ;;  %1430 = vmax.xlane.f32.xlu1 %v1429_v9  ;;  %v1426_v14 = vsel %vm1359_vm3, %v5610_v8, -inf }
 0x422   : > { %v5617_v15 = vadd.f32 %v4386_v12, %v5494_v48  ;;  %v1280_v16 = vpop.f32.mrb[29].mxu0  ;;  %1427 = vmax.xlane.f32.xlu0 %v1426_v14 }
 0x423   : > { %v5620_v18 = vadd.f32 %v5494_v48, %v1280_v16 }
 0x424   : > { %v1435_v20 = vsel %vm1359_vm3, %v5617_v15, -inf }
 0x425   : > { %v4389_v21 = vpop.f32.mrb[30].mxu0  ;;  %1436 = vmax.xlane.f32.xlu1 %v1435_v20  ;;  %v1432_v22 = vsel %vm1359_vm3, %v5620_v18, -inf }
 0x426   : > { %v5627_v24 = vadd.f32 %v4389_v21, %v5494_v48  ;;  %v1290_v26 = vpop.f32.mrb[31].mxu0  ;;  %1433 = vmax.xlane.f32.xlu0 %v1432_v22 }
 0x427   : > { %v5630_v27 = vadd.f32 %v5494_v48, %v1290_v26 }
 0x428   : > { %v1441_v28 = vsel %vm1359_vm3, %v5627_v24, -inf }
 0x429   : > { %v4392_v30 = vpop.f32.mrb[32].mxu0  ;;  %1442 = vmax.xlane.f32.xlu1 %v1441_v28  ;;  %v1438_v32 = vsel %vm1359_vm3, %v5630_v27, -inf }
 0x42a   : > { %v5637_v33 = vadd.f32 %v4392_v30, %v5494_v48  ;;  %v1300_v34 = vpop.f32.mrb[33].mxu0  ;;  %1439 = vmax.xlane.f32.xlu0 %v1438_v32 }
 0x42b   : > { %v5640_v36 = vadd.f32 %v5494_v48, %v1300_v34 }
 0x42c   : > { %v1447_v38 = vsel %vm1359_vm3, %v5637_v33, -inf }
 0x42d   : > { %v4395_v39 = vpop.f32.mrb[34].mxu0  ;;  %1448 = vmax.xlane.f32.xlu1 %v1447_v38  ;;  %v1444_v40 = vsel %vm1359_vm3, %v5640_v36, -inf }
 0x42e   : > { %v5647_v43 = vadd.f32 %v4395_v39, %v5494_v48  ;;  %v1310_v45 = vpop.f32.mrb[35].mxu0  ;;  %1445 = vmax.xlane.f32.xlu0 %v1444_v40 }
 0x42f   : > { %v5650_v46 = vadd.f32 %v5494_v48, %v1310_v45 }
 0x430   : > { %v1453_v47 = vsel %vm1359_vm3, %v5647_v43, -inf }
 0x431   : > { %v4398_v50 = vpop.f32.mrb[36].mxu0  ;;  %1454 = vmax.xlane.f32.xlu1 %v1453_v47  ;;  %v1450_v54 = vsel %vm1359_vm3, %v5650_v46, -inf }
 0x432   : > { %v5657_v56 = vadd.f32 %v4398_v50, %v5494_v48  ;;  %v1320_v58 = vpop.f32.mrb[37].mxu0  ;;  %1451 = vmax.xlane.f32.xlu0 %v1450_v54 }
 0x433   : > { %v5660_v60 = vadd.f32 %v5494_v48, %v1320_v58 }
 0x434   : > { %v1459_v0 = vsel %vm1359_vm3, %v5657_v56, -inf }
 0x435   : > { %v4401_v1 = vpop.f32.mrb[38].mxu0  ;;  %1460 = vmax.xlane.f32.xlu1 %v1459_v0  ;;  %v1456_v2 = vsel %vm1359_vm3, %v5660_v60, -inf }
 0x436   : > { %v5667_v6 = vadd.f32 %v4401_v1, %v5494_v48  ;;  %v1330_v9 = vpop.f32.mrb[39].mxu0  ;;  %1457 = vmax.xlane.f32.xlu0 %v1456_v2 }
 0x437   : > { %v5670_v12 = vadd.f32 %v5494_v48, %v1330_v9 }
 0x438   : > { %v1465_v14 = vsel %vm1359_vm3, %v5667_v6, -inf }
 0x439   : > { %v4404_v16 = vpop.f32.mrb[40].mxu0  ;;  %1466 = vmax.xlane.f32.xlu1 %v1465_v14  ;;  %v1462_v20 = vsel %vm1359_vm3, %v5670_v12, -inf }
 0x43a   : > { %v5677_v21 = vadd.f32 %v4404_v16, %v5494_v48  ;;  %v1340_v22 = vpop.f32.mrb[41].mxu0  ;;  %1463 = vmax.xlane.f32.xlu0 %v1462_v20 }
 0x43b   : > { %v5680_v26 = vadd.f32 %v5494_v48, %v1340_v22 }
 0x43c   : > { %v1471_v28 = vsel %vm1359_vm3, %v5677_v21, -inf }
 0x43d   : > { %v4407_v30 = vpop.f32.mrb[42].mxu0  ;;  %1472 = vmax.xlane.f32.xlu1 %v1471_v28  ;;  %v1468_v32 = vsel %vm1359_vm3, %v5680_v26, -inf }
 0x43e   : > { %v5687_v34 = vadd.f32 %v4407_v30, %v5494_v48  ;;  %v1350_v38 = vpop.f32.mrb[43].mxu0  ;;  %1469 = vmax.xlane.f32.xlu0 %v1468_v32 }
 0x43f   : > { %v5690_v39 = vadd.f32 %v5494_v48, %v1350_v38 }
 0x440   : > { %v1477_v40 = vsel %vm1359_vm3, %v5687_v34, -inf }
 0x441   : > { %1478 = vmax.xlane.f32.xlu1 %v1477_v40  ;;  %v1474_v45 = vsel %vm1359_vm3, %v5690_v39, -inf }
 0x442   : > { %1475 = vmax.xlane.f32.xlu0 %v1474_v45 }
 0x482   : > { %v1365_v47 = vpop.xlane.xlu1 %1364 }
 0x483   : > { %v1481_v50 = vsub.f32 %v5497_v55, %v1365_v47  ;;  %v1362_v54 = vpop.xlane.xlu0 %1361 }
 0x484   : > { %v1480_v58 = vsub.f32 %v5500_v57, %v1362_v54 }
 0x485   : > { %v1522_v0 = vmul.f32 1.442695, %v1481_v50 }
 0x486   : > { %v1520_v1 = vmul.f32 1.442695, %v1480_v58  ;;  %v1371_v2 = vpop.xlane.xlu1 %1370 }
 0x487   : > { %4739 = vpow2.f32 %v1522_v0  ;;  %v1483_v48 = vsub.f32 %v5507_v61, %v1371_v2  ;;  %v1368_v9 = vpop.xlane.xlu0 %1367 }
 0x488   : > { %4741 = vpow2.f32 %v1520_v1  ;;  %v1482_v14 = vsub.f32 %v5510_v63, %v1368_v9 }
 0x489   : > { %v1526_v16 = vmul.f32 1.442695, %v1483_v48 }
 0x48a   : > { %v1524_v20 = vmul.f32 1.442695, %v1482_v14  ;;  %v1377_v22 = vpop.xlane.xlu1 %1376 }
 0x48b   : > { %4743 = vpow2.f32 %v1526_v16  ;;  %v1485_v28 = vsub.f32 %v5517_v3, %v1377_v22  ;;  %v1374_v55 = vpop.xlane.xlu0 %1373 }
 0x48c   : > { %4745 = vpow2.f32 %v1524_v20  ;;  %v1484_v57 = vsub.f32 %v5520_v5, %v1374_v55 }
 0x48d   : > { %v1530_v30 = vmul.f32 1.442695, %v1485_v28 }
 0x48e   : > { %v1528_v32 = vmul.f32 1.442695, %v1484_v57  ;;  %v1383_v38 = vpop.xlane.xlu1 %1382 }
 0x48f   : > { %4747 = vpow2.f32 %v1530_v30  ;;  %v1487_v61 = vsub.f32 %v5527_v11, %v1383_v38  ;;  %v1380_v40 = vpop.xlane.xlu0 %1379 }
 0x490   : > { %4749 = vpow2.f32 %v1528_v32  ;;  %v1486_v63 = vsub.f32 %v5530_v13, %v1380_v40 }
 0x491   : > { %v5704_v45 = vpop.eup %4739  ;;  %v1534_v47 = vmul.f32 1.442695, %v1487_v61 }
 0x492   : > { %v5706_v50 = vpop.eup %4741  ;;  %v1532_v3 = vmul.f32 1.442695, %v1486_v63  ;;  %v1389_v54 = vpop.xlane.xlu1 %1388  ;;  %v1603_v5 = vsel %vm1359_vm3, %v5704_v45, 0.0 }
 0x493   : > { %4751 = vpow2.f32 %v1534_v47  ;;  %v1489_v58 = vsub.f32 %v5537_v17, %v1389_v54  ;;  %1604 = vadd.xlane.f32.xlu1 %v1603_v5  ;;  %v1386_v0 = vpop.xlane.xlu0 %1385  ;;  %v1600_v11 = vsel %vm1359_vm3, %v5706_v50, 0.0 }
 0x494   : > { %4753 = vpow2.f32 %v1532_v3  ;;  %v1488_v13 = vsub.f32 %v5540_v19, %v1386_v0  ;;  %1601 = vadd.xlane.f32.xlu0 %v1600_v11 }
 0x495   : > { %v5714_v1 = vpop.eup %4743  ;;  %v1538_v2 = vmul.f32 1.442695, %v1489_v58 }
 0x496   : > { %v5716_v48 = vpop.eup %4745  ;;  %v1536_v9 = vmul.f32 1.442695, %v1488_v13  ;;  %v1395_v14 = vpop.xlane.xlu1 %1394  ;;  %v1609_v16 = vsel %vm1359_vm3, %v5714_v1, 0.0 }
 0x497   : > { %4755 = vpow2.f32 %v1538_v2  ;;  %v1491_v17 = vsub.f32 %v5547_v23, %v1395_v14  ;;  %1610 = vadd.xlane.f32.xlu1 %v1609_v16  ;;  %v1392_v20 = vpop.xlane.xlu0 %1391  ;;  %v1606_v22 = vsel %vm1359_vm3, %v5716_v48, 0.0 }
 0x498   : > { %4757 = vpow2.f32 %v1536_v9  ;;  %v1490_v19 = vsub.f32 %v5550_v25, %v1392_v20  ;;  %1607 = vadd.xlane.f32.xlu0 %v1606_v22 }
 0x499   : > { %v5724_v28 = vpop.eup %4747  ;;  %v1542_v55 = vmul.f32 1.442695, %v1491_v17 }
 0x49a   : > { %v5726_v57 = vpop.eup %4749  ;;  %v1540_v30 = vmul.f32 1.442695, %v1490_v19  ;;  %v1401_v32 = vpop.xlane.xlu1 %1400  ;;  %v1615_v38 = vsel %vm1359_vm3, %v5724_v28, 0.0 }
 0x49b   : > { %4759 = vpow2.f32 %v1542_v55  ;;  %v1493_v23 = vsub.f32 %v5557_v29, %v1401_v32  ;;  %1616 = vadd.xlane.f32.xlu1 %v1615_v38  ;;  %v1398_v61 = vpop.xlane.xlu0 %1397  ;;  %v1612_v40 = vsel %vm1359_vm3, %v5726_v57, 0.0 }
 0x49c   : > { %4761 = vpow2.f32 %v1540_v30  ;;  %v1492_v25 = vsub.f32 %v5560_v31, %v1398_v61  ;;  %1613 = vadd.xlane.f32.xlu0 %v1612_v40 }
 0x49d   : > { %v5734_v63 = vpop.eup %4751  ;;  %v1546_v47 = vmul.f32 1.442695, %v1493_v23 }
 0x49e   : > { %v5736_v3 = vpop.eup %4753  ;;  %v1544_v54 = vmul.f32 1.442695, %v1492_v25  ;;  %v1407_v5 = vpop.xlane.xlu1 %1406  ;;  %v1621_v58 = vsel %vm1359_vm3, %v5734_v63, 0.0 }
 0x49f   : > { %4763 = vpow2.f32 %v1546_v47  ;;  %v1495_v29 = vsub.f32 %v5567_v35, %v1407_v5  ;;  %1622 = vadd.xlane.f32.xlu1 %v1621_v58  ;;  %v1404_v0 = vpop.xlane.xlu0 %1403  ;;  %v1618_v11 = vsel %vm1359_vm3, %v5736_v3, 0.0 }
 0x4a0   : > { %4765 = vpow2.f32 %v1544_v54  ;;  %v1494_v31 = vsub.f32 %v5570_v37, %v1404_v0  ;;  %1619 = vadd.xlane.f32.xlu0 %v1618_v11 }
 0x4a1   : > { %v5744_v13 = vpop.eup %4755  ;;  %v1550_v2 = vmul.f32 1.442695, %v1495_v29 }
 0x4a2   : > { %v5746_v9 = vpop.eup %4757  ;;  %v1548_v14 = vmul.f32 1.442695, %v1494_v31  ;;  %v1413_v16 = vpop.xlane.xlu1 %1412  ;;  %v1627_v17 = vsel %vm1359_vm3, %v5744_v13, 0.0 }
 0x4a3   : > { %4767 = vpow2.f32 %v1550_v2  ;;  %v1497_v35 = vsub.f32 %v5577_v42, %v1413_v16  ;;  %1628 = vadd.xlane.f32.xlu1 %v1627_v17  ;;  %v1410_v20 = vpop.xlane.xlu0 %1409  ;;  %v1624_v22 = vsel %vm1359_vm3, %v5746_v9, 0.0 }
 0x4a4   : > { %4769 = vpow2.f32 %v1548_v14  ;;  %v1496_v37 = vsub.f32 %v5580_v44, %v1410_v20  ;;  %1625 = vadd.xlane.f32.xlu0 %v1624_v22 }
 0x4a5   : > { %v5754_v19 = vpop.eup %4759  ;;  %v1554_v55 = vmul.f32 1.442695, %v1497_v35 }
 0x4a6   : > { %v5756_v30 = vpop.eup %4761  ;;  %v1552_v32 = vmul.f32 1.442695, %v1496_v37  ;;  %v1419_v38 = vpop.xlane.xlu1 %1418  ;;  %v1633_v23 = vsel %vm1359_vm3, %v5754_v19, 0.0 }
 0x4a7   : > { %4771 = vpow2.f32 %v1554_v55  ;;  %v1499_v42 = vsub.f32 %v5587_v49, %v1419_v38  ;;  %1634 = vadd.xlane.f32.xlu1 %v1633_v23  ;;  %v1416_v61 = vpop.xlane.xlu0 %1415  ;;  %v1630_v40 = vsel %vm1359_vm3, %v5756_v30, 0.0 }
 0x4a8   : > { %4773 = vpow2.f32 %v1552_v32  ;;  %v1498_v44 = vsub.f32 %v5590_v51, %v1416_v61  ;;  %1631 = vadd.xlane.f32.xlu0 %v1630_v40 }
 0x4a9   : > { %v5764_v25 = vpop.eup %4763  ;;  %v1558_v47 = vmul.f32 1.442695, %v1499_v42 }
 0x4aa   : > { %v5766_v54 = vpop.eup %4765  ;;  %v1556_v5 = vmul.f32 1.442695, %v1498_v44  ;;  %v1425_v58 = vpop.xlane.xlu1 %1424  ;;  %v1639_v29 = vsel %vm1359_vm3, %v5764_v25, 0.0 }
 0x4ab   : > { %4775 = vpow2.f32 %v1558_v47  ;;  %v1501_v49 = vsub.f32 %v5597_v59, %v1425_v58  ;;  %1640 = vadd.xlane.f32.xlu1 %v1639_v29  ;;  %v1422_v0 = vpop.xlane.xlu0 %1421  ;;  %v1636_v11 = vsel %vm1359_vm3, %v5766_v54, 0.0 }
 0x4ac   : > { %4777 = vpow2.f32 %v1556_v5  ;;  %v1500_v51 = vsub.f32 %v5600_v62, %v1422_v0  ;;  %1637 = vadd.xlane.f32.xlu0 %v1636_v11 }
 0x4ad   : > { %v5774_v31 = vpop.eup %4767  ;;  %v1562_v2 = vmul.f32 1.442695, %v1501_v49 }
 0x4ae   : > { %v5776_v14 = vpop.eup %4769  ;;  %v1560_v16 = vmul.f32 1.442695, %v1500_v51  ;;  %v1431_v17 = vpop.xlane.xlu1 %1430  ;;  %v1645_v35 = vsel %vm1359_vm3, %v5774_v31, 0.0 }
 0x4af   : > { %4779 = vpow2.f32 %v1562_v2  ;;  %v1503_v59 = vsub.f32 %v5607_v4, %v1431_v17  ;;  %1646 = vadd.xlane.f32.xlu1 %v1645_v35  ;;  %v1428_v20 = vpop.xlane.xlu0 %1427  ;;  %v1642_v22 = vsel %vm1359_vm3, %v5776_v14, 0.0 }
 0x4b0   : > { %4781 = vpow2.f32 %v1560_v16  ;;  %v1502_v62 = vsub.f32 %v5610_v8, %v1428_v20  ;;  %1643 = vadd.xlane.f32.xlu0 %v1642_v22 }
 0x4b1   : > { %v5784_v37 = vpop.eup %4771  ;;  %v1566_v55 = vmul.f32 1.442695, %v1503_v59 }
 0x4b2   : > { %v5786_v32 = vpop.eup %4773  ;;  %v1564_v38 = vmul.f32 1.442695, %v1502_v62  ;;  %v1437_v23 = vpop.xlane.xlu1 %1436  ;;  %v1651_v42 = vsel %vm1359_vm3, %v5784_v37, 0.0 }
 0x4b3   : > { %4783 = vpow2.f32 %v1566_v55  ;;  %v1505_v4 = vsub.f32 %v5617_v15, %v1437_v23  ;;  %1652 = vadd.xlane.f32.xlu1 %v1651_v42  ;;  %v1434_v61 = vpop.xlane.xlu0 %1433  ;;  %v1648_v40 = vsel %vm1359_vm3, %v5786_v32, 0.0 }
 0x4b4   : > { %4785 = vpow2.f32 %v1564_v38  ;;  %v1504_v8 = vsub.f32 %v5620_v18, %v1434_v61  ;;  %1649 = vadd.xlane.f32.xlu0 %v1648_v40 }
 0x4b5   : > { %v5794_v44 = vpop.eup %4775  ;;  %v1570_v47 = vmul.f32 1.442695, %v1505_v4 }
 0x4b6   : > { %v5796_v5 = vpop.eup %4777  ;;  %v1568_v58 = vmul.f32 1.442695, %v1504_v8  ;;  %v1443_v29 = vpop.xlane.xlu1 %1442  ;;  %v1657_v49 = vsel %vm1359_vm3, %v5794_v44, 0.0 }
 0x4b7   : > { %4787 = vpow2.f32 %v1570_v47  ;;  %v1507_v15 = vsub.f32 %v5627_v24, %v1443_v29  ;;  %1658 = vadd.xlane.f32.xlu1 %v1657_v49  ;;  %v1440_v0 = vpop.xlane.xlu0 %1439  ;;  %v1654_v11 = vsel %vm1359_vm3, %v5796_v5, 0.0 }
 0x4b8   : > { %4789 = vpow2.f32 %v1568_v58  ;;  %v1506_v18 = vsub.f32 %v5630_v27, %v1440_v0  ;;  %1655 = vadd.xlane.f32.xlu0 %v1654_v11 }
 0x4b9   : > { %v5804_v51 = vpop.eup %4779  ;;  %v1574_v2 = vmul.f32 1.442695, %v1507_v15 }
 0x4ba   : > { %v5806_v16 = vpop.eup %4781  ;;  %v1572_v17 = vmul.f32 1.442695, %v1506_v18  ;;  %v1449_v35 = vpop.xlane.xlu1 %1448  ;;  %v1663_v59 = vsel %vm1359_vm3, %v5804_v51, 0.0 }
 0x4bb   : > { %4791 = vpow2.f32 %v1574_v2  ;;  %v1509_v24 = vsub.f32 %v5637_v33, %v1449_v35  ;;  %1664 = vadd.xlane.f32.xlu1 %v1663_v59  ;;  %v1446_v20 = vpop.xlane.xlu0 %1445  ;;  %v1660_v22 = vsel %vm1359_vm3, %v5806_v16, 0.0 }
 0x4bc   : > { %4793 = vpow2.f32 %v1572_v17  ;;  %v1508_v27 = vsub.f32 %v5640_v36, %v1446_v20  ;;  %1661 = vadd.xlane.f32.xlu0 %v1660_v22 }
 0x4bd   : > { %v5814_v62 = vpop.eup %4783  ;;  %v1578_v55 = vmul.f32 1.442695, %v1509_v24 }
 0x4be   : > { %v5816_v38 = vpop.eup %4785  ;;  %v1576_v23 = vmul.f32 1.442695, %v1508_v27  ;;  %v1455_v42 = vpop.xlane.xlu1 %1454  ;;  %v1669_v4 = vsel %vm1359_vm3, %v5814_v62, 0.0 }
 0x4bf   : > { %4795 = vpow2.f32 %v1578_v55  ;;  %v1511_v33 = vsub.f32 %v5647_v43, %v1455_v42  ;;  %1670 = vadd.xlane.f32.xlu1 %v1669_v4  ;;  %v1452_v61 = vpop.xlane.xlu0 %1451  ;;  %v1666_v40 = vsel %vm1359_vm3, %v5816_v38, 0.0 }
 0x4c0   : > { %4797 = vpow2.f32 %v1576_v23  ;;  %v1510_v36 = vsub.f32 %v5650_v46, %v1452_v61  ;;  %1667 = vadd.xlane.f32.xlu0 %v1666_v40 }
 0x4c1   : > { %v5824_v8 = vpop.eup %4787  ;;  %v1582_v47 = vmul.f32 1.442695, %v1511_v33 }
 0x4c2   : > { %v5826_v58 = vpop.eup %4789  ;;  %v1580_v29 = vmul.f32 1.442695, %v1510_v36  ;;  %v1461_v49 = vpop.xlane.xlu1 %1460  ;;  %v1675_v15 = vsel %vm1359_vm3, %v5824_v8, 0.0 }
 0x4c3   : > { %4799 = vpow2.f32 %v1582_v47  ;;  %v1513_v43 = vsub.f32 %v5657_v56, %v1461_v49  ;;  %1676 = vadd.xlane.f32.xlu1 %v1675_v15  ;;  %v1458_v0 = vpop.xlane.xlu0 %1457  ;;  %v1672_v11 = vsel %vm1359_vm3, %v5826_v58, 0.0 }
 0x4c4   : > { %4801 = vpow2.f32 %v1580_v29  ;;  %v1512_v46 = vsub.f32 %v5660_v60, %v1458_v0  ;;  %1673 = vadd.xlane.f32.xlu0 %v1672_v11 }
 0x4c5   : > { %v5834_v18 = vpop.eup %4791  ;;  %v1586_v2 = vmul.f32 1.442695, %v1513_v43 }
 0x4c6   : > { %v5836_v17 = vpop.eup %4793  ;;  %v1584_v35 = vmul.f32 1.442695, %v1512_v46  ;;  %v1467_v59 = vpop.xlane.xlu1 %1466  ;;  %v1681_v24 = vsel %vm1359_vm3, %v5834_v18, 0.0 }
 0x4c7   : > { %4803 = vpow2.f32 %v1586_v2  ;;  %v1515_v56 = vsub.f32 %v5667_v6, %v1467_v59  ;;  %1682 = vadd.xlane.f32.xlu1 %v1681_v24  ;;  %v1464_v20 = vpop.xlane.xlu0 %1463  ;;  %v1678_v22 = vsel %vm1359_vm3, %v5836_v17, 0.0 }
 0x4c8   : > { %4805 = vpow2.f32 %v1584_v35  ;;  %v1514_v60 = vsub.f32 %v5670_v12, %v1464_v20  ;;  %1679 = vadd.xlane.f32.xlu0 %v1678_v22 }
 0x4c9   : > { %v5844_v27 = vpop.eup %4795  ;;  %v1590_v55 = vmul.f32 1.442695, %v1515_v56 }
 0x4ca   : > { %v5846_v23 = vpop.eup %4797  ;;  %v1588_v42 = vmul.f32 1.442695, %v1514_v60  ;;  %v1473_v4 = vpop.xlane.xlu1 %1472  ;;  %v1687_v33 = vsel %vm1359_vm3, %v5844_v27, 0.0 }
 0x4cb   : > { %4807 = vpow2.f32 %v1590_v55  ;;  %v1517_v6 = vsub.f32 %v5677_v21, %v1473_v4  ;;  %1688 = vadd.xlane.f32.xlu1 %v1687_v33  ;;  %v1470_v61 = vpop.xlane.xlu0 %1469  ;;  %v1684_v40 = vsel %vm1359_vm3, %v5846_v23, 0.0 }
 0x4cc   : > { %4809 = vpow2.f32 %v1588_v42  ;;  %v1516_v12 = vsub.f32 %v5680_v26, %v1470_v61  ;;  %1685 = vadd.xlane.f32.xlu0 %v1684_v40 }
 0x4cd   : > { %v5854_v36 = vpop.eup %4799  ;;  %v1594_v47 = vmul.f32 1.442695, %v1517_v6 }
 0x4ce   : > { %v5856_v29 = vpop.eup %4801  ;;  %v1592_v49 = vmul.f32 1.442695, %v1516_v12  ;;  %v1479_v15 = vpop.xlane.xlu1 %1478  ;;  %v1693_v43 = vsel %vm1359_vm3, %v5854_v36, 0.0 }
 0x4cf   : > { %4811 = vpow2.f32 %v1594_v47  ;;  %v1519_v21 = vsub.f32 %v5687_v34, %v1479_v15  ;;  %1694 = vadd.xlane.f32.xlu1 %v1693_v43  ;;  %v1476_v0 = vpop.xlane.xlu0 %1475  ;;  %v1690_v11 = vsel %vm1359_vm3, %v5856_v29, 0.0 }
 0x4d0   : > { %4813 = vpow2.f32 %v1592_v49  ;;  %v1518_v26 = vsub.f32 %v5690_v39, %v1476_v0  ;;  %1691 = vadd.xlane.f32.xlu0 %v1690_v11 }
 0x4d1   : > { %v5864_v46 = vpop.eup %4803  ;;  %v1598_v2 = vmul.f32 1.442695, %v1519_v21 }
 0x4d2   : > { %v5866_v35 = vpop.eup %4805  ;;  %v1596_v59 = vmul.f32 1.442695, %v1518_v26  ;;  %v1699_v24 = vsel %vm1359_vm3, %v5864_v46, 0.0 }
 0x4d3   : > { %4815 = vpow2.f32 %v1598_v2  ;;  %1700 = vadd.xlane.f32.xlu1 %v1699_v24  ;;  %v1696_v34 = vsel %vm1359_vm3, %v5866_v35, 0.0 }
 0x4d4   : > { %4817 = vpow2.f32 %v1596_v59  ;;  %1697 = vadd.xlane.f32.xlu0 %v1696_v34 }
 0x4d5   : > { %v5872_v56 = vpop.eup %4807 }
 0x4d6   : > { %v5874_v39 = vpop.eup %4809  ;;  %v1705_v20 = vsel %vm1359_vm3, %v5872_v56, 0.0 }
 0x4d7   : > { %1706 = vadd.xlane.f32.xlu1 %v1705_v20  ;;  %v1702_v22 = vsel %vm1359_vm3, %v5874_v39, 0.0 }
 0x4d8   : > { %1703 = vadd.xlane.f32.xlu0 %v1702_v22 }
 0x4d9   : > { %v5880_v60 = vpop.eup %4811 }
 0x4da   : > { %v5882_v55 = vpop.eup %4813  ;;  %v1711_v42 = vsel %vm1359_vm3, %v5880_v60, 0.0 }
 0x4db   : > { %1712 = vadd.xlane.f32.xlu1 %v1711_v42  ;;  %v1708_v4 = vsel %vm1359_vm3, %v5882_v55, 0.0 }
 0x4dc   : > { %1709 = vadd.xlane.f32.xlu0 %v1708_v4 }
 0x4dd   : > { %v5888_v33 = vpop.eup %4815 }
 0x4de   : > { %v5890_v6 = vpop.eup %4817  ;;  %v1717_v61 = vsel %vm1359_vm3, %v5888_v33, 0.0 }
 0x4df   : > { %1718 = vadd.xlane.f32.xlu1 %v1717_v61  ;;  %v1714_v40 = vsel %vm1359_vm3, %v5890_v6, 0.0 }
 0x4e0   : > { %1715 = vadd.xlane.f32.xlu0 %v1714_v40 }
 0x520   : > { %v1605_v12 = vpop.xlane.xlu1 %1604 }
 0x521   : > { %4819 = vrcp.f32 %v1605_v12  ;;  %v1602_v47 = vpop.xlane.xlu0 %1601 }
 0x522   : > { %4821 = vrcp.f32 %v1602_v47 }
 0x524   : > { %v1611_v49 = vpop.xlane.xlu1 %1610 }
 0x525   : > { %4823 = vrcp.f32 %v1611_v49  ;;  %v1608_v15 = vpop.xlane.xlu0 %1607 }
 0x526   : > { %4825 = vrcp.f32 %v1608_v15 }
 0x528   : > { %v1617_v43 = vpop.xlane.xlu1 %1616 }
 0x529   : > { %4827 = vrcp.f32 %v1617_v43  ;;  %v1614_v21 = vpop.xlane.xlu0 %1613 }
 0x52a   : > { %4829 = vrcp.f32 %v1614_v21 }
 0x52b   : > { %v4820_v0 = vpop.eup %4819 }
 0x52c   : > { %v4822_v11 = vpop.eup %4821  ;;  %v1623_v26 = vpop.xlane.xlu1 %1622  ;;  %v1761_v24 = vmul.f32 %v4820_v0, %v5704_v45 }
 0x52d   : > { %4831 = vrcp.f32 %v1623_v26  ;;  %v1620_v2 = vpop.xlane.xlu0 %1619  ;;  %v1760_v59 = vmul.f32 %v4822_v11, %v5706_v50 }
 0x52e   : > { %4833 = vrcp.f32 %v1620_v2 }
 0x52f   : > { %v4824_v34 = vpop.eup %4823  ;;  %4412 = vmatprep.mubr.msk.f32.mxu1 %vm1359_vm3, %v1760_v59 }
 0x530   : > { %v4826_v20 = vpop.eup %4825  ;;  %v1629_v22 = vpop.xlane.xlu1 %1628  ;;  %4413 = vmatmul.mubr.msk.f32.vlgmr.msra.gmra.mrb[8].mxu1 %vm1359_vm3, %v1761_v24  ;;  %v1763_v50 = vmul.f32 %v4824_v34, %v5714_v1 }
 0x531   : > { %4835 = vrcp.f32 %v1629_v22  ;;  %4701 = vmatpush3.bf16.xpose.msk.msra.mxu1 %vm5290_vm2, %v5479_v41  ;;  %v1626_v42 = vpop.xlane.xlu0 %1625  ;;  %v1762_v4 = vmul.f32 %v4826_v20, %v5716_v48 }
 0x532   : > { %4837 = vrcp.f32 %v1626_v42  ;;  %4707 = vmatprep.subr.bf16.mxu1 %v5358_v7 }
 0x533   : > { %v4828_v45 = vpop.eup %4827  ;;  %4415 = vmatprep.mubr.msk.f32.mxu1 %vm1359_vm3, %v1762_v4 }
 0x534   : > { %v4830_v61 = vpop.eup %4829  ;;  %v1635_v40 = vpop.xlane.xlu1 %1634  ;;  %4416 = vmatmul.mubr.msk.f32.gmra.mrb[10].mxu1 %vm1359_vm3, %v1763_v50  ;;  %v1765_v41 = vmul.f32 %v4828_v45, %v5724_v28 }
 0x535   : > { %4839 = vrcp.f32 %v1635_v40  ;;  %v1632_v12 = vpop.xlane.xlu0 %1631  ;;  %v1764_v53 = vmul.f32 %v4830_v61, %v5726_v57 }
 0x536   : > { %4841 = vrcp.f32 %v1632_v12 }
 0x537   : > { %v4832_v48 = vpop.eup %4831  ;;  %4418 = vmatprep.mubr.msk.f32.mxu1 %vm1359_vm3, %v1764_v53 }
 0x538   : > { %v4834_v1 = vpop.eup %4833  ;;  %v1641_v47 = vpop.xlane.xlu1 %1640  ;;  %4419 = vmatmul.mubr.msk.f32.gmra.mrb[12].mxu1 %vm1359_vm3, %v1765_v41  ;;  %v1767_v43 = vmul.f32 %v4832_v48, %v5734_v63 }
 0x539   : > { %4843 = vrcp.f32 %v1641_v47  ;;  %v1638_v49 = vpop.xlane.xlu0 %1637  ;;  %v1766_v15 = vmul.f32 %v4834_v1, %v5736_v3 }
 0x53a   : > { %4845 = vrcp.f32 %v1638_v49 }
 0x53b   : > { %v4836_v21 = vpop.eup %4835  ;;  %4421 = vmatprep.mubr.msk.f32.mxu1 %vm1359_vm3, %v1766_v15 }
 0x53c   : > { %v4838_v57 = vpop.eup %4837  ;;  %v1647_v0 = vpop.xlane.xlu1 %1646  ;;  %4422 = vmatmul.mubr.msk.f32.gmra.mrb[14].mxu1 %vm1359_vm3, %v1767_v43  ;;  %v1769_v26 = vmul.f32 %v4836_v21, %v5744_v13 }
 0x53d   : > { %4847 = vrcp.f32 %v1647_v0  ;;  %v1644_v28 = vpop.xlane.xlu0 %1643  ;;  %v1768_v11 = vmul.f32 %v4838_v57, %v5746_v9 }
 0x53e   : > { %4849 = vrcp.f32 %v1644_v28 }
 0x53f   : > { %v4840_v2 = vpop.eup %4839  ;;  %4424 = vmatprep.mubr.msk.f32.mxu1 %vm1359_vm3, %v1768_v11 }
 0x540   : > { %v4842_v3 = vpop.eup %4841  ;;  %v1653_v59 = vpop.xlane.xlu1 %1652  ;;  %4425 = vmatmul.mubr.msk.f32.gmra.mrb[16].mxu1 %vm1359_vm3, %v1769_v26  ;;  %v1771_v34 = vmul.f32 %v4840_v2, %v5754_v19 }
 0x541   : > { %4851 = vrcp.f32 %v1653_v59  ;;  %v1650_v63 = vpop.xlane.xlu0 %1649  ;;  %v1770_v24 = vmul.f32 %v4842_v3, %v5756_v30 }
 0x542   : > { %4853 = vrcp.f32 %v1650_v63 }
 0x543   : > { %v4844_v20 = vpop.eup %4843  ;;  %4427 = vmatprep.mubr.msk.f32.mxu1 %vm1359_vm3, %v1770_v24 }
 0x544   : > { %v4846_v9 = vpop.eup %4845  ;;  %v1659_v22 = vpop.xlane.xlu1 %1658  ;;  %4428 = vmatmul.mubr.msk.f32.gmra.mrb[18].mxu1 %vm1359_vm3, %v1771_v34  ;;  %v1773_v4 = vmul.f32 %v4844_v20, %v5764_v25 }
 0x545   : > { %4855 = vrcp.f32 %v1659_v22  ;;  %v1656_v13 = vpop.xlane.xlu0 %1655  ;;  %v1772_v42 = vmul.f32 %v4846_v9, %v5766_v54 }
 0x546   : > { %4857 = vrcp.f32 %v1656_v13 }
 0x547   : > { %v4848_v50 = vpop.eup %4847  ;;  %4430 = vmatprep.mubr.msk.f32.mxu1 %vm1359_vm3, %v1772_v42 }
 0x548   : > { %v4850_v30 = vpop.eup %4849  ;;  %v1665_v45 = vpop.xlane.xlu1 %1664  ;;  %4431 = vmatmul.mubr.msk.f32.gmra.mrb[20].mxu1 %vm1359_vm3, %v1773_v4  ;;  %v1775_v40 = vmul.f32 %v4848_v50, %v5774_v31 }
 0x549   : > { %4859 = vrcp.f32 %v1665_v45  ;;  %v1662_v19 = vpop.xlane.xlu0 %1661  ;;  %v1774_v61 = vmul.f32 %v4850_v30, %v5776_v14 }
 0x54a   : > { %4861 = vrcp.f32 %v1662_v19 }
 0x54b   : > { %v4852_v12 = vpop.eup %4851  ;;  %4433 = vmatprep.mubr.msk.f32.mxu1 %vm1359_vm3, %v1774_v61 }
 0x54c   : > { %v4854_v54 = vpop.eup %4853  ;;  %v1671_v53 = vpop.xlane.xlu1 %1670  ;;  %4434 = vmatmul.mubr.msk.f32.gmra.mrb[22].mxu1 %vm1359_vm3, %v1775_v40  ;;  %v1777_v48 = vmul.f32 %v4852_v12, %v5784_v37 }
 0x54d   : > { %4863 = vrcp.f32 %v1671_v53  ;;  %v1668_v25 = vpop.xlane.xlu0 %1667  ;;  %v1776_v41 = vmul.f32 %v4854_v54, %v5786_v32 }
 0x54e   : > { %4865 = vrcp.f32 %v1668_v25 }
 0x54f   : > { %v4856_v1 = vpop.eup %4855  ;;  %4436 = vmatprep.mubr.msk.f32.mxu1 %vm1359_vm3, %v1776_v41 }
 0x550   : > { %v4858_v14 = vpop.eup %4857  ;;  %v1677_v47 = vpop.xlane.xlu1 %1676  ;;  %4437 = vmatmul.mubr.msk.f32.gmra.mrb[24].mxu1 %vm1359_vm3, %v1777_v48  ;;  %v1779_v15 = vmul.f32 %v4856_v1, %v5794_v44 }
 0x551   : > { %4867 = vrcp.f32 %v1677_v47  ;;  %v1674_v31 = vpop.xlane.xlu0 %1673  ;;  %v1778_v49 = vmul.f32 %v4858_v14, %v5796_v5 }
 0x552   : > { %4869 = vrcp.f32 %v1674_v31  ;;  %v5063_v31 = vld [vmem:[%s6750_s5 + $0x20] sm:$0xff] }
 0x553   : > { %v4860_v43 = vpop.eup %4859  ;;  %4439 = vmatprep.mubr.msk.f32.mxu1 %vm1359_vm3, %v1778_v49  ;;  %v5065_v49 = vld [vmem:[%s6750_s5 + $0x30] sm:$0xff] }
 0x554   : > { %v4862_v32 = vpop.eup %4861  ;;  %v1683_v21 = vpop.xlane.xlu1 %1682  ;;  %4440 = vmatmul.mubr.msk.f32.gmra.mrb[26].mxu1 %vm1359_vm3, %v1779_v15  ;;  %v1781_v0 = vmul.f32 %v4860_v43, %v5804_v51  ;;  %v5066_v15 = vld [vmem:[%s6750_s5 + $0x38] sm:$0xff]  ;;  %v5068_v43 = vld [vmem:[%s6750_s5 + $0x48] sm:$0xff] }
 0x555   : > { %4871 = vrcp.f32 %v1683_v21  ;;  %v1680_v37 = vpop.xlane.xlu0 %1679  ;;  %v1780_v57 = vmul.f32 %v4862_v32, %v5806_v16  ;;  %v5069_v32 = vld [vmem:[%s6750_s5 + $0x50] sm:$0xff]  ;;  %v5070_v21 = vld [vmem:[%s6750_s5 + $0x58] sm:$0xff] }
 0x556   : > { %4873 = vrcp.f32 %v1680_v37  ;;  %v5071_v37 = vld [vmem:[%s6750_s5 + $0x60] sm:$0xff] }
 0x557   : > { %v4864_v28 = vpop.eup %4863  ;;  %4442 = vmatprep.mubr.msk.f32.mxu1 %vm1359_vm3, %v1780_v57  ;;  %v5072_v57 = vld [vmem:[%s6750_s5 + $0x68] sm:$0xff] }
 0x558   : > { %v4866_v5 = vpop.eup %4865  ;;  %v1689_v11 = vpop.xlane.xlu1 %1688  ;;  %4443 = vmatmul.mubr.msk.f32.gmra.mrb[28].mxu1 %vm1359_vm3, %v1781_v0  ;;  %v1783_v2 = vmul.f32 %v4864_v28, %v5814_v62  ;;  %v5073_v0 = vld [vmem:[%s6750_s5 + $0x70] sm:$0xff]  ;;  %v5074_v28 = vld [vmem:[%s6750_s5 + $0x78] sm:$0xff] }
 0x559   : > { %4875 = vrcp.f32 %v1689_v11  ;;  %v1686_v44 = vpop.xlane.xlu0 %1685  ;;  %v1782_v26 = vmul.f32 %v4866_v5, %v5816_v38  ;;  %v5075_v5 = vld [vmem:[%s6750_s5 + $0x80] sm:$0xff]  ;;  %v5076_v11 = vld [vmem:[%s6750_s5 + $0x88] sm:$0xff] }
 0x55a   : > { %4877 = vrcp.f32 %v1686_v44  ;;  %v5077_v44 = vld [vmem:[%s6750_s5 + $0x90] sm:$0xff] }
 0x55b   : > { %v4868_v3 = vpop.eup %4867  ;;  %4445 = vmatprep.mubr.msk.f32.mxu1 %vm1359_vm3, %v1782_v26  ;;  %v5078_v26 = vld [vmem:[%s6750_s5 + $0x98] sm:$0xff] }
 0x55c   : > { %v4870_v16 = vpop.eup %4869  ;;  %v1695_v59 = vpop.xlane.xlu1 %1694  ;;  %4446 = vmatmul.mubr.msk.f32.gmra.mrb[30].mxu1 %vm1359_vm3, %v1783_v2  ;;  %v1785_v24 = vmul.f32 %v4868_v3, %v5824_v8  ;;  %v5079_v2 = vld [vmem:[%s6750_s5 + $0xa0] sm:$0xff]  ;;  %v5080_v3 = vld [vmem:[%s6750_s5 + $0xa8] sm:$0xff] }
 0x55d   : > { %4879 = vrcp.f32 %v1695_v59  ;;  %v1692_v51 = vpop.xlane.xlu0 %1691  ;;  %v1784_v63 = vmul.f32 %v4870_v16, %v5826_v58  ;;  %v5081_v16 = vld [vmem:[%s6750_s5 + $0xb0] sm:$0xff]  ;;  %v5082_v59 = vld [vmem:[%s6750_s5 + $0xb8] sm:$0xff] }
 0x55e   : > { %4881 = vrcp.f32 %v1692_v51  ;;  %v5083_v51 = vld [vmem:[%s6750_s5 + $0xc0] sm:$0xff] }
 0x55f   : > { %v4872_v34 = vpop.eup %4871  ;;  %4448 = vmatprep.mubr.msk.f32.mxu1 %vm1359_vm3, %v1784_v63  ;;  %v5084_v63 = vld [vmem:[%s6750_s5 + $0xc8] sm:$0xff] }
 0x560   : > { %v4874_v38 = vpop.eup %4873  ;;  %v1701_v20 = vpop.xlane.xlu1 %1700  ;;  %4449 = vmatmul.mubr.msk.f32.gmra.mrb[32].mxu1 %vm1359_vm3, %v1785_v24  ;;  %v1787_v22 = vmul.f32 %v4872_v34, %v5834_v18  ;;  %v5085_v24 = vld [vmem:[%s6750_s5 + $0xd0] sm:$0xff]  ;;  %v5086_v34 = vld [vmem:[%s6750_s5 + $0xd8] sm:$0xff] }
 0x561   : > { %4883 = vrcp.f32 %v1701_v20  ;;  %v1698_v62 = vpop.xlane.xlu0 %1697  ;;  %v1786_v9 = vmul.f32 %v4874_v38, %v5836_v17  ;;  %v5087_v38 = vld [vmem:[%s6750_s5 + $0xe0] sm:$0xff]  ;;  %v5088_v20 = vld [vmem:[%s6750_s5 + $0xe8] sm:$0xff] }
 0x562   : > { %4885 = vrcp.f32 %v1698_v62  ;;  %v5089_v62 = vld [vmem:[%s6750_s5 + $0xf0] sm:$0xff] }
 0x563   : > { %v4876_v13 = vpop.eup %4875  ;;  %4451 = vmatprep.mubr.msk.f32.mxu1 %vm1359_vm3, %v1786_v9  ;;  %v5090_v9 = vld [vmem:[%s6750_s5 + $0xf8] sm:$0xff] }
 0x564   : > { %v4878_v58 = vpop.eup %4877  ;;  %v1707_v42 = vpop.xlane.xlu1 %1706  ;;  %4452 = vmatmul.mubr.msk.f32.gmra.mrb[34].mxu1 %vm1359_vm3, %v1787_v22  ;;  %v1789_v50 = vmul.f32 %v4876_v13, %v5844_v27  ;;  %v5091_v22 = vld [vmem:[%s6750_s5 + $0x100] sm:$0xff]  ;;  %v5092_v13 = vld [vmem:[%s6750_s5 + $0x108] sm:$0xff] }
 0x565   : > { %4887 = vrcp.f32 %v1707_v42  ;;  %v1704_v8 = vpop.xlane.xlu0 %1703  ;;  %v1788_v4 = vmul.f32 %v4878_v58, %v5846_v23  ;;  %v5093_v58 = vld [vmem:[%s6750_s5 + $0x110] sm:$0xff]  ;;  %v5094_v42 = vld [vmem:[%s6750_s5 + $0x118] sm:$0xff] }
 0x566   : > { %4889 = vrcp.f32 %v1704_v8  ;;  %v5095_v8 = vld [vmem:[%s6750_s5 + $0x120] sm:$0xff] }
 0x567   : > { %v4880_v30 = vpop.eup %4879  ;;  %4454 = vmatprep.mubr.msk.f32.mxu1 %vm1359_vm3, %v1788_v4  ;;  %v5096_v4 = vld [vmem:[%s6750_s5 + $0x128] sm:$0xff] }
 0x568   : > { %v4882_v17 = vpop.eup %4881  ;;  %v1713_v45 = vpop.xlane.xlu1 %1712  ;;  %4455 = vmatmul.mubr.msk.f32.gmra.mrb[36].mxu1 %vm1359_vm3, %v1789_v50  ;;  %v1791_v61 = vmul.f32 %v4880_v30, %v5854_v36  ;;  %v5097_v50 = vld [vmem:[%s6750_s5 + $0x130] sm:$0xff]  ;;  %v5098_v30 = vld [vmem:[%s6750_s5 + $0x138] sm:$0xff] }
 0x569   : > { %4891 = vrcp.f32 %v1713_v45  ;;  %v1710_v18 = vpop.xlane.xlu0 %1709  ;;  %v1790_v19 = vmul.f32 %v4882_v17, %v5856_v29 }
 0x56a   : > { %4893 = vrcp.f32 %v1710_v18 }
 0x56b   : > { %v4884_v40 = vpop.eup %4883  ;;  %4457 = vmatprep.mubr.msk.f32.mxu1 %vm1359_vm3, %v1790_v19 }
 0x56c   : > { %v4886_v23 = vpop.eup %4885  ;;  %v1719_v12 = vpop.xlane.xlu1 %1718  ;;  %4458 = vmatmul.mubr.msk.f32.gmra.mrb[38].mxu1 %vm1359_vm3, %v1791_v61  ;;  %v1793_v53 = vmul.f32 %v4884_v40, %v5864_v46 }
 0x56d   : > { %4895 = vrcp.f32 %v1719_v12  ;;  %v1716_v27 = vpop.xlane.xlu0 %1715  ;;  %v1792_v54 = vmul.f32 %v4886_v23, %v5866_v35 }
 0x56e   : > { %4897 = vrcp.f32 %v1716_v27 }
 0x56f   : > { %v4888_v25 = vpop.eup %4887  ;;  %4460 = vmatprep.mubr.msk.f32.mxu1 %vm1359_vm3, %v1792_v54 }
 0x570   : > { %v4890_v29 = vpop.eup %4889  ;;  %4461 = vmatmul.mubr.msk.f32.gmra.mrb[40].mxu1 %vm1359_vm3, %v1793_v53  ;;  %v1795_v41 = vmul.f32 %v4888_v25, %v5872_v56  ;;  %v3948_v53 = vld [vmem:[%s6751_s6] ss:$0 sm:$0xff]  ;;  %v3949_v25 = vld [vmem:[%s6751_s6 + $0x1] ss:$0 sm:$0xff] }
 0x571   : > { %v1794_v36 = vmul.f32 %v4890_v29, %v5874_v39 }
 0x573   : > { %v4892_v48 = vpop.eup %4891  ;;  %4463 = vmatprep.mubr.msk.f32.mxu1 %vm1359_vm3, %v1794_v36 }
 0x574   : > { %v4894_v1 = vpop.eup %4893  ;;  %4464 = vmatmul.mubr.msk.f32.gmra.mrb[42].mxu1 %vm1359_vm3, %v1795_v41  ;;  %v1797_v46 = vmul.f32 %v4892_v48, %v5880_v60  ;;  %v5060_v60 = vld [vmem:[%s6750_s5 + $0x8] sm:$0xff] }
 0x575   : > { %v1796_v35 = vmul.f32 %v4894_v1, %v5882_v55  ;;  %v5059_v55 = vld [vmem:[%s6750_s5] sm:$0xff] }
 0x577   : > { %v4896_v14 = vpop.eup %4895  ;;  %4466 = vmatprep.mubr.msk.f32.mxu1 %vm1359_vm3, %v1796_v35 }
 0x578   : > { %v4898_v47 = vpop.eup %4897  ;;  %4467 = vmatmul.mubr.msk.f32.gmra.mrb[44].mxu1 %vm1359_vm3, %v1797_v46  ;;  %v1799_v56 = vmul.f32 %v4896_v14, %v5888_v33  ;;  %v5061_v33 = vld [vmem:[%s6750_s5 + $0x10] sm:$0xff] }
 0x579   : > { %v1798_v39 = vmul.f32 %v4898_v47, %v5890_v6  ;;  %v5062_v6 = vld [vmem:[%s6750_s5 + $0x18] sm:$0xff] }
 0x57b   : > { %4469 = vmatprep.mubr.msk.f32.mxu1 %vm1359_vm3, %v1798_v39 }
 0x57c   : > { %4470 = vmatmul.mubr.msk.f32.gmra.mrb[46].mxu1 %vm1359_vm3, %v1799_v56 }
 0x57d   : > { %4499 = vmatprep.mubr.msk.f32.mxu1 %vm632_vm1, %v5059_v55 }
 0x580   : > { %4500 = vmatmul.mubr.msk.f32.vlgmr.msra.gmra.mrb[48].mxu1 %vm632_vm1, %v5060_v60 }
 0x581   : > { %4502 = vmatprep.mubr.msk.f32.mxu1 %vm632_vm1, %v5061_v33  ;;  %4709 = vmatpush3.bf16.msra.mxu1 %v5358_v7  ;;  %v5064_v7 = vld [vmem:[%s6750_s5 + $0x28] sm:$0xff] }
 0x582   : > { %4711 = vmatprep.subr.bf16.mxu1 %v5367_v10 }
 0x584   : > { %4503 = vmatmul.mubr.msk.f32.gmra.mrb[50].mxu1 %vm632_vm1, %v5062_v6 }
 0x585   : > { %4505 = vmatprep.mubr.msk.f32.mxu1 %vm632_vm1, %v5063_v31  ;;  %4713 = vmatpush3.bf16.msra.mxu1 %v5367_v10  ;;  %v5067_v10 = vld [vmem:[%s6750_s5 + $0x40] sm:$0xff] }
 0x588   : > { %4506 = vmatmul.mubr.msk.f32.gmra.mrb[52].mxu1 %vm632_vm1, %v5064_v7 }
 0x589   : > { %4508 = vmatprep.mubr.msk.f32.mxu1 %vm632_vm1, %v5065_v49 }
 0x58c   : > { %4509 = vmatmul.mubr.msk.f32.gmra.mrb[54].mxu1 %vm632_vm1, %v5066_v15 }
 0x58d   : > { %4511 = vmatprep.mubr.msk.f32.mxu1 %vm632_vm1, %v5067_v10 }
 0x590   : > { %4512 = vmatmul.mubr.msk.f32.gmra.mrb[56].mxu1 %vm632_vm1, %v5068_v43 }
 0x591   : > { %4514 = vmatprep.mubr.msk.f32.mxu1 %vm632_vm1, %v5069_v32 }
 0x594   : > { %4515 = vmatmul.mubr.msk.f32.gmra.mrb[58].mxu1 %vm632_vm1, %v5070_v21 }
 0x595   : > { %4517 = vmatprep.mubr.msk.f32.mxu1 %vm632_vm1, %v5071_v37 }
 0x598   : > { %4518 = vmatmul.mubr.msk.f32.gmra.mrb[60].mxu1 %vm632_vm1, %v5072_v57 }
 0x599   : > { %4520 = vmatprep.mubr.msk.f32.mxu1 %vm632_vm1, %v5073_v0 }
 0x59c   : > { %4521 = vmatmul.mubr.msk.f32.gmra.mrb[62].mxu1 %vm632_vm1, %v5074_v28 }
 0x59d   : > { %4523 = vmatprep.mubr.msk.f32.mxu1 %vm632_vm1, %v5075_v5 }
 0x5a0   : > { %4524 = vmatmul.mubr.msk.f32.gmra.mrb[64].mxu1 %vm632_vm1, %v5076_v11 }
 0x5a1   : > { %4526 = vmatprep.mubr.msk.f32.mxu1 %vm632_vm1, %v5077_v44 }
 0x5a4   : > { %4527 = vmatmul.mubr.msk.f32.gmra.mrb[66].mxu1 %vm632_vm1, %v5078_v26 }
 0x5a5   : > { %4529 = vmatprep.mubr.msk.f32.mxu1 %vm632_vm1, %v5079_v2 }
 0x5a8   : > { %4530 = vmatmul.mubr.msk.f32.gmra.mrb[68].mxu1 %vm632_vm1, %v5080_v3 }
 0x5a9   : > { %4532 = vmatprep.mubr.msk.f32.mxu1 %vm632_vm1, %v5081_v16 }
 0x5ac   : > { %4533 = vmatmul.mubr.msk.f32.gmra.mrb[70].mxu1 %vm632_vm1, %v5082_v59 }
 0x5ad   : > { %4535 = vmatprep.mubr.msk.f32.mxu1 %vm632_vm1, %v5083_v51 }
 0x5b0   : > { %4536 = vmatmul.mubr.msk.f32.gmra.mrb[72].mxu1 %vm632_vm1, %v5084_v63 }
 0x5b1   : > { %4538 = vmatprep.mubr.msk.f32.mxu1 %vm632_vm1, %v5085_v24 }
 0x5b4   : > { %4539 = vmatmul.mubr.msk.f32.gmra.mrb[74].mxu1 %vm632_vm1, %v5086_v34  ;;  %v3950_v34 = vld [vmem:[%s6751_s6 + $0x2] ss:$0 sm:$0xff] }
 0x5b5   : > { %4541 = vmatprep.mubr.msk.f32.mxu1 %vm632_vm1, %v5087_v38 }
 0x5b8   : > { %4542 = vmatmul.mubr.msk.f32.gmra.mrb[76].mxu1 %vm632_vm1, %v5088_v20 }
 0x5b9   : > { %4544 = vmatprep.mubr.msk.f32.mxu1 %vm632_vm1, %v5089_v62 }
 0x5bc   : > { %4545 = vmatmul.mubr.msk.f32.gmra.mrb[78].mxu1 %vm632_vm1, %v5090_v9 }
 0x5bd   : > { %4547 = vmatprep.mubr.msk.f32.mxu1 %vm632_vm1, %v5091_v22 }
 0x5c0   : > { %4548 = vmatmul.mubr.msk.f32.gmra.mrb[80].mxu1 %vm632_vm1, %v5092_v13 }
 0x5c1   : > { %4550 = vmatprep.mubr.msk.f32.mxu1 %vm632_vm1, %v5093_v58 }
 0x5c4   : > { %4551 = vmatmul.mubr.msk.f32.gmra.mrb[82].mxu1 %vm632_vm1, %v5094_v42 }
 0x5c5   : > { %4553 = vmatprep.mubr.msk.f32.mxu1 %vm632_vm1, %v5095_v8 }
 0x5c8   : > { %4554 = vmatmul.mubr.msk.f32.gmra.mrb[84].mxu1 %vm632_vm1, %v5096_v4 }
 0x5c9   : > { %4556 = vmatprep.mubr.msk.f32.mxu1 %vm632_vm1, %v5097_v50 }
 0x5cc   : > { %4557 = vmatmul.mubr.msk.f32.gmra.mrb[86].mxu1 %vm632_vm1, %v5098_v30 }
 0x603   : > { %v4414_v17 = vpop.f32.mrb[8].mxu1 }
 0x604   : > { %v1986_v45 = vpop.f32.mrb[9].mxu1  ;;  %v2192_v36 = vmul.f32 %v4414_v17, %v3948_v53 }
 0x605   : > { %v2191_v1 = vmul.f32 %v3948_v53, %v1986_v45 }
 0x607   : > { %v4417_v18 = vpop.f32.mrb[10].mxu1 }
 0x608   : > { %v1996_v19 = vpop.f32.mrb[11].mxu1  ;;  %v2194_v39 = vmul.f32 %v4417_v18, %v3948_v53 }
 0x609   : > { %v2193_v60 = vmul.f32 %v3948_v53, %v1996_v19 }
 0x60b   : > { %v4420_v61 = vpop.f32.mrb[12].mxu1 }
 0x60c   : > { %v2006_v40 = vpop.f32.mrb[13].mxu1  ;;  %v2196_v49 = vmul.f32 %v4420_v61, %v3948_v53 }
 0x60d   : > { %v2195_v43 = vmul.f32 %v3948_v53, %v2006_v40 }
 0x60f   : > { %v4423_v23 = vpop.f32.mrb[14].mxu1 }
 0x610   : > { %v2016_v12 = vpop.f32.mrb[15].mxu1  ;;  %v2198_v0 = vmul.f32 %v4423_v23, %v3948_v53 }
 0x611   : > { %v2197_v11 = vmul.f32 %v3948_v53, %v2016_v12 }
 0x613   : > { %v4426_v27 = vpop.f32.mrb[16].mxu1 }
 0x614   : > { %v2026_v54 = vpop.f32.mrb[17].mxu1  ;;  %v2200_v16 = vmul.f32 %v4426_v27, %v3948_v53 }
 0x615   : > { %v2199_v63 = vmul.f32 %v3948_v53, %v2026_v54 }
 0x617   : > { %v4429_v29 = vpop.f32.mrb[18].mxu1 }
 0x618   : > { %v2208_v41 = vmul.f32 %v4429_v29, %v3949_v25  ;;  %v2036_v48 = vpop.f32.mrb[19].mxu1 }
 0x619   : > { %v2207_v35 = vmul.f32 %v3949_v25, %v2036_v48 }
 0x61a   : > { %v2218_v46 = vadd.f32 %v2208_v41, %v2192_v36 }
 0x61b   : > { %v2217_v14 = vadd.f32 %v2207_v35, %v2191_v1  ;;  %v4432_v47 = vpop.f32.mrb[20].mxu1 }
 0x61c   : > { %v2210_v56 = vmul.f32 %v4432_v47, %v3949_v25  ;;  %v2046_v55 = vpop.f32.mrb[21].mxu1 }
 0x61d   : > { %v2209_v33 = vmul.f32 %v3949_v25, %v2046_v55 }
 0x61e   : > { %v2220_v6 = vadd.f32 %v2210_v56, %v2194_v39 }
 0x61f   : > { %v2219_v31 = vadd.f32 %v2209_v33, %v2193_v60  ;;  %v4435_v7 = vpop.f32.mrb[22].mxu1 }
 0x620   : > { %v2212_v15 = vmul.f32 %v4435_v7, %v3949_v25  ;;  %v2056_v10 = vpop.f32.mrb[23].mxu1 }
 0x621   : > { %v2211_v32 = vmul.f32 %v3949_v25, %v2056_v10 }
 0x622   : > { %v2222_v21 = vadd.f32 %v2212_v15, %v2196_v49 }
 0x623   : > { %v2221_v37 = vadd.f32 %v2211_v32, %v2195_v43  ;;  %v4438_v57 = vpop.f32.mrb[24].mxu1 }
 0x624   : > { %v2214_v28 = vmul.f32 %v4438_v57, %v3949_v25  ;;  %v2066_v5 = vpop.f32.mrb[25].mxu1 }
 0x625   : > { %v2213_v44 = vmul.f32 %v3949_v25, %v2066_v5 }
 0x626   : > { %v2224_v26 = vadd.f32 %v2214_v28, %v2198_v0 }
 0x627   : > { %v2223_v2 = vadd.f32 %v2213_v44, %v2197_v11  ;;  %v4441_v3 = vpop.f32.mrb[26].mxu1 }
 0x628   : > { %v2216_v59 = vmul.f32 %v4441_v3, %v3949_v25  ;;  %v2076_v51 = vpop.f32.mrb[27].mxu1 }
 0x629   : > { %v2215_v24 = vmul.f32 %v3949_v25, %v2076_v51  ;;  %v6163_v51 = vld [vmem:[%s5491_s26 + $0x1] ss:$0 sm:$0xff]  ;;  %s4714_s26 = smul.u32 80, %s6763_s21 }
 0x62a   : > { %v2226_v38 = vadd.f32 %v2216_v59, %v2200_v16 }
 0x62b   : > { %v2225_v20 = vadd.f32 %v2215_v24, %v2199_v63  ;;  %v4444_v62 = vpop.f32.mrb[28].mxu1  ;;  %s6482_s27 = scalar_lea.vmem %s6759_s14, %s4714_s26 }
 0x62c   : > { %v2234_v9 = vmul.f32 %v4444_v62, %v3950_v34  ;;  %v2086_v22 = vpop.f32.mrb[29].mxu1 }
 0x62d   : > { %v2233_v13 = vmul.f32 %v3950_v34, %v2086_v22 }
 0x62e   : > { %v2244_v58 = vadd.f32 %v2234_v9, %v2218_v46  ;;  %v3951_v46 = vld [vmem:[%s6751_s6 + $0x3] ss:$0 sm:$0xff] }
 0x62f   : > { %v2243_v42 = vadd.f32 %v2233_v13, %v2217_v14  ;;  %v4447_v8 = vpop.f32.mrb[30].mxu1 }
 0x630   : > { %v2236_v4 = vmul.f32 %v4447_v8, %v3950_v34  ;;  %v2096_v50 = vpop.f32.mrb[31].mxu1 }
 0x631   : > { %v2235_v30 = vmul.f32 %v3950_v34, %v2096_v50 }
 0x632   : > { %v2246_v17 = vadd.f32 %v2236_v4, %v2220_v6 }
 0x633   : > { %v2245_v45 = vadd.f32 %v2235_v30, %v2219_v31  ;;  %v4450_v18 = vpop.f32.mrb[32].mxu1 }
 0x634   : > { %v2238_v19 = vmul.f32 %v4450_v18, %v3950_v34  ;;  %v2106_v61 = vpop.f32.mrb[33].mxu1 }
 0x635   : > { %v2237_v40 = vmul.f32 %v3950_v34, %v2106_v61 }
 0x636   : > { %v2248_v23 = vadd.f32 %v2238_v19, %v2222_v21 }
 0x637   : > { %v2247_v12 = vadd.f32 %v2237_v40, %v2221_v37  ;;  %v4453_v27 = vpop.f32.mrb[34].mxu1 }
 0x638   : > { %v2240_v54 = vmul.f32 %v4453_v27, %v3950_v34  ;;  %v2116_v53 = vpop.f32.mrb[35].mxu1 }
 0x639   : > { %v2239_v25 = vmul.f32 %v3950_v34, %v2116_v53 }
 0x63a   : > { %v2250_v29 = vadd.f32 %v2240_v54, %v2224_v26 }
 0x63b   : > { %v2249_v36 = vadd.f32 %v2239_v25, %v2223_v2  ;;  %v4456_v41 = vpop.f32.mrb[36].mxu1 }
 0x63c   : > { %v2242_v48 = vmul.f32 %v4456_v41, %v3950_v34  ;;  %v2126_v1 = vpop.f32.mrb[37].mxu1 }
 0x63d   : > { %v2241_v35 = vmul.f32 %v3950_v34, %v2126_v1 }
 0x63e   : > { %v2252_v14 = vadd.f32 %v2242_v48, %v2226_v38 }
 0x63f   : > { %v2251_v47 = vadd.f32 %v2241_v35, %v2225_v20  ;;  %v4459_v39 = vpop.f32.mrb[38].mxu1 }
 0x640   : > { %v2260_v56 = vmul.f32 %v4459_v39, %v3951_v46  ;;  %v2136_v55 = vpop.f32.mrb[39].mxu1 }
 0x641   : > { %v2259_v60 = vmul.f32 %v3951_v46, %v2136_v55 }
 0x642   : > { %v2270_v33 = vadd.f32 %v2260_v56, %v2244_v58 }
 0x643   : > { %v2269_v6 = vadd.f32 %v2259_v60, %v2243_v42  ;;  %v4462_v31 = vpop.f32.mrb[40].mxu1 }
 0x644   : > { %v2262_v7 = vmul.f32 %v4462_v31, %v3951_v46  ;;  %v2146_v49 = vpop.f32.mrb[41].mxu1 }
 0x645   : > { %v2261_v15 = vmul.f32 %v3951_v46, %v2146_v49  ;;  %4480 = vmatprep.mubr.msk.f32.mxu0 %vm632_vm1, %v2269_v6 }
 0x646   : > { %v2272_v10 = vadd.f32 %v2262_v7, %v2246_v17  ;;  %4481 = vmatmul.mubr.msk.f32.vlgmr.msra.gmra.mrb[44].mxu0 %vm632_vm1, %v2270_v33 }
 0x647   : > { %v2271_v43 = vadd.f32 %v2261_v15, %v2245_v45  ;;  %4705 = vmatpush3.bf16.msra.mxu0 %v5481_v52  ;;  %v4465_v32 = vpop.f32.mrb[42].mxu1 }
 0x648   : > { %v2264_v21 = vmul.f32 %v4465_v32, %v3951_v46  ;;  %v2156_v37 = vpop.f32.mrb[43].mxu1 }
 0x649   : > { %v2263_v57 = vmul.f32 %v3951_v46, %v2156_v37  ;;  %4483 = vmatprep.mubr.msk.f32.mxu0 %vm632_vm1, %v2271_v43 }
 0x64a   : > { %v2274_v0 = vadd.f32 %v2264_v21, %v2248_v23  ;;  %4484 = vmatmul.mubr.msk.f32.gmra.mrb[46].mxu0 %vm632_vm1, %v2272_v10 }
 0x64b   : > { %v2273_v28 = vadd.f32 %v2263_v57, %v2247_v12  ;;  %v4468_v5 = vpop.f32.mrb[44].mxu1 }
 0x64c   : > { %v2266_v11 = vmul.f32 %v4468_v5, %v3951_v46  ;;  %v2166_v44 = vpop.f32.mrb[45].mxu1 }
 0x64d   : > { %v2265_v26 = vmul.f32 %v3951_v46, %v2166_v44  ;;  %4486 = vmatprep.mubr.msk.f32.mxu0 %vm632_vm1, %v2273_v28 }
 0x64e   : > { %v2276_v2 = vadd.f32 %v2266_v11, %v2250_v29  ;;  %4487 = vmatmul.mubr.msk.f32.gmra.mrb[48].mxu0 %vm632_vm1, %v2274_v0 }
 0x64f   : > { %v2275_v52 = vadd.f32 %v2265_v26, %v2249_v36  ;;  %v4471_v3 = vpop.f32.mrb[46].mxu1 }
 0x650   : > { %v2268_v16 = vmul.f32 %v4471_v3, %v3951_v46  ;;  %v2176_v59 = vpop.f32.mrb[47].mxu1 }
 0x651   : > { %v2267_v63 = vmul.f32 %v3951_v46, %v2176_v59  ;;  %4489 = vmatprep.mubr.msk.f32.mxu0 %vm632_vm1, %v2275_v52 }
 0x652   : > { %v2278_v24 = vadd.f32 %v2268_v16, %v2252_v14  ;;  %4490 = vmatmul.mubr.msk.f32.gmra.mrb[50].mxu0 %vm632_vm1, %v2276_v2 }
 0x653   : > { %v2277_v34 = vadd.f32 %v2267_v63, %v2251_v47  ;;  %v4501_v38 = vpop.f32.mrb[48].mxu1 }
 0x654   : > { %v6168_v20 = vadd.f32 %v4501_v38, %v6163_v51  ;;  %v2520_v62 = vpop.f32.mrb[49].mxu1 }
 0x655   : > { %v6171_v9 = vadd.f32 %v6163_v51, %v2520_v62  ;;  %4492 = vmatprep.mubr.msk.f32.mxu0 %vm632_vm1, %v2277_v34 }
 0x656   : > { %4493 = vmatmul.mubr.msk.f32.gmra.mrb[52].mxu0 %vm632_vm1, %v2278_v24  ;;  %v2722_v22 = vsel %vm1359_vm3, %v6168_v20, -inf }
 0x657   : > { %2723 = vmax.xlane.f32.xlu1 %v2722_v22  ;;  %v4504_v13 = vpop.f32.mrb[50].mxu1  ;;  %v2719_v58 = vsel %vm1359_vm3, %v6171_v9, -inf }
 0x658   : > { %v6180_v42 = vadd.f32 %v4504_v13, %v6163_v51  ;;  %v2530_v8 = vpop.f32.mrb[51].mxu1  ;;  %2720 = vmax.xlane.f32.xlu0 %v2719_v58 }
 0x659   : > { %v6183_v4 = vadd.f32 %v6163_v51, %v2530_v8 }
 0x65a   : > { %v2728_v50 = vsel %vm1359_vm3, %v6180_v42, -inf }
 0x65b   : > { %2729 = vmax.xlane.f32.xlu1 %v2728_v50  ;;  %v4507_v30 = vpop.f32.mrb[52].mxu1  ;;  %v2725_v17 = vsel %vm1359_vm3, %v6183_v4, -inf }
 0x65c   : > { %v6190_v45 = vadd.f32 %v4507_v30, %v6163_v51  ;;  %v2540_v18 = vpop.f32.mrb[53].mxu1  ;;  %2726 = vmax.xlane.f32.xlu0 %v2725_v17 }
 0x65d   : > { %v6193_v19 = vadd.f32 %v6163_v51, %v2540_v18 }
 0x65e   : > { %v2734_v61 = vsel %vm1359_vm3, %v6190_v45, -inf }
 0x65f   : > { %2735 = vmax.xlane.f32.xlu1 %v2734_v61  ;;  %v4510_v40 = vpop.f32.mrb[54].mxu1  ;;  %v2731_v23 = vsel %vm1359_vm3, %v6193_v19, -inf }
 0x660   : > { %v6200_v12 = vadd.f32 %v4510_v40, %v6163_v51  ;;  %v2550_v27 = vpop.f32.mrb[55].mxu1  ;;  %2732 = vmax.xlane.f32.xlu0 %v2731_v23 }
 0x661   : > { %v6203_v54 = vadd.f32 %v6163_v51, %v2550_v27 }
 0x662   : > { %v2740_v53 = vsel %vm1359_vm3, %v6200_v12, -inf }
 0x663   : > { %2741 = vmax.xlane.f32.xlu1 %v2740_v53  ;;  %v4513_v25 = vpop.f32.mrb[56].mxu1  ;;  %v2737_v29 = vsel %vm1359_vm3, %v6203_v54, -inf }
 0x664   : > { %v6210_v36 = vadd.f32 %v4513_v25, %v6163_v51  ;;  %v2560_v41 = vpop.f32.mrb[57].mxu1  ;;  %2738 = vmax.xlane.f32.xlu0 %v2737_v29 }
 0x665   : > { %v6213_v48 = vadd.f32 %v6163_v51, %v2560_v41 }
 0x666   : > { %v2746_v1 = vsel %vm1359_vm3, %v6210_v36, -inf }
 0x667   : > { %2747 = vmax.xlane.f32.xlu1 %v2746_v1  ;;  %v4516_v35 = vpop.f32.mrb[58].mxu1  ;;  %v2743_v46 = vsel %vm1359_vm3, %v6213_v48, -inf }
 0x668   : > { %v6220_v14 = vadd.f32 %v4516_v35, %v6163_v51  ;;  %v2570_v47 = vpop.f32.mrb[59].mxu1  ;;  %2744 = vmax.xlane.f32.xlu0 %v2743_v46 }
 0x669   : > { %v6223_v39 = vadd.f32 %v6163_v51, %v2570_v47 }
 0x66a   : > { %v2752_v56 = vsel %vm1359_vm3, %v6220_v14, -inf }
 0x66b   : > { %2753 = vmax.xlane.f32.xlu1 %v2752_v56  ;;  %v4519_v55 = vpop.f32.mrb[60].mxu1  ;;  %v2749_v60 = vsel %vm1359_vm3, %v6223_v39, -inf }
 0x66c   : > { %v6230_v33 = vadd.f32 %v4519_v55, %v6163_v51  ;;  %v2580_v6 = vpop.f32.mrb[61].mxu1  ;;  %2750 = vmax.xlane.f32.xlu0 %v2749_v60 }
 0x66d   : > { %v6233_v31 = vadd.f32 %v6163_v51, %v2580_v6 }
 0x66e   : > { %v2758_v7 = vsel %vm1359_vm3, %v6230_v33, -inf }
 0x66f   : > { %2759 = vmax.xlane.f32.xlu1 %v2758_v7  ;;  %v4522_v49 = vpop.f32.mrb[62].mxu1  ;;  %v2755_v15 = vsel %vm1359_vm3, %v6233_v31, -inf }
 0x670   : > { %v6240_v10 = vadd.f32 %v4522_v49, %v6163_v51  ;;  %v2590_v43 = vpop.f32.mrb[63].mxu1  ;;  %2756 = vmax.xlane.f32.xlu0 %v2755_v15 }
 0x671   : > { %v6243_v32 = vadd.f32 %v6163_v51, %v2590_v43 }
 0x672   : > { %v2764_v21 = vsel %vm1359_vm3, %v6240_v10, -inf }
 0x673   : > { %2765 = vmax.xlane.f32.xlu1 %v2764_v21  ;;  %v4525_v37 = vpop.f32.mrb[64].mxu1  ;;  %v2761_v57 = vsel %vm1359_vm3, %v6243_v32, -inf }
 0x674   : > { %v6250_v0 = vadd.f32 %v4525_v37, %v6163_v51  ;;  %v2600_v28 = vpop.f32.mrb[65].mxu1  ;;  %2762 = vmax.xlane.f32.xlu0 %v2761_v57 }
 0x675   : > { %v6253_v5 = vadd.f32 %v6163_v51, %v2600_v28 }
 0x676   : > { %v2770_v11 = vsel %vm1359_vm3, %v6250_v0, -inf }
 0x677   : > { %2771 = vmax.xlane.f32.xlu1 %v2770_v11  ;;  %v4528_v44 = vpop.f32.mrb[66].mxu1  ;;  %v2767_v26 = vsel %vm1359_vm3, %v6253_v5, -inf }
 0x678   : > { %v6260_v2 = vadd.f32 %v4528_v44, %v6163_v51  ;;  %v2610_v52 = vpop.f32.mrb[67].mxu1  ;;  %2768 = vmax.xlane.f32.xlu0 %v2767_v26 }
 0x679   : > { %v6263_v3 = vadd.f32 %v6163_v51, %v2610_v52 }
 0x67a   : > { %v2776_v16 = vsel %vm1359_vm3, %v6260_v2, -inf }
 0x67b   : > { %2777 = vmax.xlane.f32.xlu1 %v2776_v16  ;;  %v4531_v59 = vpop.f32.mrb[68].mxu1  ;;  %v2773_v63 = vsel %vm1359_vm3, %v6263_v3, -inf }
 0x67c   : > { %v6270_v24 = vadd.f32 %v4531_v59, %v6163_v51  ;;  %v2620_v34 = vpop.f32.mrb[69].mxu1  ;;  %2774 = vmax.xlane.f32.xlu0 %v2773_v63 }
 0x67d   : > { %v6273_v38 = vadd.f32 %v6163_v51, %v2620_v34 }
 0x67e   : > { %v2782_v62 = vsel %vm1359_vm3, %v6270_v24, -inf }
 0x67f   : > { %2783 = vmax.xlane.f32.xlu1 %v2782_v62  ;;  %v4534_v22 = vpop.f32.mrb[70].mxu1  ;;  %v2779_v13 = vsel %vm1359_vm3, %v6273_v38, -inf }
 0x680   : > { %v6280_v58 = vadd.f32 %v4534_v22, %v6163_v51  ;;  %v2630_v8 = vpop.f32.mrb[71].mxu1  ;;  %2780 = vmax.xlane.f32.xlu0 %v2779_v13 }
 0x681   : > { %v6283_v50 = vadd.f32 %v6163_v51, %v2630_v8 }
 0x682   : > { %v2788_v30 = vsel %vm1359_vm3, %v6280_v58, -inf }
 0x683   : > { %2789 = vmax.xlane.f32.xlu1 %v2788_v30  ;;  %v4537_v17 = vpop.f32.mrb[72].mxu1  ;;  %v2785_v18 = vsel %vm1359_vm3, %v6283_v50, -inf }
 0x684   : > { %v6290_v61 = vadd.f32 %v4537_v17, %v6163_v51  ;;  %v2640_v40 = vpop.f32.mrb[73].mxu1  ;;  %2786 = vmax.xlane.f32.xlu0 %v2785_v18 }
 0x685   : > { %v6293_v23 = vadd.f32 %v6163_v51, %v2640_v40 }
 0x686   : > { %v2794_v27 = vsel %vm1359_vm3, %v6290_v61, -inf }
 0x687   : > { %2795 = vmax.xlane.f32.xlu1 %v2794_v27  ;;  %v4540_v53 = vpop.f32.mrb[74].mxu1  ;;  %v2791_v25 = vsel %vm1359_vm3, %v6293_v23, -inf }
 0x688   : > { %v6300_v29 = vadd.f32 %v4540_v53, %v6163_v51  ;;  %v2650_v41 = vpop.f32.mrb[75].mxu1  ;;  %2792 = vmax.xlane.f32.xlu0 %v2791_v25 }
 0x689   : > { %v6303_v1 = vadd.f32 %v6163_v51, %v2650_v41 }
 0x68a   : > { %v2800_v35 = vsel %vm1359_vm3, %v6300_v29, -inf }
 0x68b   : > { %2801 = vmax.xlane.f32.xlu1 %v2800_v35  ;;  %v4543_v46 = vpop.f32.mrb[76].mxu1  ;;  %v2797_v47 = vsel %vm1359_vm3, %v6303_v1, -inf }
 0x68c   : > { %v6310_v56 = vadd.f32 %v4543_v46, %v6163_v51  ;;  %v2660_v55 = vpop.f32.mrb[77].mxu1  ;;  %2798 = vmax.xlane.f32.xlu0 %v2797_v47 }
 0x68d   : > { %v6313_v60 = vadd.f32 %v6163_v51, %v2660_v55 }
 0x68e   : > { %v2806_v6 = vsel %vm1359_vm3, %v6310_v56, -inf }
 0x68f   : > { %2807 = vmax.xlane.f32.xlu1 %v2806_v6  ;;  %v4546_v7 = vpop.f32.mrb[78].mxu1  ;;  %v2803_v49 = vsel %vm1359_vm3, %v6313_v60, -inf }
 0x690   : > { %v6320_v15 = vadd.f32 %v4546_v7, %v6163_v51  ;;  %v2670_v43 = vpop.f32.mrb[79].mxu1  ;;  %2804 = vmax.xlane.f32.xlu0 %v2803_v49 }
 0x691   : > { %v6323_v21 = vadd.f32 %v6163_v51, %v2670_v43 }
 0x692   : > { %v2812_v37 = vsel %vm1359_vm3, %v6320_v15, -inf }
 0x693   : > { %2813 = vmax.xlane.f32.xlu1 %v2812_v37  ;;  %v4549_v57 = vpop.f32.mrb[80].mxu1  ;;  %v2809_v28 = vsel %vm1359_vm3, %v6323_v21, -inf }
 0x694   : > { %v6330_v11 = vadd.f32 %v4549_v57, %v6163_v51  ;;  %v2680_v44 = vpop.f32.mrb[81].mxu1  ;;  %2810 = vmax.xlane.f32.xlu0 %v2809_v28 }
 0x695   : > { %v6333_v26 = vadd.f32 %v6163_v51, %v2680_v44 }
 0x696   : > { %v2818_v52 = vsel %vm1359_vm3, %v6330_v11, -inf }
 0x697   : > { %2819 = vmax.xlane.f32.xlu1 %v2818_v52  ;;  %v4552_v16 = vpop.f32.mrb[82].mxu1  ;;  %v2815_v59 = vsel %vm1359_vm3, %v6333_v26, -inf }
 0x698   : > { %v6340_v63 = vadd.f32 %v4552_v16, %v6163_v51  ;;  %v2690_v34 = vpop.f32.mrb[83].mxu1  ;;  %2816 = vmax.xlane.f32.xlu0 %v2815_v59 }
 0x699   : > { %v6343_v62 = vadd.f32 %v6163_v51, %v2690_v34 }
 0x69a   : > { %v2824_v22 = vsel %vm1359_vm3, %v6340_v63, -inf }
 0x69b   : > { %2825 = vmax.xlane.f32.xlu1 %v2824_v22  ;;  %v4555_v13 = vpop.f32.mrb[84].mxu1  ;;  %v2821_v8 = vsel %vm1359_vm3, %v6343_v62, -inf }
 0x69c   : > { %v6350_v30 = vadd.f32 %v4555_v13, %v6163_v51  ;;  %v2700_v17 = vpop.f32.mrb[85].mxu1  ;;  %2822 = vmax.xlane.f32.xlu0 %v2821_v8 }
 0x69d   : > { %v6353_v18 = vadd.f32 %v6163_v51, %v2700_v17 }
 0x69e   : > { %v2830_v40 = vsel %vm1359_vm3, %v6350_v30, -inf }
 0x69f   : > { %2831 = vmax.xlane.f32.xlu1 %v2830_v40  ;;  %v4558_v27 = vpop.f32.mrb[86].mxu1  ;;  %v2827_v53 = vsel %vm1359_vm3, %v6353_v18, -inf }
 0x6a0   : > { %v6360_v25 = vadd.f32 %v4558_v27, %v6163_v51  ;;  %v2710_v41 = vpop.f32.mrb[87].mxu1  ;;  %2828 = vmax.xlane.f32.xlu0 %v2827_v53 }
 0x6a1   : > { %v6363_v35 = vadd.f32 %v6163_v51, %v2710_v41 }
 0x6a2   : > { %v2836_v46 = vsel %vm1359_vm3, %v6360_v25, -inf }
 0x6a3   : > { %2837 = vmax.xlane.f32.xlu1 %v2836_v46  ;;  %v2833_v47 = vsel %vm1359_vm3, %v6363_v35, -inf }
 0x6a4   : > { %2834 = vmax.xlane.f32.xlu0 %v2833_v47 }
 0x6e4   : > { %v2724_v55 = vpop.xlane.xlu1 %2723 }
 0x6e5   : > { %v2840_v6 = vsub.f32 %v6168_v20, %v2724_v55  ;;  %v2721_v7 = vpop.xlane.xlu0 %2720 }
 0x6e6   : > { %v2839_v49 = vsub.f32 %v6171_v9, %v2721_v7 }
 0x6e7   : > { %v2881_v43 = vmul.f32 1.442695, %v2840_v6 }
 0x6e8   : > { %v2879_v37 = vmul.f32 1.442695, %v2839_v49  ;;  %v2730_v57 = vpop.xlane.xlu1 %2729 }
 0x6e9   : > { %4899 = vpow2.f32 %v2881_v43  ;;  %v2842_v51 = vsub.f32 %v6180_v42, %v2730_v57  ;;  %v2727_v28 = vpop.xlane.xlu0 %2726 }
 0x6ea   : > { %4901 = vpow2.f32 %v2879_v37  ;;  %v2841_v44 = vsub.f32 %v6183_v4, %v2727_v28 }
 0x6eb   : > { %v2885_v52 = vmul.f32 1.442695, %v2842_v51 }
 0x6ec   : > { %v2883_v16 = vmul.f32 1.442695, %v2841_v44  ;;  %v2736_v59 = vpop.xlane.xlu1 %2735 }
 0x6ed   : > { %4903 = vpow2.f32 %v2885_v52  ;;  %v2844_v34 = vsub.f32 %v6190_v45, %v2736_v59  ;;  %v2733_v20 = vpop.xlane.xlu0 %2732 }
 0x6ee   : > { %4905 = vpow2.f32 %v2883_v16  ;;  %v2843_v9 = vsub.f32 %v6193_v19, %v2733_v20 }
 0x6ef   : > { %v2889_v22 = vmul.f32 1.442695, %v2844_v34 }
 0x6f0   : > { %v2887_v13 = vmul.f32 1.442695, %v2843_v9  ;;  %v2742_v8 = vpop.xlane.xlu1 %2741 }
 0x6f1   : > { %4907 = vpow2.f32 %v2889_v22  ;;  %v2846_v42 = vsub.f32 %v6200_v12, %v2742_v8  ;;  %v2739_v17 = vpop.xlane.xlu0 %2738 }
 0x6f2   : > { %4909 = vpow2.f32 %v2887_v13  ;;  %v2845_v4 = vsub.f32 %v6203_v54, %v2739_v17 }
 0x6f3   : > { %v6377_v40 = vpop.eup %4899  ;;  %v2893_v27 = vmul.f32 1.442695, %v2846_v42 }
 0x6f4   : > { %v6379_v53 = vpop.eup %4901  ;;  %v2891_v45 = vmul.f32 1.442695, %v2845_v4  ;;  %v2748_v41 = vpop.xlane.xlu1 %2747  ;;  %v2962_v19 = vsel %vm1359_vm3, %v6377_v40, 0.0 }
 0x6f5   : > { %4911 = vpow2.f32 %v2893_v27  ;;  %v2848_v46 = vsub.f32 %v6210_v36, %v2748_v41  ;;  %2963 = vadd.xlane.f32.xlu1 %v2962_v19  ;;  %v2745_v47 = vpop.xlane.xlu0 %2744  ;;  %v2959_v12 = vsel %vm1359_vm3, %v6379_v53, 0.0 }
 0x6f6   : > { %4913 = vpow2.f32 %v2891_v45  ;;  %v2847_v54 = vsub.f32 %v6213_v48, %v2745_v47  ;;  %2960 = vadd.xlane.f32.xlu0 %v2959_v12 }
 0x6f7   : > { %v6387_v55 = vpop.eup %4903  ;;  %v2897_v6 = vmul.f32 1.442695, %v2848_v46 }
 0x6f8   : > { %v6389_v7 = vpop.eup %4905  ;;  %v2895_v49 = vmul.f32 1.442695, %v2847_v54  ;;  %v2754_v43 = vpop.xlane.xlu1 %2753  ;;  %v2968_v37 = vsel %vm1359_vm3, %v6387_v55, 0.0 }
 0x6f9   : > { %4915 = vpow2.f32 %v2897_v6  ;;  %v2850_v36 = vsub.f32 %v6220_v14, %v2754_v43  ;;  %2969 = vadd.xlane.f32.xlu1 %v2968_v37  ;;  %v2751_v57 = vpop.xlane.xlu0 %2750  ;;  %v2965_v51 = vsel %vm1359_vm3, %v6389_v7, 0.0 }
 0x6fa   : > { %4917 = vpow2.f32 %v2895_v49  ;;  %v2849_v48 = vsub.f32 %v6223_v39, %v2751_v57  ;;  %2966 = vadd.xlane.f32.xlu0 %v2965_v51 }
 0x6fb   : > { %v6397_v28 = vpop.eup %4907  ;;  %v2901_v44 = vmul.f32 1.442695, %v2850_v36 }
 0x6fc   : > { %v6399_v52 = vpop.eup %4909  ;;  %v2899_v16 = vmul.f32 1.442695, %v2849_v48  ;;  %v2760_v59 = vpop.xlane.xlu1 %2759  ;;  %v2974_v34 = vsel %vm1359_vm3, %v6397_v28, 0.0 }
 0x6fd   : > { %4919 = vpow2.f32 %v2901_v44  ;;  %v2852_v14 = vsub.f32 %v6230_v33, %v2760_v59  ;;  %2975 = vadd.xlane.f32.xlu1 %v2974_v34  ;;  %v2757_v20 = vpop.xlane.xlu0 %2756  ;;  %v2971_v9 = vsel %vm1359_vm3, %v6399_v52, 0.0 }
 0x6fe   : > { %4921 = vpow2.f32 %v2899_v16  ;;  %v2851_v39 = vsub.f32 %v6233_v31, %v2757_v20  ;;  %2972 = vadd.xlane.f32.xlu0 %v2971_v9 }
 0x6ff   : > { %v6407_v22 = vpop.eup %4911  ;;  %v2905_v13 = vmul.f32 1.442695, %v2852_v14 }
 0x700   : > { %v6409_v8 = vpop.eup %4913  ;;  %v2903_v42 = vmul.f32 1.442695, %v2851_v39  ;;  %v2766_v17 = vpop.xlane.xlu1 %2765  ;;  %v2980_v4 = vsel %vm1359_vm3, %v6407_v22, 0.0 }
 0x701   : > { %4923 = vpow2.f32 %v2905_v13  ;;  %v2854_v33 = vsub.f32 %v6240_v10, %v2766_v17  ;;  %2981 = vadd.xlane.f32.xlu1 %v2980_v4  ;;  %v2763_v27 = vpop.xlane.xlu0 %2762  ;;  %v2977_v45 = vsel %vm1359_vm3, %v6409_v8, 0.0 }
 0x702   : > { %4925 = vpow2.f32 %v2903_v42  ;;  %v2853_v31 = vsub.f32 %v6243_v32, %v2763_v27  ;;  %2978 = vadd.xlane.f32.xlu0 %v2977_v45 }
 0x703   : > { %v6417_v41 = vpop.eup %4915  ;;  %v2909_v19 = vmul.f32 1.442695, %v2854_v33 }
 0x704   : > { %v6419_v46 = vpop.eup %4917  ;;  %v2907_v47 = vmul.f32 1.442695, %v2853_v31  ;;  %v2772_v12 = vpop.xlane.xlu1 %2771  ;;  %v2986_v54 = vsel %vm1359_vm3, %v6417_v41, 0.0 }
 0x705   : > { %4927 = vpow2.f32 %v2909_v19  ;;  %v2856_v10 = vsub.f32 %v6250_v0, %v2772_v12  ;;  %2987 = vadd.xlane.f32.xlu1 %v2986_v54  ;;  %v2769_v6 = vpop.xlane.xlu0 %2768  ;;  %v2983_v49 = vsel %vm1359_vm3, %v6419_v46, 0.0 }
 0x706   : > { %4929 = vpow2.f32 %v2907_v47  ;;  %v2855_v32 = vsub.f32 %v6253_v5, %v2769_v6  ;;  %2984 = vadd.xlane.f32.xlu0 %v2983_v49 }
 0x707   : > { %v6427_v43 = vpop.eup %4919  ;;  %v2913_v37 = vmul.f32 1.442695, %v2856_v10 }
 0x708   : > { %v6429_v36 = vpop.eup %4921  ;;  %v2911_v57 = vmul.f32 1.442695, %v2855_v32  ;;  %v2778_v51 = vpop.xlane.xlu1 %2777  ;;  %v2992_v48 = vsel %vm1359_vm3, %v6427_v43, 0.0 }
 0x709   : > { %4931 = vpow2.f32 %v2913_v37  ;;  %v2858_v0 = vsub.f32 %v6260_v2, %v2778_v51  ;;  %2993 = vadd.xlane.f32.xlu1 %v2992_v48  ;;  %v2775_v44 = vpop.xlane.xlu0 %2774  ;;  %v2989_v16 = vsel %vm1359_vm3, %v6429_v36, 0.0 }
 0x70a   : > { %4933 = vpow2.f32 %v2911_v57  ;;  %v2857_v5 = vsub.f32 %v6263_v3, %v2775_v44  ;;  %2990 = vadd.xlane.f32.xlu0 %v2989_v16 }
 0x70b   : > { %v6437_v59 = vpop.eup %4923  ;;  %v2917_v34 = vmul.f32 1.442695, %v2858_v0  ;;  %v6473_v0 = vld [vmem:[%s6758_s13] ss:$0 sm:$0xff] }
 0x70c   : > { %v6439_v14 = vpop.eup %4925  ;;  %v2915_v20 = vmul.f32 1.442695, %v2857_v5  ;;  %v2784_v9 = vpop.xlane.xlu1 %2783  ;;  %v2998_v39 = vsel %vm1359_vm3, %v6437_v59, 0.0 }
 0x70d   : > { %4935 = vpow2.f32 %v2917_v34  ;;  %v2860_v2 = vsub.f32 %v6270_v24, %v2784_v9  ;;  %2999 = vadd.xlane.f32.xlu1 %v2998_v39  ;;  %v2781_v13 = vpop.xlane.xlu0 %2780  ;;  %v2995_v42 = vsel %vm1359_vm3, %v6439_v14, 0.0 }
 0x70e   : > { %4937 = vpow2.f32 %v2915_v20  ;;  %v2859_v3 = vsub.f32 %v6273_v38, %v2781_v13  ;;  %2996 = vadd.xlane.f32.xlu0 %v2995_v42 }
 0x70f   : > { %v6447_v17 = vpop.eup %4927  ;;  %v2921_v4 = vmul.f32 1.442695, %v2860_v2 }
 0x710   : > { %v6449_v33 = vpop.eup %4929  ;;  %v2919_v27 = vmul.f32 1.442695, %v2859_v3  ;;  %v2790_v45 = vpop.xlane.xlu1 %2789  ;;  %v3004_v24 = vsel %vm1359_vm3, %v6447_v17, 0.0 }
 0x711   : > { %4939 = vpow2.f32 %v2921_v4  ;;  %v2862_v31 = vsub.f32 %v6280_v58, %v2790_v45  ;;  %3005 = vadd.xlane.f32.xlu1 %v3004_v24  ;;  %v2787_v19 = vpop.xlane.xlu0 %2786  ;;  %v3001_v38 = vsel %vm1359_vm3, %v6449_v33, 0.0 }
 0x712   : > { %4941 = vpow2.f32 %v2919_v27  ;;  %v2861_v47 = vsub.f32 %v6283_v50, %v2787_v19  ;;  %3002 = vadd.xlane.f32.xlu0 %v3001_v38 }
 0x713   : > { %v6457_v12 = vpop.eup %4931  ;;  %v2925_v54 = vmul.f32 1.442695, %v2862_v31 }
 0x714   : > { %v6459_v10 = vpop.eup %4933  ;;  %v2923_v6 = vmul.f32 1.442695, %v2861_v47  ;;  %v2796_v49 = vpop.xlane.xlu1 %2795  ;;  %v3010_v32 = vsel %vm1359_vm3, %v6457_v12, 0.0 }
 0x715   : > { %4943 = vpow2.f32 %v2925_v54  ;;  %v2864_v58 = vsub.f32 %v6290_v61, %v2796_v49  ;;  %3011 = vadd.xlane.f32.xlu1 %v3010_v32  ;;  %v2793_v37 = vpop.xlane.xlu0 %2792  ;;  %v3007_v50 = vsel %vm1359_vm3, %v6459_v10, 0.0 }
 0x716   : > { %4945 = vpow2.f32 %v2923_v6  ;;  %v2863_v57 = vsub.f32 %v6293_v23, %v2793_v37  ;;  %3008 = vadd.xlane.f32.xlu0 %v3007_v50 }
 0x717   : > { %v6468_v51 = vpop.eup %4935  ;;  %v2929_v48 = vmul.f32 1.442695, %v2864_v58 }
 0x718   : > { %v6475_v44 = vpop.eup %4937  ;;  %v2927_v61 = vmul.f32 1.442695, %v2863_v57  ;;  %v2802_v16 = vpop.xlane.xlu1 %2801  ;;  %v3016_v5 = vsel %vm1359_vm3, %v6468_v51, 0.0 }
 0x719   : > { %4947 = vpow2.f32 %v2929_v48  ;;  %v2866_v23 = vsub.f32 %v6300_v29, %v2802_v16  ;;  %v4482_v34 = vpop.f32.mrb[44].mxu0  ;;  %3017 = vadd.xlane.f32.xlu1 %v3016_v5  ;;  %v2799_v20 = vpop.xlane.xlu0 %2798  ;;  %v3013_v9 = vsel %vm1359_vm3, %v6475_v44, 0.0 }
 0x71a   : > { %4949 = vpow2.f32 %v2927_v61  ;;  %v2387_v39 = vadd.f32 %v4482_v34, %v6473_v0  ;;  %v2865_v2 = vsub.f32 %v6303_v1, %v2799_v20  ;;  %v2381_v13 = vpop.f32.mrb[45].mxu0  ;;  %3014 = vadd.xlane.f32.xlu0 %v3013_v9 }
 0x71b   : > { %v6489_v42 = vpop.eup %4939  ;;  %v2933_v3 = vmul.f32 1.442695, %v2866_v23  ;;  %v2382_v4 = vadd.f32 %v6473_v0, %v2381_v13 }
 0x71c   : > { %v6492_v29 = vpop.eup %4941  ;;  %2431 = vst.msk [vmem:[%s6482_s27 + $0x8] sm:$0xff] %vm632_vm1, %v2387_v39  ;;  %v2931_v27 = vmul.f32 1.442695, %v2865_v2  ;;  %v2808_v45 = vpop.xlane.xlu1 %2807  ;;  %v3022_v24 = vsel %vm1359_vm3, %v6489_v42, 0.0 }
 0x71d   : > { %4951 = vpow2.f32 %v2933_v3  ;;  %2430 = vst.msk [vmem:[%s6482_s27] sm:$0xff] %vm632_vm1, %v2382_v4  ;;  %v2868_v1 = vsub.f32 %v6310_v56, %v2808_v45  ;;  %v4485_v31 = vpop.f32.mrb[46].mxu0  ;;  %3023 = vadd.xlane.f32.xlu1 %v3022_v24  ;;  %v2805_v19 = vpop.xlane.xlu0 %2804  ;;  %v3019_v38 = vsel %vm1359_vm3, %v6492_v29, 0.0 }
 0x71e   : > { %4953 = vpow2.f32 %v2931_v27  ;;  %v2397_v47 = vadd.f32 %v4485_v31, %v6473_v0  ;;  %v2867_v54 = vsub.f32 %v6313_v60, %v2805_v19  ;;  %v2391_v6 = vpop.f32.mrb[47].mxu0  ;;  %3020 = vadd.xlane.f32.xlu0 %v3019_v38 }
 0x71f   : > { %v6505_v49 = vpop.eup %4943  ;;  %v2937_v32 = vmul.f32 1.442695, %v2868_v1  ;;  %v2392_v58 = vadd.f32 %v6473_v0, %v2391_v6 }
 0x720   : > { %v6508_v56 = vpop.eup %4945  ;;  %2433 = vst.msk [vmem:[%s6482_s27 + $0x18] sm:$0xff] %vm632_vm1, %v2397_v47  ;;  %v2935_v37 = vmul.f32 1.442695, %v2867_v54  ;;  %v2814_v50 = vpop.xlane.xlu1 %2813  ;;  %v3028_v57 = vsel %vm1359_vm3, %v6505_v49, 0.0 }
 0x721   : > { %4955 = vpow2.f32 %v2937_v32  ;;  %2432 = vst.msk [vmem:[%s6482_s27 + $0x10] sm:$0xff] %vm632_vm1, %v2392_v58  ;;  %v2870_v60 = vsub.f32 %v6320_v15, %v2814_v50  ;;  %v4488_v48 = vpop.f32.mrb[48].mxu0  ;;  %3029 = vadd.xlane.f32.xlu1 %v3028_v57  ;;  %v2811_v61 = vpop.xlane.xlu0 %2810  ;;  %v3025_v16 = vsel %vm1359_vm3, %v6508_v56, 0.0 }
 0x722   : > { %4957 = vpow2.f32 %v2935_v37  ;;  %v2407_v5 = vadd.f32 %v4488_v48, %v6473_v0  ;;  %v2869_v23 = vsub.f32 %v6323_v21, %v2811_v61  ;;  %v2401_v34 = vpop.f32.mrb[49].mxu0  ;;  %3026 = vadd.xlane.f32.xlu0 %v3025_v16 }
 0x723   : > { %v6521_v20 = vpop.eup %4947  ;;  %v2941_v9 = vmul.f32 1.442695, %v2870_v60  ;;  %v2402_v39 = vadd.f32 %v6473_v0, %v2401_v34 }
 0x724   : > { %v6524_v15 = vpop.eup %4949  ;;  %2435 = vst.msk [vmem:[%s6482_s27 + $0x28] sm:$0xff] %vm632_vm1, %v2407_v5  ;;  %v2939_v2 = vmul.f32 1.442695, %v2869_v23  ;;  %v2820_v13 = vpop.xlane.xlu1 %2819  ;;  %v3034_v3 = vsel %vm1359_vm3, %v6521_v20, 0.0 }
 0x725   : > { %4959 = vpow2.f32 %v2941_v9  ;;  %2434 = vst.msk [vmem:[%s6482_s27 + $0x20] sm:$0xff] %vm632_vm1, %v2402_v39  ;;  %v2872_v21 = vsub.f32 %v6330_v11, %v2820_v13  ;;  %v4491_v4 = vpop.f32.mrb[50].mxu0  ;;  %3035 = vadd.xlane.f32.xlu1 %v3034_v3  ;;  %v2817_v27 = vpop.xlane.xlu0 %2816  ;;  %v3031_v45 = vsel %vm1359_vm3, %v6524_v15, 0.0 }
 0x726   : > { %4961 = vpow2.f32 %v2939_v2  ;;  %v2417_v24 = vadd.f32 %v4491_v4, %v6473_v0  ;;  %v2871_v1 = vsub.f32 %v6333_v26, %v2817_v27  ;;  %v2411_v31 = vpop.f32.mrb[51].mxu0  ;;  %3032 = vadd.xlane.f32.xlu0 %v3031_v45 }
 0x727   : > { %v6537_v19 = vpop.eup %4951  ;;  %v2945_v38 = vmul.f32 1.442695, %v2872_v21  ;;  %v2412_v47 = vadd.f32 %v6473_v0, %v2411_v31 }
 0x728   : > { %v6540_v11 = vpop.eup %4953  ;;  %2437 = vst.msk [vmem:[%s6482_s27 + $0x38] sm:$0xff] %vm632_vm1, %v2417_v24  ;;  %v2943_v54 = vmul.f32 1.442695, %v2871_v1  ;;  %v2826_v6 = vpop.xlane.xlu1 %2825  ;;  %v3040_v32 = vsel %vm1359_vm3, %v6537_v19, 0.0 }
 0x729   : > { %4963 = vpow2.f32 %v2945_v38  ;;  %2436 = vst.msk [vmem:[%s6482_s27 + $0x30] sm:$0xff] %vm632_vm1, %v2412_v47  ;;  %v2874_v26 = vsub.f32 %v6340_v63, %v2826_v6  ;;  %3041 = vadd.xlane.f32.xlu1 %v3040_v32  ;;  %v2823_v58 = vpop.xlane.xlu0 %2822  ;;  %v4494_v37 = vpop.f32.mrb[52].mxu0  ;;  %v3037_v50 = vsel %vm1359_vm3, %v6540_v11, 0.0 }
 0x72a   : > { %4965 = vpow2.f32 %v2943_v54  ;;  %v2873_v57 = vsub.f32 %v6343_v62, %v2823_v58  ;;  %v2427_v60 = vadd.f32 %v4494_v37, %v6473_v0  ;;  %3038 = vadd.xlane.f32.xlu0 %v3037_v50  ;;  %v2421_v48 = vpop.f32.mrb[53].mxu0 }
 0x72b   : > { %v6553_v61 = vpop.eup %4955  ;;  %v2949_v16 = vmul.f32 1.442695, %v2874_v26  ;;  %v2422_v5 = vadd.f32 %v6473_v0, %v2421_v48 }
 0x72c   : > { %v6556_v63 = vpop.eup %4957  ;;  %v2947_v23 = vmul.f32 1.442695, %v2873_v57  ;;  %2439 = vst.msk [vmem:[%s6482_s27 + $0x48] sm:$0xff] %vm632_vm1, %v2427_v60  ;;  %v2832_v34 = vpop.xlane.xlu1 %2831  ;;  %v3046_v9 = vsel %vm1359_vm3, %v6553_v61, 0.0 }
 0x72d   : > { %4967 = vpow2.f32 %v2949_v16  ;;  %2438 = vst.msk [vmem:[%s6482_s27 + $0x40] sm:$0xff] %vm632_vm1, %v2422_v5  ;;  %v2876_v62 = vsub.f32 %v6350_v30, %v2832_v34  ;;  %3047 = vadd.xlane.f32.xlu1 %v3046_v9  ;;  %v2829_v39 = vpop.xlane.xlu0 %2828  ;;  %v3043_v2 = vsel %vm1359_vm3, %v6556_v63, 0.0 }
 0x72e   : > { %4969 = vpow2.f32 %v2947_v23  ;;  %v2875_v13 = vsub.f32 %v6353_v18, %v2829_v39  ;;  %3044 = vadd.xlane.f32.xlu0 %v3043_v2 }
 0x72f   : > { %v6568_v3 = vpop.eup %4959  ;;  %v2953_v21 = vmul.f32 1.442695, %v2876_v62 }
 0x730   : > { %v6570_v4 = vpop.eup %4961  ;;  %v2951_v27 = vmul.f32 1.442695, %v2875_v13  ;;  %v2838_v45 = vpop.xlane.xlu1 %2837  ;;  %v3052_v24 = vsel %vm1359_vm3, %v6568_v3, 0.0 }
 0x731   : > { %4971 = vpow2.f32 %v2953_v21  ;;  %v2878_v30 = vsub.f32 %v6360_v25, %v2838_v45  ;;  %3053 = vadd.xlane.f32.xlu1 %v3052_v24  ;;  %v2835_v1 = vpop.xlane.xlu0 %2834  ;;  %v3049_v31 = vsel %vm1359_vm3, %v6570_v4, 0.0 }
 0x732   : > { %4973 = vpow2.f32 %v2951_v27  ;;  %v2877_v18 = vsub.f32 %v6363_v35, %v2835_v1  ;;  %3050 = vadd.xlane.f32.xlu0 %v3049_v31 }
 0x733   : > { %v6578_v38 = vpop.eup %4963  ;;  %v2957_v47 = vmul.f32 1.442695, %v2878_v30 }
 0x734   : > { %v6580_v54 = vpop.eup %4965  ;;  %v2955_v6 = vmul.f32 1.442695, %v2877_v18  ;;  %v3058_v32 = vsel %vm1359_vm3, %v6578_v38, 0.0 }
 0x735   : > { %4975 = vpow2.f32 %v2957_v47  ;;  %3059 = vadd.xlane.f32.xlu1 %v3058_v32  ;;  %v3055_v25 = vsel %vm1359_vm3, %v6580_v54, 0.0 }
 0x736   : > { %4977 = vpow2.f32 %v2955_v6  ;;  %3056 = vadd.xlane.f32.xlu0 %v3055_v25 }
 0x737   : > { %v6586_v26 = vpop.eup %4967 }
 0x738   : > { %v6588_v35 = vpop.eup %4969  ;;  %v3064_v58 = vsel %vm1359_vm3, %v6586_v26, 0.0 }
 0x739   : > { %3065 = vadd.xlane.f32.xlu1 %v3064_v58  ;;  %v3061_v37 = vsel %vm1359_vm3, %v6588_v35, 0.0 }
 0x73a   : > { %3062 = vadd.xlane.f32.xlu0 %v3061_v37 }
 0x73b   : > { %v6594_v50 = vpop.eup %4971 }
 0x73c   : > { %v6596_v57 = vpop.eup %4973  ;;  %v3070_v60 = vsel %vm1359_vm3, %v6594_v50, 0.0 }
 0x73d   : > { %3071 = vadd.xlane.f32.xlu1 %v3070_v60  ;;  %v3067_v48 = vsel %vm1359_vm3, %v6596_v57, 0.0 }
 0x73e   : > { %3068 = vadd.xlane.f32.xlu0 %v3067_v48 }
 0x73f   : > { %v6602_v16 = vpop.eup %4975 }
 0x740   : > { %v6604_v5 = vpop.eup %4977  ;;  %v3076_v23 = vsel %vm1359_vm3, %v6602_v16, 0.0 }
 0x741   : > { %3077 = vadd.xlane.f32.xlu1 %v3076_v23  ;;  %v3073_v34 = vsel %vm1359_vm3, %v6604_v5, 0.0 }
 0x742   : > { %3074 = vadd.xlane.f32.xlu0 %v3073_v34 }
 0x782   : > { %v2964_v9 = vpop.xlane.xlu1 %2963 }
 0x783   : > { %4979 = vrcp.f32 %v2964_v9  ;;  %v2961_v62 = vpop.xlane.xlu0 %2960 }
 0x784   : > { %4981 = vrcp.f32 %v2961_v62 }
 0x786   : > { %v2970_v39 = vpop.xlane.xlu1 %2969 }
 0x787   : > { %4983 = vrcp.f32 %v2970_v39  ;;  %v2967_v2 = vpop.xlane.xlu0 %2966 }
 0x788   : > { %4985 = vrcp.f32 %v2967_v2 }
 0x78a   : > { %v2976_v13 = vpop.xlane.xlu1 %2975 }
 0x78b   : > { %4987 = vrcp.f32 %v2976_v13  ;;  %v2973_v21 = vpop.xlane.xlu0 %2972 }
 0x78c   : > { %4989 = vrcp.f32 %v2973_v21 }
 0x78d   : > { %v4980_v27 = vpop.eup %4979 }
 0x78e   : > { %v4982_v45 = vpop.eup %4981  ;;  %v2982_v24 = vpop.xlane.xlu1 %2981  ;;  %v3120_v31 = vmul.f32 %v4980_v27, %v6377_v40 }
 0x78f   : > { %4991 = vrcp.f32 %v2982_v24  ;;  %v2979_v30 = vpop.xlane.xlu0 %2978  ;;  %v3119_v1 = vmul.f32 %v4982_v45, %v6379_v53 }
 0x790   : > { %4993 = vrcp.f32 %v2979_v30 }
 0x791   : > { %v4984_v18 = vpop.eup %4983  ;;  %4563 = vmatprep.mubr.msk.f32.mxu0 %vm1359_vm3, %v3119_v1 }
 0x792   : > { %v4986_v47 = vpop.eup %4985  ;;  %v2988_v6 = vpop.xlane.xlu1 %2987  ;;  %4564 = vmatmul.mubr.msk.f32.vlgmr.msra.gmra.mrb[54].mxu0 %vm1359_vm3, %v3120_v31  ;;  %v3122_v58 = vmul.f32 %v4984_v18, %v6387_v55 }
 0x793   : > { %4995 = vrcp.f32 %v2988_v6  ;;  %v2985_v32 = vpop.xlane.xlu0 %2984  ;;  %v3121_v25 = vmul.f32 %v4986_v47, %v6389_v7 }
 0x794   : > { %4997 = vrcp.f32 %v2985_v32 }
 0x795   : > { %v4988_v37 = vpop.eup %4987  ;;  %4566 = vmatprep.mubr.msk.f32.mxu0 %vm1359_vm3, %v3121_v25 }
 0x796   : > { %v4990_v53 = vpop.eup %4989  ;;  %v2994_v40 = vpop.xlane.xlu1 %2993  ;;  %4567 = vmatmul.mubr.msk.f32.gmra.mrb[56].mxu0 %vm1359_vm3, %v3122_v58  ;;  %v3124_v23 = vmul.f32 %v4988_v37, %v6397_v28 }
 0x797   : > { %4999 = vrcp.f32 %v2994_v40  ;;  %v2991_v60 = vpop.xlane.xlu0 %2990  ;;  %v3123_v48 = vmul.f32 %v4990_v53, %v6399_v52 }
 0x798   : > { %5001 = vrcp.f32 %v2991_v60 }
 0x799   : > { %v4992_v34 = vpop.eup %4991  ;;  %4569 = vmatprep.mubr.msk.f32.mxu0 %vm1359_vm3, %v3123_v48 }
 0x79a   : > { %v4994_v7 = vpop.eup %4993  ;;  %v3000_v9 = vpop.xlane.xlu1 %2999  ;;  %4570 = vmatmul.mubr.msk.f32.gmra.mrb[58].mxu0 %vm1359_vm3, %v3124_v23  ;;  %v3126_v39 = vmul.f32 %v4992_v34, %v6407_v22 }
 0x79b   : > { %5003 = vrcp.f32 %v3000_v9  ;;  %v2997_v55 = vpop.xlane.xlu0 %2996  ;;  %v3125_v62 = vmul.f32 %v4994_v7, %v6409_v8 }
 0x79c   : > { %5005 = vrcp.f32 %v2997_v55 }
 0x79d   : > { %v4996_v2 = vpop.eup %4995  ;;  %4572 = vmatprep.mubr.msk.f32.mxu0 %vm1359_vm3, %v3125_v62 }
 0x79e   : > { %v4998_v52 = vpop.eup %4997  ;;  %v3006_v13 = vpop.xlane.xlu1 %3005  ;;  %4573 = vmatmul.mubr.msk.f32.gmra.mrb[60].mxu0 %vm1359_vm3, %v3126_v39  ;;  %v3128_v27 = vmul.f32 %v4996_v2, %v6417_v41 }
 0x79f   : > { %5007 = vrcp.f32 %v3006_v13  ;;  %v3003_v28 = vpop.xlane.xlu0 %3002  ;;  %v3127_v21 = vmul.f32 %v4998_v52, %v6419_v46 }
 0x7a0   : > { %5009 = vrcp.f32 %v3003_v28 }
 0x7a1   : > { %v5000_v45 = vpop.eup %4999  ;;  %4575 = vmatprep.mubr.msk.f32.mxu0 %vm1359_vm3, %v3127_v21 }
 0x7a2   : > { %v5002_v8 = vpop.eup %5001  ;;  %v3012_v24 = vpop.xlane.xlu1 %3011  ;;  %4576 = vmatmul.mubr.msk.f32.gmra.mrb[62].mxu0 %vm1359_vm3, %v3128_v27  ;;  %v3130_v1 = vmul.f32 %v5000_v45, %v6427_v43 }
 0x7a3   : > { %5011 = vrcp.f32 %v3012_v24  ;;  %v3009_v22 = vpop.xlane.xlu0 %3008  ;;  %v3129_v30 = vmul.f32 %v5002_v8, %v6429_v36 }
 0x7a4   : > { %5013 = vrcp.f32 %v3009_v22 }
 0x7a5   : > { %v5004_v31 = vpop.eup %5003  ;;  %4578 = vmatprep.mubr.msk.f32.mxu0 %vm1359_vm3, %v3129_v30 }
 0x7a6   : > { %v5006_v46 = vpop.eup %5005  ;;  %v3018_v18 = vpop.xlane.xlu1 %3017  ;;  %4579 = vmatmul.mubr.msk.f32.gmra.mrb[64].mxu0 %vm1359_vm3, %v3130_v1  ;;  %v3132_v6 = vmul.f32 %v5004_v31, %v6437_v59 }
 0x7a7   : > { %5015 = vrcp.f32 %v3018_v18  ;;  %v3015_v41 = vpop.xlane.xlu0 %3014  ;;  %v3131_v47 = vmul.f32 %v5006_v46, %v6439_v14 }
 0x7a8   : > { %5017 = vrcp.f32 %v3015_v41 }
 0x7a9   : > { %v5008_v32 = vpop.eup %5007  ;;  %4581 = vmatprep.mubr.msk.f32.mxu0 %vm1359_vm3, %v3131_v47 }
 0x7aa   : > { %v5010_v36 = vpop.eup %5009  ;;  %v3024_v25 = vpop.xlane.xlu1 %3023  ;;  %4582 = vmatmul.mubr.msk.f32.gmra.mrb[66].mxu0 %vm1359_vm3, %v3132_v6  ;;  %v3134_v37 = vmul.f32 %v5008_v32, %v6447_v17 }
 0x7ab   : > { %5019 = vrcp.f32 %v3024_v25  ;;  %v3021_v43 = vpop.xlane.xlu0 %3020  ;;  %v3133_v58 = vmul.f32 %v5010_v36, %v6449_v33 }
 0x7ac   : > { %5021 = vrcp.f32 %v3021_v43 }
 0x7ad   : > { %v5012_v53 = vpop.eup %5011  ;;  %4584 = vmatprep.mubr.msk.f32.mxu0 %vm1359_vm3, %v3133_v58 }
 0x7ae   : > { %v5014_v14 = vpop.eup %5013  ;;  %v3030_v40 = vpop.xlane.xlu1 %3029  ;;  %4585 = vmatmul.mubr.msk.f32.gmra.mrb[68].mxu0 %vm1359_vm3, %v3134_v37  ;;  %v3136_v48 = vmul.f32 %v5012_v53, %v6457_v12 }
 0x7af   : > { %5023 = vrcp.f32 %v3030_v40  ;;  %v3027_v59 = vpop.xlane.xlu0 %3026  ;;  %v3135_v60 = vmul.f32 %v5014_v14, %v6459_v10 }
 0x7b0   : > { %5025 = vrcp.f32 %v3027_v59 }
 0x7b1   : > { %v5016_v23 = vpop.eup %5015  ;;  %4587 = vmatprep.mubr.msk.f32.mxu0 %vm1359_vm3, %v3135_v60 }
 0x7b2   : > { %v5018_v33 = vpop.eup %5017  ;;  %v3036_v34 = vpop.xlane.xlu1 %3035  ;;  %4588 = vmatmul.mubr.msk.f32.gmra.mrb[70].mxu0 %vm1359_vm3, %v3136_v48  ;;  %v3138_v9 = vmul.f32 %v5016_v23, %v6468_v51 }
 0x7b3   : > { %5027 = vrcp.f32 %v3036_v34  ;;  %v3033_v17 = vpop.xlane.xlu0 %3032  ;;  %v3137_v7 = vmul.f32 %v5018_v33, %v6475_v44 }
 0x7b4   : > { %5029 = vrcp.f32 %v3033_v17 }
 0x7b5   : > { %v5020_v55 = vpop.eup %5019  ;;  %4590 = vmatprep.mubr.msk.f32.mxu0 %vm1359_vm3, %v3137_v7 }
 0x7b6   : > { %v5022_v10 = vpop.eup %5021  ;;  %v3042_v62 = vpop.xlane.xlu1 %3041  ;;  %4591 = vmatmul.mubr.msk.f32.gmra.mrb[72].mxu0 %vm1359_vm3, %v3138_v9  ;;  %v3140_v2 = vmul.f32 %v5020_v55, %v6489_v42 }
 0x7b7   : > { %5031 = vrcp.f32 %v3042_v62  ;;  %v3039_v12 = vpop.xlane.xlu0 %3038  ;;  %v3139_v39 = vmul.f32 %v5022_v10, %v6492_v29 }
 0x7b8   : > { %5033 = vrcp.f32 %v3039_v12 }
 0x7b9   : > { %v5024_v52 = vpop.eup %5023  ;;  %4593 = vmatprep.mubr.msk.f32.mxu0 %vm1359_vm3, %v3139_v39  ;;  %v5100_v39 = vld [vmem:[%s6751_s6 + $0x1] ss:$0 sm:$0xff] }
 0x7ba   : > { %v5026_v44 = vpop.eup %5025  ;;  %v3048_v13 = vpop.xlane.xlu1 %3047  ;;  %4594 = vmatmul.mubr.msk.f32.gmra.mrb[74].mxu0 %vm1359_vm3, %v3140_v2  ;;  %v3142_v21 = vmul.f32 %v5024_v52, %v6505_v49 }
 0x7bb   : > { %5035 = vrcp.f32 %v3048_v13  ;;  %v3045_v51 = vpop.xlane.xlu0 %3044  ;;  %v3141_v28 = vmul.f32 %v5026_v44, %v6508_v56 }
 0x7bc   : > { %5037 = vrcp.f32 %v3045_v51 }
 0x7bd   : > { %v5028_v27 = vpop.eup %5027  ;;  %4596 = vmatprep.mubr.msk.f32.mxu0 %vm1359_vm3, %v3141_v28 }
 0x7be   : > { %v5030_v29 = vpop.eup %5029  ;;  %v3054_v45 = vpop.xlane.xlu1 %3053  ;;  %4597 = vmatmul.mubr.msk.f32.gmra.mrb[76].mxu0 %vm1359_vm3, %v3142_v21  ;;  %v3144_v24 = vmul.f32 %v5028_v27, %v6521_v20 }
 0x7bf   : > { %5039 = vrcp.f32 %v3054_v45  ;;  %v3051_v42 = vpop.xlane.xlu0 %3050  ;;  %v3143_v8 = vmul.f32 %v5030_v29, %v6524_v15 }
 0x7c0   : > { %5041 = vrcp.f32 %v3051_v42 }
 0x7c1   : > { %v5032_v22 = vpop.eup %5031  ;;  %4599 = vmatprep.mubr.msk.f32.mxu0 %vm1359_vm3, %v3143_v8 }
 0x7c2   : > { %v5034_v56 = vpop.eup %5033  ;;  %v3060_v30 = vpop.xlane.xlu1 %3059  ;;  %4600 = vmatmul.mubr.msk.f32.gmra.mrb[78].mxu0 %vm1359_vm3, %v3144_v24  ;;  %v3146_v31 = vmul.f32 %v5032_v22, %v6537_v19 }
 0x7c3   : > { %5043 = vrcp.f32 %v3060_v30  ;;  %v3057_v49 = vpop.xlane.xlu0 %3056  ;;  %v3145_v1 = vmul.f32 %v5034_v56, %v6540_v11 }
 0x7c4   : > { %5045 = vrcp.f32 %v3057_v49 }
 0x7c5   : > { %v5036_v46 = vpop.eup %5035  ;;  %4602 = vmatprep.mubr.msk.f32.mxu0 %vm1359_vm3, %v3145_v1 }
 0x7c6   : > { %v5038_v15 = vpop.eup %5037  ;;  %v3066_v18 = vpop.xlane.xlu1 %3065  ;;  %4603 = vmatmul.mubr.msk.f32.gmra.mrb[80].mxu0 %vm1359_vm3, %v3146_v31  ;;  %v3148_v47 = vmul.f32 %v5036_v46, %v6553_v61 }
 0x7c7   : > { %5047 = vrcp.f32 %v3066_v18  ;;  %v3063_v20 = vpop.xlane.xlu0 %3062  ;;  %v3147_v41 = vmul.f32 %v5038_v15, %v6556_v63 }
 0x7c8   : > { %5049 = vrcp.f32 %v3063_v20 }
 0x7c9   : > { %v5040_v6 = vpop.eup %5039  ;;  %4605 = vmatprep.mubr.msk.f32.mxu0 %vm1359_vm3, %v3147_v41 }
 0x7ca   : > { %v5042_v11 = vpop.eup %5041  ;;  %v3072_v32 = vpop.xlane.xlu1 %3071  ;;  %4606 = vmatmul.mubr.msk.f32.gmra.mrb[82].mxu0 %vm1359_vm3, %v3148_v47  ;;  %v3150_v25 = vmul.f32 %v5040_v6, %v6568_v3 }
 0x7cb   : > { %5051 = vrcp.f32 %v3072_v32  ;;  %v3069_v19 = vpop.xlane.xlu0 %3068  ;;  %v3149_v36 = vmul.f32 %v5042_v11, %v6570_v4 }
 0x7cc   : > { %5053 = vrcp.f32 %v3069_v19 }
 0x7cd   : > { %v5044_v43 = vpop.eup %5043  ;;  %4608 = vmatprep.mubr.msk.f32.mxu0 %vm1359_vm3, %v3149_v36 }
 0x7ce   : > { %v5046_v63 = vpop.eup %5045  ;;  %v3078_v58 = vpop.xlane.xlu1 %3077  ;;  %4609 = vmatmul.mubr.msk.f32.gmra.mrb[84].mxu0 %vm1359_vm3, %v3150_v25  ;;  %v3152_v53 = vmul.f32 %v5044_v43, %v6578_v38 }
 0x7cf   : > { %5055 = vrcp.f32 %v3078_v58  ;;  %v3075_v61 = vpop.xlane.xlu0 %3074  ;;  %v3151_v37 = vmul.f32 %v5046_v63, %v6580_v54 }
 0x7d0   : > { %5057 = vrcp.f32 %v3075_v61 }
 0x7d1   : > { %v5048_v14 = vpop.eup %5047  ;;  %4611 = vmatprep.mubr.msk.f32.mxu0 %vm1359_vm3, %v3151_v37 }
 0x7d2   : > { %v5050_v4 = vpop.eup %5049  ;;  %4612 = vmatmul.mubr.msk.f32.gmra.mrb[86].mxu0 %vm1359_vm3, %v3152_v53  ;;  %v3154_v40 = vmul.f32 %v5048_v14, %v6586_v26 }
 0x7d3   : > { %v3153_v3 = vmul.f32 %v5050_v4, %v6588_v35 }
 0x7d5   : > { %v5052_v59 = vpop.eup %5051  ;;  %4614 = vmatprep.mubr.msk.f32.mxu0 %vm1359_vm3, %v3153_v3  ;;  %v5101_v3 = vld [vmem:[%s6751_s6 + $0x2] ss:$0 sm:$0xff] }
 0x7d6   : > { %v5054_v60 = vpop.eup %5053  ;;  %4615 = vmatmul.mubr.msk.f32.gmra.mrb[88].mxu0 %vm1359_vm3, %v3154_v40  ;;  %v3156_v38 = vmul.f32 %v5052_v59, %v6594_v50 }
 0x7d7   : > { %v3155_v54 = vmul.f32 %v5054_v60, %v6596_v57 }
 0x7d9   : > { %v5056_v48 = vpop.eup %5055  ;;  %4617 = vmatprep.mubr.msk.f32.mxu0 %vm1359_vm3, %v3155_v54 }
 0x7da   : > { %v5058_v23 = vpop.eup %5057  ;;  %4618 = vmatmul.mubr.msk.f32.gmra.mrb[90].mxu0 %vm1359_vm3, %v3156_v38  ;;  %v3158_v26 = vmul.f32 %v5056_v48, %v6602_v16 }
 0x7db   : > { %v3157_v35 = vmul.f32 %v5058_v23, %v6604_v5  ;;  %v5099_v5 = vld [vmem:[%s6751_s6] ss:$0 sm:$0xff] }
 0x7dd   : > { %4620 = vmatprep.mubr.msk.f32.mxu0 %vm1359_vm3, %v3157_v35 }
 0x7de   : > { %4621 = vmatmul.mubr.msk.f32.gmra.mrb[92].mxu0 %vm1359_vm3, %v3158_v26 }
 0x865   : > { %v4565_v33 = vpop.f32.mrb[54].mxu0 }
 0x866   : > { %v3345_v34 = vpop.f32.mrb[55].mxu0  ;;  %v3545_v16 = vmul.f32 %v5099_v5, %v4565_v33 }
 0x867   : > { %v3544_v44 = vmul.f32 %v5099_v5, %v3345_v34 }
 0x869   : > { %v4568_v17 = vpop.f32.mrb[56].mxu0 }
 0x86a   : > { %v3355_v57 = vpop.f32.mrb[57].mxu0  ;;  %v3547_v27 = vmul.f32 %v5099_v5, %v4568_v17 }
 0x86b   : > { %v3546_v42 = vmul.f32 %v5099_v5, %v3355_v57 }
 0x86d   : > { %v4571_v7 = vpop.f32.mrb[58].mxu0 }
 0x86e   : > { %v3365_v50 = vpop.f32.mrb[59].mxu0  ;;  %v3549_v30 = vmul.f32 %v5099_v5, %v4571_v7 }
 0x86f   : > { %v3548_v31 = vmul.f32 %v5099_v5, %v3365_v50 }
 0x871   : > { %v4574_v9 = vpop.f32.mrb[60].mxu0 }
 0x872   : > { %v3375_v55 = vpop.f32.mrb[61].mxu0  ;;  %v3551_v41 = vmul.f32 %v5099_v5, %v4574_v9 }
 0x873   : > { %v3550_v11 = vmul.f32 %v5099_v5, %v3375_v55 }
 0x875   : > { %v4577_v10 = vpop.f32.mrb[62].mxu0 }
 0x876   : > { %v3385_v62 = vpop.f32.mrb[63].mxu0  ;;  %v3553_v43 = vmul.f32 %v5099_v5, %v4577_v10 }
 0x877   : > { %v3552_v61 = vmul.f32 %v5099_v5, %v3385_v62 }
 0x879   : > { %v4580_v12 = vpop.f32.mrb[64].mxu0 }
 0x87a   : > { %v3555_v2 = vmul.f32 %v5100_v39, %v4580_v12  ;;  %v3395_v52 = vpop.f32.mrb[65].mxu0 }
 0x87b   : > { %v3554_v13 = vmul.f32 %v5100_v39, %v3395_v52 }
 0x87c   : > { %v3565_v51 = vadd.f32 %v3555_v2, %v3545_v16 }
 0x87d   : > { %v3564_v28 = vadd.f32 %v3554_v13, %v3544_v44  ;;  %v4583_v21 = vpop.f32.mrb[66].mxu0 }
 0x87e   : > { %v3557_v29 = vmul.f32 %v5100_v39, %v4583_v21  ;;  %v3405_v45 = vpop.f32.mrb[67].mxu0 }
 0x87f   : > { %v3556_v8 = vmul.f32 %v5100_v39, %v3405_v45 }
 0x880   : > { %v3567_v24 = vadd.f32 %v3557_v29, %v3547_v27  ;;  %v5102_v27 = vld [vmem:[%s6751_s6 + $0x3] ss:$0 sm:$0xff] }
 0x881   : > { %v3566_v22 = vadd.f32 %v3556_v8, %v3546_v42  ;;  %v4586_v56 = vpop.f32.mrb[68].mxu0 }
 0x882   : > { %v3559_v49 = vmul.f32 %v5100_v39, %v4586_v56  ;;  %v3415_v1 = vpop.f32.mrb[69].mxu0 }
 0x883   : > { %v3558_v46 = vmul.f32 %v5100_v39, %v3415_v1 }
 0x884   : > { %v3569_v15 = vadd.f32 %v3559_v49, %v3549_v30 }
 0x885   : > { %v3568_v18 = vadd.f32 %v3558_v46, %v3548_v31  ;;  %v4589_v20 = vpop.f32.mrb[70].mxu0 }
 0x886   : > { %v3561_v47 = vmul.f32 %v5100_v39, %v4589_v20  ;;  %v3425_v6 = vpop.f32.mrb[71].mxu0 }
 0x887   : > { %v3560_v32 = vmul.f32 %v5100_v39, %v3425_v6 }
 0x888   : > { %v3571_v19 = vadd.f32 %v3561_v47, %v3551_v41 }
 0x889   : > { %v3570_v36 = vadd.f32 %v3560_v32, %v3550_v11  ;;  %v4592_v25 = vpop.f32.mrb[72].mxu0 }
 0x88a   : > { %v3563_v63 = vmul.f32 %v5100_v39, %v4592_v25  ;;  %v3435_v58 = vpop.f32.mrb[73].mxu0 }
 0x88b   : > { %v3562_v37 = vmul.f32 %v5100_v39, %v3435_v58 }
 0x88c   : > { %v3573_v53 = vadd.f32 %v3563_v63, %v3553_v43 }
 0x88d   : > { %v3572_v14 = vadd.f32 %v3562_v37, %v3552_v61  ;;  %v4595_v4 = vpop.f32.mrb[74].mxu0 }
 0x88e   : > { %v3575_v40 = vmul.f32 %v5101_v3, %v4595_v4  ;;  %v3445_v59 = vpop.f32.mrb[75].mxu0 }
 0x88f   : > { %v3574_v60 = vmul.f32 %v5101_v3, %v3445_v59 }
 0x890   : > { %v3585_v54 = vadd.f32 %v3575_v40, %v3565_v51 }
 0x891   : > { %v3584_v38 = vadd.f32 %v3574_v60, %v3564_v28  ;;  %v4598_v48 = vpop.f32.mrb[76].mxu0 }
 0x892   : > { %v3577_v23 = vmul.f32 %v5101_v3, %v4598_v48  ;;  %v3455_v35 = vpop.f32.mrb[77].mxu0 }
 0x893   : > { %v3576_v26 = vmul.f32 %v5101_v3, %v3455_v35 }
 0x894   : > { %v3587_v33 = vadd.f32 %v3577_v23, %v3567_v24 }
 0x895   : > { %v3586_v34 = vadd.f32 %v3576_v26, %v3566_v22  ;;  %v4601_v17 = vpop.f32.mrb[78].mxu0 }
 0x896   : > { %v3579_v57 = vmul.f32 %v5101_v3, %v4601_v17  ;;  %v3465_v7 = vpop.f32.mrb[79].mxu0 }
 0x897   : > { %v3578_v50 = vmul.f32 %v5101_v3, %v3465_v7 }
 0x898   : > { %v3589_v9 = vadd.f32 %v3579_v57, %v3569_v15 }
 0x899   : > { %v3588_v55 = vadd.f32 %v3578_v50, %v3568_v18  ;;  %v4604_v10 = vpop.f32.mrb[80].mxu0 }
 0x89a   : > { %v3581_v62 = vmul.f32 %v5101_v3, %v4604_v10  ;;  %v3475_v12 = vpop.f32.mrb[81].mxu0 }
 0x89b   : > { %v3580_v5 = vmul.f32 %v5101_v3, %v3475_v12 }
 0x89c   : > { %v3591_v16 = vadd.f32 %v3581_v62, %v3571_v19 }
 0x89d   : > { %v3590_v39 = vadd.f32 %v3580_v5, %v3570_v36  ;;  %v4607_v2 = vpop.f32.mrb[82].mxu0 }
 0x89e   : > { %v3583_v52 = vmul.f32 %v5101_v3, %v4607_v2  ;;  %v3485_v44 = vpop.f32.mrb[83].mxu0 }
 0x89f   : > { %v3582_v13 = vmul.f32 %v5101_v3, %v3485_v44 }
 0x8a0   : > { %v3593_v51 = vadd.f32 %v3583_v52, %v3573_v53 }
 0x8a1   : > { %v3592_v28 = vadd.f32 %v3582_v13, %v3572_v14  ;;  %v4610_v21 = vpop.f32.mrb[84].mxu0 }
 0x8a2   : > { %v3595_v29 = vmul.f32 %v5102_v27, %v4610_v21  ;;  %v3495_v45 = vpop.f32.mrb[85].mxu0 }
 0x8a3   : > { %v3594_v42 = vmul.f32 %v5102_v27, %v3495_v45 }
 0x8a4   : > { %v3605_v8 = vadd.f32 %v3595_v29, %v3585_v54 }
 0x8a5   : > { %v3604_v24 = vadd.f32 %v3594_v42, %v3584_v38  ;;  %v4613_v22 = vpop.f32.mrb[86].mxu0 }
 0x8a6   : > { %v3597_v56 = vmul.f32 %v5102_v27, %v4613_v22  ;;  %v3505_v30 = vpop.f32.mrb[87].mxu0 }
 0x8a7   : > { %v3596_v49 = vmul.f32 %v5102_v27, %v3505_v30  ;;  %4631 = vmatprep.mubr.msk.f32.mxu1 %vm632_vm1, %v3604_v24 }
 0x8a8   : > { %v3607_v1 = vadd.f32 %v3597_v56, %v3587_v33  ;;  %4632 = vmatmul.mubr.msk.f32.vlgmr.msra.gmra.mrb[88].mxu1 %vm632_vm1, %v3605_v8 }
 0x8a9   : > { %v3606_v31 = vadd.f32 %v3596_v49, %v3586_v34  ;;  %v4616_v46 = vpop.f32.mrb[88].mxu0 }
 0x8aa   : > { %v3599_v15 = vmul.f32 %v5102_v27, %v4616_v46  ;;  %v3515_v18 = vpop.f32.mrb[89].mxu0 }
 0x8ab   : > { %v3598_v20 = vmul.f32 %v5102_v27, %v3515_v18  ;;  %4634 = vmatprep.mubr.msk.f32.mxu1 %vm632_vm1, %v3606_v31 }
 0x8ac   : > { %v3609_v41 = vadd.f32 %v3599_v15, %v3589_v9  ;;  %4635 = vmatmul.mubr.msk.f32.gmra.mrb[90].mxu1 %vm632_vm1, %v3607_v1 }
 0x8ad   : > { %v3608_v47 = vadd.f32 %v3598_v20, %v3588_v55  ;;  %v4619_v6 = vpop.f32.mrb[90].mxu0 }
 0x8ae   : > { %v3601_v11 = vmul.f32 %v5102_v27, %v4619_v6  ;;  %v3525_v32 = vpop.f32.mrb[91].mxu0 }
 0x8af   : > { %v3600_v19 = vmul.f32 %v5102_v27, %v3525_v32  ;;  %4637 = vmatprep.mubr.msk.f32.mxu1 %vm632_vm1, %v3608_v47 }
 0x8b0   : > { %v3611_v36 = vadd.f32 %v3601_v11, %v3591_v16  ;;  %4638 = vmatmul.mubr.msk.f32.gmra.mrb[92].mxu1 %vm632_vm1, %v3609_v41 }
 0x8b1   : > { %v3610_v25 = vadd.f32 %v3600_v19, %v3590_v39  ;;  %v4622_v43 = vpop.f32.mrb[92].mxu0 }
 0x8b2   : > { %v3603_v63 = vmul.f32 %v5102_v27, %v4622_v43  ;;  %v3535_v58 = vpop.f32.mrb[93].mxu0 }
 0x8b3   : > { %v3602_v61 = vmul.f32 %v5102_v27, %v3535_v58  ;;  %4640 = vmatprep.mubr.msk.f32.mxu1 %vm632_vm1, %v3610_v25 }
 0x8b4   : > { %v3613_v37 = vadd.f32 %v3603_v63, %v3593_v51  ;;  %4641 = vmatmul.mubr.msk.f32.gmra.mrb[94].mxu1 %vm632_vm1, %v3611_v36 }
 0x8b5   : > { %v3612_v53 = vadd.f32 %v3602_v61, %v3592_v28 }
 0x8b7   : > { %4643 = vmatprep.mubr.msk.f32.mxu1 %vm632_vm1, %v3612_v53 }
 0x8b8   : > { %4644 = vmatmul.mubr.msk.f32.gmra.mrb[96].mxu1 %vm632_vm1, %v3613_v37 }
 0x97b   : > { %v4633_v14 = vpop.f32.mrb[88].mxu1 }
 0x97c   : > { %v3716_v4 = vadd.f32 %v4633_v14, %v6473_v0  ;;  %v3710_v3 = vpop.f32.mrb[89].mxu1 }
 0x97d   : > { %v3711_v40 = vadd.f32 %v6473_v0, %v3710_v3 }
 0x97e   : > { %4058 = vst.msk [vmem:[%s6482_s27 + $0x58] sm:$0xff] %vm632_vm1, %v3716_v4 }
 0x97f   : > { %4057 = vst.msk [vmem:[%s6482_s27 + $0x50] sm:$0xff] %vm632_vm1, %v3711_v40  ;;  %v4636_v59 = vpop.f32.mrb[90].mxu1 }
 0x980   : > { %v3726_v60 = vadd.f32 %v4636_v59, %v6473_v0  ;;  %v3720_v54 = vpop.f32.mrb[91].mxu1 }
 0x981   : > { %v3721_v38 = vadd.f32 %v6473_v0, %v3720_v54 }
 0x982   : > { %4060 = vst.msk [vmem:[%s6482_s27 + $0x68] sm:$0xff] %vm632_vm1, %v3726_v60 }
 0x983   : > { %4059 = vst.msk [vmem:[%s6482_s27 + $0x60] sm:$0xff] %vm632_vm1, %v3721_v38  ;;  %v4639_v48 = vpop.f32.mrb[92].mxu1 }
 0x984   : > { %v3736_v23 = vadd.f32 %v4639_v48, %v6473_v0  ;;  %v3730_v35 = vpop.f32.mrb[93].mxu1 }
 0x985   : > { %v3731_v26 = vadd.f32 %v6473_v0, %v3730_v35 }
 0x986   : > { %4062 = vst.msk [vmem:[%s6482_s27 + $0x78] sm:$0xff] %vm632_vm1, %v3736_v23 }
 0x987   : > { %4061 = vst.msk [vmem:[%s6482_s27 + $0x70] sm:$0xff] %vm632_vm1, %v3731_v26  ;;  %v4642_v33 = vpop.f32.mrb[94].mxu1 }
 0x988   : > { %v3746_v34 = vadd.f32 %v4642_v33, %v6473_v0  ;;  %v3740_v17 = vpop.f32.mrb[95].mxu1 }
 0x989   : > { %v3741_v57 = vadd.f32 %v6473_v0, %v3740_v17 }
 0x98a   : > { %4064 = vst.msk [vmem:[%s6482_s27 + $0x88] sm:$0xff] %vm632_vm1, %v3746_v34 }
 0x98b   : > { %4063 = vst.msk [vmem:[%s6482_s27 + $0x80] sm:$0xff] %vm632_vm1, %v3741_v57  ;;  %v4645_v7 = vpop.f32.mrb[96].mxu1 }
 0x98c   : > { %v3756_v50 = vadd.f32 %v4645_v7, %v6473_v0  ;;  %v3750_v9 = vpop.f32.mrb[97].mxu1 }
 0x98d   : > { %v3751_v55 = vadd.f32 %v6473_v0, %v3750_v9 }
 0x98e   : > { %4066 = vst.msk [vmem:[%s6482_s27 + $0x98] sm:$0xff] %vm632_vm1, %v3756_v50 }
 0x98f   : > { %4065 = vst.msk [vmem:[%s6482_s27 + $0x90] sm:$0xff] %vm632_vm1, %v3751_v55 }
 0x990 PF: > { %s24_s29 = sadd.s32 1, %s5109_s29  }
 0x991   : > { %p21_p4 = scmp.ge.s32.totalorder %s24_s29, 4  }
 0x993   :  { %23 = sbr.rel (!%p21_p4) target bundleno = 1 (0x1), region = 111 }

</bundles_post_ra>
